<compile_context>
chip_gen: v5e
topology: v5e:2x2
jax: 0.10.0
libtpu: 0.0.40
codegen_flags: <defaults>
</compile_context>

<pallas_src>
import numpy as np

import jax
import jax.numpy as jnp
from jax.experimental import pallas as pl
from jax.experimental.pallas import tpu as pltpu

# ----------------------------------------------------------------------------
# Model configuration (small shapes consistent with the module's forward)
# ----------------------------------------------------------------------------
N_POINTS = 128
PT_IN = 6                                 # concat(rgb, xyz)
PT_H, PT_F = 64, 64                       # point MLP hidden / global feature
LANG_IN, LANG_H, LANG_OUT = 32, 32, 16
PROPRIO_IN, PROPRIO_OUT = 8, 16
PROPRIO_EMB_H, PROPRIO_EMB_OUT = 16, 16
TIME_IN, TIME_H, TIME_OUT = 4, 16, 8
HIDDEN = 32                               # GRU hidden dim
PRE_H, PRE_OUT = 64, 32                   # pre_process MLP -> GRU input
POST_H, FINAL = 64, 32                    # post_process MLP -> final_dim
GRIP_H1, GRIP_H2 = 32, 16                 # gripper_mlp hidden dims
POS_CH, ORI_CH = 3, 4                     # pos_in_channels, quaternion
HEAD_DIM = POS_CH + ORI_CH + 1            # packed head output: pos|ori|grip

CAT_DIM = PT_F + LANG_OUT + PROPRIO_EMB_OUT + TIME_OUT          # 104
PTE_DIM = LANG_OUT + PROPRIO_EMB_OUT + TIME_OUT                 # 40

# Flat ordering of the (pre-split / pre-packed) weight arrays fed to the kernel.
PARAM_ORDER = (
    # point-cloud MLP (rgb|xyz pre-concatenated outside the kernel)
    "pt_w1", "pt_b1", "pt_w2", "pt_b2",
    # language / proprio / time embeddings
    "lang_w1", "lang_b1", "lang_w2", "lang_b2",
    "pp_w", "pp_b",
    "pe_w1", "pe_b1", "pe_w2", "pe_b2",
    "t_w1", "t_b1", "t_w2", "t_b2",
    # pre-process MLP (pre_w1 split over [pt|lang|prop|time] rows -> no concat)
    "pre_w1_pt", "pre_w1_lang", "pre_w1_prop", "pre_w1_time", "pre_b1",
    "pre_w2", "pre_b2",
    # GRU cell
    "gru_wih", "gru_whh", "gru_bih", "gru_bhh",
    # post-process MLP
    "post_w1", "post_b1", "post_w2", "post_b2",
    # QueryRegressionHead: pos_linear + ori_linear packed into one (FINAL, 8)
    "head_po_w", "head_po_b",
    # gripper path (g1_w split over [lang|prop|time] rows -> no concat)
    "g1_w_lang", "g1_w_prop", "g1_w_time", "g1_b",
    "g2_w", "g2_b", "gl_w", "gl_b",
)
_N_DATA = 5
_N_W = len(PARAM_ORDER)


# ----------------------------------------------------------------------------
# Fused single-invocation Pallas kernel (whole T-step forward, no grid)
# ----------------------------------------------------------------------------
def _make_kernel(T, n_pts):
    def kernel(*refs):
        pts_ref, proprio_ref, time_ref, lang_ref, h0_ref = refs[:_N_DATA]
        w = dict(zip(PARAM_ORDER, refs[_N_DATA:_N_DATA + _N_W]))
        head_ref, hid_ref, gx_sc, h_sc = refs[_N_DATA + _N_W:]

        def W(name):                       # point-of-use weight load
            return w[name][...]

        def dot(a, b):
            return jnp.dot(a, b, preferred_element_type=jnp.float32)

        def relu(a):
            return jnp.maximum(a, 0.0)

        # ---- batched (over T) language / proprio / time embeddings ---------
        lang_emb = dot(relu(dot(lang_ref[...], W("lang_w1")) + W("lang_b1")),
                       W("lang_w2")) + W("lang_b2")               # (T, 16)
        pp = relu(dot(proprio_ref[...], W("pp_w")) + W("pp_b"))   # DenseBlock
        proprio_emb = dot(relu(dot(pp, W("pe_w1")) + W("pe_b1")),
                          W("pe_w2")) + W("pe_b2")                # (T, 16)
        time_emb = dot(relu(dot(time_ref[...], W("t_w1")) + W("t_b1")),
                       W("t_w2")) + W("t_b2")                     # (T, 8)

        # ---- point MLP over ALL T*N points at once, per-step max pool ------
        hp = relu(dot(pts_ref[...], W("pt_w1")) + W("pt_b1"))     # (T*N, 64)
        hp = relu(dot(hp, W("pt_w2")) + W("pt_b2"))               # (T*N, 64)
        x_pt = jnp.max(hp.reshape(T, n_pts, PT_F), axis=1)        # (T, 64)

        # ---- pre-process MLP (split-weight partial dots replace concat) ----
        pre = relu(dot(x_pt, W("pre_w1_pt"))
                   + dot(lang_emb, W("pre_w1_lang"))
                   + dot(proprio_emb, W("pre_w1_prop"))
                   + dot(time_emb, W("pre_w1_time"))
                   + W("pre_b1"))                                 # (T, 64)
        x = relu(dot(pre, W("pre_w2")) + W("pre_b2"))             # (T, 32)

        # ---- GRU: input projection batched over T, recurrence serial -------
        gx_sc[...] = dot(x, W("gru_wih")) + W("gru_bih")          # (T, 3H)
        w_hh = W("gru_whh")          # reused every step -> hoist out of loop
        b_hh = W("gru_bhh")
        H = HIDDEN

        def gru_step(t, h):
            gx = gx_sc[pl.ds(t, 1), :]                            # (1, 3H)
            gh = dot(h, w_hh) + b_hh                              # (1, 3H)
            r = jax.nn.sigmoid(gx[:, 0:H] + gh[:, 0:H])
            z = jax.nn.sigmoid(gx[:, H:2 * H] + gh[:, H:2 * H])
            n = jnp.tanh(gx[:, 2 * H:3 * H] + r * gh[:, 2 * H:3 * H])
            h_new = (1.0 - z) * n + z * h
            h_sc[pl.ds(t, 1), :] = h_new
            return h_new

        h_final = jax.lax.fori_loop(0, T, gru_step, h0_ref[...], unroll=True)

        # ---- post-process MLP + QueryRegressionHead, batched over T --------
        x2 = relu(dot(h_sc[...], W("post_w1")) + W("post_b1"))
        x2 = relu(dot(x2, W("post_w2")) + W("post_b2"))           # (T, FINAL)

        # pos_linear & ori_linear packed into a single (FINAL, 8) weight:
        # lanes [0:3]=delta_ee_pos, [3:7]=abs_ee_ori, [7]=padding -> gripper
        po = dot(x2, W("head_po_w")) + W("head_po_b")             # (T, 8)
        lanes = jax.lax.broadcasted_iota(jnp.int32, (T, HEAD_DIM), 1)
        ori_mask = jnp.logical_and(lanes >= POS_CH, lanes < POS_CH + ORI_CH)
        ssq = jnp.sum(jnp.where(ori_mask, po * po, 0.0), axis=-1, keepdims=True)
        po = jnp.where(ori_mask, po * jax.lax.rsqrt(ssq + 1e-8), po)

        # gripper = sigmoid(gripper_linear(relu(gripper_mlp(proprio_task_emb))))
        g = relu(dot(lang_emb, W("g1_w_lang"))
                 + dot(proprio_emb, W("g1_w_prop"))
                 + dot(time_emb, W("g1_w_time"))
                 + W("g1_b"))
        g = relu(dot(g, W("g2_w")) + W("g2_b"))
        grip = jax.nn.sigmoid(dot(g, W("gl_w")) + W("gl_b"))      # (T, 1)

        # single dense store of the packed head; final hidden stored once
        head_ref[...] = jnp.where(lanes == POS_CH + ORI_CH, grip, po)
        hid_ref[...] = h_final

    return kernel


def fused_forward(wq, rgb_seq, xyz_seq, proprio_seq, time_seq, lang_seq, h0):
    """Runs the whole T-step module forward in ONE no-grid pallas_call.

    rgb_seq/xyz_seq: (T, N, 3); proprio_seq: (T, 1, 8); time_seq: (T, 1, 4);
    lang_seq: (T, 1, 32); h0: (1, HIDDEN).  T=1 reproduces a single call.
    """
    T, n_pts, _ = rgb_seq.shape

    # one-time, cheap XLA-side input repacking (outside the kernel)
    pts = jnp.concatenate([rgb_seq, xyz_seq], axis=-1).reshape(T * n_pts, PT_IN)
    proprio = proprio_seq.reshape(T, PROPRIO_IN)
    tvec = time_seq.reshape(T, TIME_IN)
    lang = lang_seq.reshape(T, LANG_IN)

    vmem = pltpu.MemorySpace.VMEM
    n_in = _N_DATA + _N_W

    head, hid = pl.pallas_call(
        _make_kernel(T, n_pts),
        out_shape=(jax.ShapeDtypeStruct((T, HEAD_DIM), jnp.float32),
                   jax.ShapeDtypeStruct((1, HIDDEN), jnp.float32)),
        in_specs=[pl.BlockSpec(memory_space=vmem)] * n_in,
        out_specs=(pl.BlockSpec(memory_space=vmem),
                   pl.BlockSpec(memory_space=vmem)),
        scratch_shapes=[pltpu.VMEM((T, 3 * HIDDEN), jnp.float32),  # gx cache
                        pltpu.VMEM((T, HIDDEN), jnp.float32)],     # h_t cache
    )(pts, proprio, tvec, lang, h0, *[wq[name] for name in PARAM_ORDER])

    positions = head[:, :POS_CH]                       # (T, 3)
    orientations = head[:, POS_CH:POS_CH + ORI_CH]     # (T, 4)
    grippers = head[:, POS_CH + ORI_CH:]               # (T, 1)
    return positions, orientations, grippers, hid      # hid: (1, HIDDEN)


# ----------------------------------------------------------------------------
# Parameter setup (deterministic, synthetic) and pre-split packing
# ----------------------------------------------------------------------------
def _init_linear(key, din, dout):
    kw, kb = jax.random.split(key)
    w = jax.random.normal(kw, (din, dout), jnp.float32) / jnp.sqrt(float(din))
    b = 0.01 * jax.random.normal(kb, (1, dout), jnp.float32)
    return w, b


def init_params(key):
    keys = jax.random.split(key, 16)
    p = {}
    p["pt_w1"], p["pt_b1"] = _init_linear(keys[0], PT_IN, PT_H)
    p["pt_w2"], p["pt_b2"] = _init_linear(keys[1], PT_H, PT_F)
    p["lang_w1"], p["lang_b1"] = _init_linear(keys[2], LANG_IN, LANG_H)
    p["lang_w2"], p["lang_b2"] = _init_linear(keys[3], LANG_H, LANG_OUT)
    p["pp_w"], p["pp_b"] = _init_linear(keys[4], PROPRIO_IN, PROPRIO_OUT)
    p["pe_w1"], p["pe_b1"] = _init_linear(keys[5], PROPRIO_OUT, PROPRIO_EMB_H)
    p["pe_w2"], p["pe_b2"] = _init_linear(keys[6], PROPRIO_EMB_H, PROPRIO_EMB_OUT)
    p["t_w1"], p["t_b1"] = _init_linear(keys[7], TIME_IN, TIME_H)
    p["t_w2"], p["t_b2"] = _init_linear(keys[8], TIME_H, TIME_OUT)
    p["pre_w1"], p["pre_b1"] = _init_linear(keys[9], CAT_DIM, PRE_H)
    p["pre_w2"], p["pre_b2"] = _init_linear(keys[10], PRE_H, PRE_OUT)
    p["gru_wih"], p["gru_bih"] = _init_linear(keys[11], PRE_OUT, 3 * HIDDEN)
    p["gru_whh"], p["gru_bhh"] = _init_linear(keys[12], HIDDEN, 3 * HIDDEN)
    p["post_w1"], p["post_b1"] = _init_linear(keys[13], HIDDEN, POST_H)
    p["post_w2"], p["post_b2"] = _init_linear(keys[14], POST_H, FINAL)
    hk = jax.random.split(keys[15], 6)
    p["pos_w"], p["pos_b"] = _init_linear(hk[0], FINAL, POS_CH)
    p["ori_w"], p["ori_b"] = _init_linear(hk[1], FINAL, ORI_CH)
    p["g1_w"], p["g1_b"] = _init_linear(hk[2], PTE_DIM, GRIP_H1)
    p["g2_w"], p["g2_b"] = _init_linear(hk[3], GRIP_H1, GRIP_H2)
    p["gl_w"], p["gl_b"] = _init_linear(hk[4], GRIP_H2, 1)
    return p


def pack_params(p):
    """Repack the original parameterization into the split/packed kernel form.

    Pure one-time repacking, done outside the kernel:
      * pre_w1 rows split over [pt|lang|prop|time] and g1_w rows split over
        [lang|prop|time]  (removes all in-kernel feature concatenates);
      * pos_linear + ori_linear packed into one (FINAL, 8) matrix with a zero
        padding column so the head is one dot + one lane-dense store.
    """
    q = {k: p[k] for k in (
        "pt_w1", "pt_b1", "pt_w2", "pt_b2",
        "lang_w1", "lang_b1", "lang_w2", "lang_b2",
        "pp_w", "pp_b", "pe_w1", "pe_b1", "pe_w2", "pe_b2",
        "t_w1", "t_b1", "t_w2", "t_b2",
        "pre_b1", "pre_w2", "pre_b2",
        "gru_wih", "gru_whh", "gru_bih", "gru_bhh",
        "post_w1", "post_b1", "post_w2", "post_b2",
        "g1_b", "g2_w", "g2_b", "gl_w", "gl_b")}
    o = 0
    q["pre_w1_pt"] = p["pre_w1"][o:o + PT_F]; o += PT_F
    q["pre_w1_lang"] = p["pre_w1"][o:o + LANG_OUT]; o += LANG_OUT
    q["pre_w1_prop"] = p["pre_w1"][o:o + PROPRIO_EMB_OUT]; o += PROPRIO_EMB_OUT
    q["pre_w1_time"] = p["pre_w1"][o:o + TIME_OUT]
    o = 0
    q["g1_w_lang"] = p["g1_w"][o:o + LANG_OUT]; o += LANG_OUT
    q["g1_w_prop"] = p["g1_w"][o:o + PROPRIO_EMB_OUT]; o += PROPRIO_EMB_OUT
    q["g1_w_time"] = p["g1_w"][o:o + TIME_OUT]
    q["head_po_w"] = jnp.concatenate(
        [p["pos_w"], p["ori_w"], jnp.zeros((FINAL, 1), jnp.float32)], axis=1)
    q["head_po_b"] = jnp.concatenate(
        [p["pos_b"], p["ori_b"], jnp.zeros((1, 1), jnp.float32)], axis=1)
    return q


# ----------------------------------------------------------------------------
# Pure-JAX reference (original unsplit parameterization, HIGHEST precision)
# ----------------------------------------------------------------------------
def reference_forward(p, rgb_seq, xyz_seq, proprio_seq, time_seq, lang_seq, h0):
    hi = jax.lax.Precision.HIGHEST
    rdot = lambda a, b: jnp.dot(a, b, precision=hi)
    relu = lambda a: jnp.maximum(a, 0.0)
    T = rgb_seq.shape[0]
    h = h0
    poss, oris, grips = [], [], []
    for t in range(T):
        rgb, xyz = rgb_seq[t], xyz_seq[t]
        proprio, tv, lang = proprio_seq[t], time_seq[t], lang_seq[t]
        lang_emb = rdot(relu(rdot(lang, p["lang_w1"]) + p["lang_b1"]),
                        p["lang_w2"]) + p["lang_b2"]
        pp = relu(rdot(proprio, p["pp_w"]) + p["pp_b"])
        proprio_emb = rdot(relu(rdot(pp, p["pe_w1"]) + p["pe_b1"]),
                           p["pe_w2"]) + p["pe_b2"]
        time_emb = rdot(relu(rdot(tv, p["t_w1"]) + p["t_b1"]),
                        p["t_w2"]) + p["t_b2"]
        pts = jnp.concatenate([rgb, xyz], axis=-1)
        hp = relu(rdot(pts, p["pt_w1"]) + p["pt_b1"])
        hp = relu(rdot(hp, p["pt_w2"]) + p["pt_b2"])
        x_pt = jnp.max(hp, axis=0, keepdims=True)
        xc = jnp.concatenate([x_pt, lang_emb, proprio_emb, time_emb], axis=-1)
        pte = jnp.concatenate([lang_emb, proprio_emb, time_emb], axis=-1)
        x = relu(rdot(relu(rdot(xc, p["pre_w1"]) + p["pre_b1"]),
                      p["pre_w2"]) + p["pre_b2"])
        gx = rdot(x, p["gru_wih"]) + p["gru_bih"]
        gh = rdot(h, p["gru_whh"]) + p["gru_bhh"]
        H = HIDDEN
        r = jax.nn.sigmoid(gx[:, 0:H] + gh[:, 0:H])
        z = jax.nn.sigmoid(gx[:, H:2 * H] + gh[:, H:2 * H])
        n = jnp.tanh(gx[:, 2 * H:3 * H] + r * gh[:, 2 * H:3 * H])
        h = (1.0 - z) * n + z * h
        x2 = relu(rdot(relu(rdot(h, p["post_w1"]) + p["post_b1"]),
                       p["post_w2"]) + p["post_b2"])
        pos = rdot(x2, p["pos_w"]) + p["pos_b"]
        ori = rdot(x2, p["ori_w"]) + p["ori_b"]
        ori = ori * jax.lax.rsqrt(jnp.sum(ori * ori, axis=-1, keepdims=True) + 1e-8)
        g = relu(rdot(relu(rdot(pte, p["g1_w"]) + p["g1_b"]),
                      p["g2_w"]) + p["g2_b"])
        grip = jax.nn.sigmoid(rdot(g, p["gl_w"]) + p["gl_b"])
        poss.append(pos); oris.append(ori); grips.append(grip)
    return (jnp.concatenate(poss, axis=0), jnp.concatenate(oris, axis=0),
            jnp.concatenate(grips, axis=0), h)


# ----------------------------------------------------------------------------
if __name__ == "__main__":
    key = jax.random.PRNGKey(0)
    k_param, k_xyz, k_rgb, k_prop, k_time, k_lang = jax.random.split(key, 6)

    T_STEPS = 4
    params = init_params(k_param)
    packed = pack_params(params)

    xyz_seq = jax.random.normal(k_xyz, (T_STEPS, N_POINTS, 3), jnp.float32)
    rgb_seq = jax.random.uniform(k_rgb, (T_STEPS, N_POINTS, 3), jnp.float32)
    proprio_seq = jax.random.normal(k_prop, (T_STEPS, 1, PROPRIO_IN), jnp.float32)
    time_seq = jax.random.normal(k_time, (T_STEPS, 1, TIME_IN), jnp.float32)
    lang_seq = jax.random.normal(k_lang, (T_STEPS, 1, LANG_IN), jnp.float32)
    h0 = jnp.zeros((1, HIDDEN), jnp.float32)

    fwd = jax.jit(fused_forward)
    positions, orientations, grippers, hidden_out = fwd(
        packed, rgb_seq, xyz_seq, proprio_seq, time_seq, lang_seq, h0)
    jax.block_until_ready((positions, orientations, grippers, hidden_out))

    assert positions.shape == (T_STEPS, POS_CH)
    assert orientations.shape == (T_STEPS, ORI_CH)
    assert grippers.shape == (T_STEPS, 1)
    assert hidden_out.shape == (1, HIDDEN)

    ref_pos, ref_ori, ref_grip, ref_hid = reference_forward(
        params, rgb_seq, xyz_seq, proprio_seq, time_seq, lang_seq, h0)
    np.testing.assert_allclose(np.asarray(positions), np.asarray(ref_pos),
                               rtol=1e-3, atol=1e-4)
    np.testing.assert_allclose(np.asarray(orientations), np.asarray(ref_ori),
                               rtol=1e-3, atol=1e-4)
    np.testing.assert_allclose(np.asarray(grippers), np.asarray(ref_grip),
                               rtol=1e-3, atol=1e-4)
    np.testing.assert_allclose(np.asarray(hidden_out), np.asarray(ref_hid),
                               rtol=1e-3, atol=1e-4)

    print("KERNEL_OK")
</pallas_src>

<mosaic_0001>
module attributes {stable_mosaic.version = 11 : i64} {
  func.func @kernel(%arg0: memref<512x6xf32, #tpu.memory_space<vmem>>, %arg1: memref<4x8xf32, #tpu.memory_space<vmem>>, %arg2: memref<4x4xf32, #tpu.memory_space<vmem>>, %arg3: memref<4x32xf32, #tpu.memory_space<vmem>>, %arg4: memref<1x32xf32, #tpu.memory_space<vmem>>, %arg5: memref<6x64xf32, #tpu.memory_space<vmem>>, %arg6: memref<1x64xf32, #tpu.memory_space<vmem>>, %arg7: memref<64x64xf32, #tpu.memory_space<vmem>>, %arg8: memref<1x64xf32, #tpu.memory_space<vmem>>, %arg9: memref<32x32xf32, #tpu.memory_space<vmem>>, %arg10: memref<1x32xf32, #tpu.memory_space<vmem>>, %arg11: memref<32x16xf32, #tpu.memory_space<vmem>>, %arg12: memref<1x16xf32, #tpu.memory_space<vmem>>, %arg13: memref<8x16xf32, #tpu.memory_space<vmem>>, %arg14: memref<1x16xf32, #tpu.memory_space<vmem>>, %arg15: memref<16x16xf32, #tpu.memory_space<vmem>>, %arg16: memref<1x16xf32, #tpu.memory_space<vmem>>, %arg17: memref<16x16xf32, #tpu.memory_space<vmem>>, %arg18: memref<1x16xf32, #tpu.memory_space<vmem>>, %arg19: memref<4x16xf32, #tpu.memory_space<vmem>>, %arg20: memref<1x16xf32, #tpu.memory_space<vmem>>, %arg21: memref<16x8xf32, #tpu.memory_space<vmem>>, %arg22: memref<1x8xf32, #tpu.memory_space<vmem>>, %arg23: memref<64x64xf32, #tpu.memory_space<vmem>>, %arg24: memref<16x64xf32, #tpu.memory_space<vmem>>, %arg25: memref<16x64xf32, #tpu.memory_space<vmem>>, %arg26: memref<8x64xf32, #tpu.memory_space<vmem>>, %arg27: memref<1x64xf32, #tpu.memory_space<vmem>>, %arg28: memref<64x32xf32, #tpu.memory_space<vmem>>, %arg29: memref<1x32xf32, #tpu.memory_space<vmem>>, %arg30: memref<32x96xf32, #tpu.memory_space<vmem>>, %arg31: memref<32x96xf32, #tpu.memory_space<vmem>>, %arg32: memref<1x96xf32, #tpu.memory_space<vmem>>, %arg33: memref<1x96xf32, #tpu.memory_space<vmem>>, %arg34: memref<32x64xf32, #tpu.memory_space<vmem>>, %arg35: memref<1x64xf32, #tpu.memory_space<vmem>>, %arg36: memref<64x32xf32, #tpu.memory_space<vmem>>, %arg37: memref<1x32xf32, #tpu.memory_space<vmem>>, %arg38: memref<32x8xf32, #tpu.memory_space<vmem>>, %arg39: memref<1x8xf32, #tpu.memory_space<vmem>>, %arg40: memref<16x32xf32, #tpu.memory_space<vmem>>, %arg41: memref<16x32xf32, #tpu.memory_space<vmem>>, %arg42: memref<8x32xf32, #tpu.memory_space<vmem>>, %arg43: memref<1x32xf32, #tpu.memory_space<vmem>>, %arg44: memref<32x16xf32, #tpu.memory_space<vmem>>, %arg45: memref<1x16xf32, #tpu.memory_space<vmem>>, %arg46: memref<16x1xf32, #tpu.memory_space<vmem>>, %arg47: memref<1x1xf32, #tpu.memory_space<vmem>>, %arg48: memref<4x8xf32, #tpu.memory_space<vmem>>, %arg49: memref<1x32xf32, #tpu.memory_space<vmem>>, %arg50: memref<4x96xf32, #tpu.memory_space<vmem>>, %arg51: memref<4x32xf32, #tpu.memory_space<vmem>>) attributes {dimension_semantics = [], scalar_prefetch = 0 : i64, scratch_operands = 2 : i64, tpu.core_type = #tpu.core_type<tc>} {
    %c0 = arith.constant 0 : index
    %c0_0 = arith.constant 0 : index
    %0 = vector.load %arg3[%c0, %c0_0] : memref<4x32xf32, #tpu.memory_space<vmem>>, vector<4x32xf32>
    %c0_1 = arith.constant 0 : index
    %c0_2 = arith.constant 0 : index
    %1 = vector.load %arg9[%c0_1, %c0_2] : memref<32x32xf32, #tpu.memory_space<vmem>>, vector<32x32xf32>
    %cst = arith.constant dense<0.000000e+00> : vector<4x32xf32>
    %2 = tpu.matmul %0, %1, %cst {dimension_numbers = #tpu.dot_dimension_numbers<[1], [0], [0], [1], [0, 0, 1, 1], [], []>} : vector<4x32xf32>, vector<32x32xf32>, vector<4x32xf32> -> vector<4x32xf32>
    %c0_3 = arith.constant 0 : index
    %c0_4 = arith.constant 0 : index
    %3 = vector.load %arg10[%c0_3, %c0_4] : memref<1x32xf32, #tpu.memory_space<vmem>>, vector<1x32xf32>
    %4 = vector.broadcast %3 : vector<1x32xf32> to vector<4x32xf32>
    %5 = arith.addf %2, %4 : vector<4x32xf32>
    %cst_5 = arith.constant 0.000000e+00 : f32
    %6 = vector.broadcast %cst_5 : f32 to vector<4x32xf32>
    %7 = arith.maximumf %5, %6 : vector<4x32xf32>
    %c0_6 = arith.constant 0 : index
    %c0_7 = arith.constant 0 : index
    %8 = vector.load %arg11[%c0_6, %c0_7] : memref<32x16xf32, #tpu.memory_space<vmem>>, vector<32x16xf32>
    %cst_8 = arith.constant dense<0.000000e+00> : vector<4x16xf32>
    %9 = tpu.matmul %7, %8, %cst_8 {dimension_numbers = #tpu.dot_dimension_numbers<[1], [0], [0], [1], [0, 0, 1, 1], [], []>} : vector<4x32xf32>, vector<32x16xf32>, vector<4x16xf32> -> vector<4x16xf32>
    %c0_9 = arith.constant 0 : index
    %c0_10 = arith.constant 0 : index
    %10 = vector.load %arg12[%c0_9, %c0_10] : memref<1x16xf32, #tpu.memory_space<vmem>>, vector<1x16xf32>
    %11 = vector.broadcast %10 : vector<1x16xf32> to vector<4x16xf32>
    %12 = arith.addf %9, %11 : vector<4x16xf32>
    %c0_11 = arith.constant 0 : index
    %c0_12 = arith.constant 0 : index
    %13 = vector.load %arg1[%c0_11, %c0_12] : memref<4x8xf32, #tpu.memory_space<vmem>>, vector<4x8xf32>
    %c0_13 = arith.constant 0 : index
    %c0_14 = arith.constant 0 : index
    %14 = vector.load %arg13[%c0_13, %c0_14] : memref<8x16xf32, #tpu.memory_space<vmem>>, vector<8x16xf32>
    %cst_15 = arith.constant dense<0.000000e+00> : vector<4x16xf32>
    %15 = tpu.matmul %13, %14, %cst_15 {dimension_numbers = #tpu.dot_dimension_numbers<[1], [0], [0], [1], [0, 0, 1, 1], [], []>} : vector<4x8xf32>, vector<8x16xf32>, vector<4x16xf32> -> vector<4x16xf32>
    %c0_16 = arith.constant 0 : index
    %c0_17 = arith.constant 0 : index
    %16 = vector.load %arg14[%c0_16, %c0_17] : memref<1x16xf32, #tpu.memory_space<vmem>>, vector<1x16xf32>
    %17 = vector.broadcast %16 : vector<1x16xf32> to vector<4x16xf32>
    %18 = arith.addf %15, %17 : vector<4x16xf32>
    %cst_18 = arith.constant 0.000000e+00 : f32
    %19 = vector.broadcast %cst_18 : f32 to vector<4x16xf32>
    %20 = arith.maximumf %18, %19 : vector<4x16xf32>
    %c0_19 = arith.constant 0 : index
    %c0_20 = arith.constant 0 : index
    %21 = vector.load %arg15[%c0_19, %c0_20] : memref<16x16xf32, #tpu.memory_space<vmem>>, vector<16x16xf32>
    %cst_21 = arith.constant dense<0.000000e+00> : vector<4x16xf32>
    %22 = tpu.matmul %20, %21, %cst_21 {dimension_numbers = #tpu.dot_dimension_numbers<[1], [0], [0], [1], [0, 0, 1, 1], [], []>} : vector<4x16xf32>, vector<16x16xf32>, vector<4x16xf32> -> vector<4x16xf32>
    %c0_22 = arith.constant 0 : index
    %c0_23 = arith.constant 0 : index
    %23 = vector.load %arg16[%c0_22, %c0_23] : memref<1x16xf32, #tpu.memory_space<vmem>>, vector<1x16xf32>
    %24 = vector.broadcast %23 : vector<1x16xf32> to vector<4x16xf32>
    %25 = arith.addf %22, %24 : vector<4x16xf32>
    %cst_24 = arith.constant 0.000000e+00 : f32
    %26 = vector.broadcast %cst_24 : f32 to vector<4x16xf32>
    %27 = arith.maximumf %25, %26 : vector<4x16xf32>
    %c0_25 = arith.constant 0 : index
    %c0_26 = arith.constant 0 : index
    %28 = vector.load %arg17[%c0_25, %c0_26] : memref<16x16xf32, #tpu.memory_space<vmem>>, vector<16x16xf32>
    %cst_27 = arith.constant dense<0.000000e+00> : vector<4x16xf32>
    %29 = tpu.matmul %27, %28, %cst_27 {dimension_numbers = #tpu.dot_dimension_numbers<[1], [0], [0], [1], [0, 0, 1, 1], [], []>} : vector<4x16xf32>, vector<16x16xf32>, vector<4x16xf32> -> vector<4x16xf32>
    %c0_28 = arith.constant 0 : index
    %c0_29 = arith.constant 0 : index
    %30 = vector.load %arg18[%c0_28, %c0_29] : memref<1x16xf32, #tpu.memory_space<vmem>>, vector<1x16xf32>
    %31 = vector.broadcast %30 : vector<1x16xf32> to vector<4x16xf32>
    %32 = arith.addf %29, %31 : vector<4x16xf32>
    %c0_30 = arith.constant 0 : index
    %c0_31 = arith.constant 0 : index
    %33 = vector.load %arg2[%c0_30, %c0_31] : memref<4x4xf32, #tpu.memory_space<vmem>>, vector<4x4xf32>
    %c0_32 = arith.constant 0 : index
    %c0_33 = arith.constant 0 : index
    %34 = vector.load %arg19[%c0_32, %c0_33] : memref<4x16xf32, #tpu.memory_space<vmem>>, vector<4x16xf32>
    %cst_34 = arith.constant dense<0.000000e+00> : vector<4x16xf32>
    %35 = tpu.matmul %33, %34, %cst_34 {dimension_numbers = #tpu.dot_dimension_numbers<[1], [0], [0], [1], [0, 0, 1, 1], [], []>} : vector<4x4xf32>, vector<4x16xf32>, vector<4x16xf32> -> vector<4x16xf32>
    %c0_35 = arith.constant 0 : index
    %c0_36 = arith.constant 0 : index
    %36 = vector.load %arg20[%c0_35, %c0_36] : memref<1x16xf32, #tpu.memory_space<vmem>>, vector<1x16xf32>
    %37 = vector.broadcast %36 : vector<1x16xf32> to vector<4x16xf32>
    %38 = arith.addf %35, %37 : vector<4x16xf32>
    %cst_37 = arith.constant 0.000000e+00 : f32
    %39 = vector.broadcast %cst_37 : f32 to vector<4x16xf32>
    %40 = arith.maximumf %38, %39 : vector<4x16xf32>
    %c0_38 = arith.constant 0 : index
    %c0_39 = arith.constant 0 : index
    %41 = vector.load %arg21[%c0_38, %c0_39] : memref<16x8xf32, #tpu.memory_space<vmem>>, vector<16x8xf32>
    %cst_40 = arith.constant dense<0.000000e+00> : vector<4x8xf32>
    %42 = tpu.matmul %40, %41, %cst_40 {dimension_numbers = #tpu.dot_dimension_numbers<[1], [0], [0], [1], [0, 0, 1, 1], [], []>} : vector<4x16xf32>, vector<16x8xf32>, vector<4x8xf32> -> vector<4x8xf32>
    %c0_41 = arith.constant 0 : index
    %c0_42 = arith.constant 0 : index
    %43 = vector.load %arg22[%c0_41, %c0_42] : memref<1x8xf32, #tpu.memory_space<vmem>>, vector<1x8xf32>
    %44 = vector.broadcast %43 : vector<1x8xf32> to vector<4x8xf32>
    %45 = arith.addf %42, %44 : vector<4x8xf32>
    %c0_43 = arith.constant 0 : index
    %c0_44 = arith.constant 0 : index
    %46 = vector.load %arg0[%c0_43, %c0_44] : memref<512x6xf32, #tpu.memory_space<vmem>>, vector<512x6xf32>
    %c0_45 = arith.constant 0 : index
    %c0_46 = arith.constant 0 : index
    %47 = vector.load %arg5[%c0_45, %c0_46] : memref<6x64xf32, #tpu.memory_space<vmem>>, vector<6x64xf32>
    %cst_47 = arith.constant dense<0.000000e+00> : vector<512x64xf32>
    %48 = tpu.matmul %46, %47, %cst_47 {dimension_numbers = #tpu.dot_dimension_numbers<[1], [0], [0], [1], [0, 0, 1, 1], [], []>} : vector<512x6xf32>, vector<6x64xf32>, vector<512x64xf32> -> vector<512x64xf32>
    %c0_48 = arith.constant 0 : index
    %c0_49 = arith.constant 0 : index
    %49 = vector.load %arg6[%c0_48, %c0_49] : memref<1x64xf32, #tpu.memory_space<vmem>>, vector<1x64xf32>
    %50 = vector.broadcast %49 : vector<1x64xf32> to vector<512x64xf32>
    %51 = arith.addf %48, %50 : vector<512x64xf32>
    %cst_50 = arith.constant 0.000000e+00 : f32
    %52 = vector.broadcast %cst_50 : f32 to vector<512x64xf32>
    %53 = arith.maximumf %51, %52 : vector<512x64xf32>
    %c0_51 = arith.constant 0 : index
    %c0_52 = arith.constant 0 : index
    %54 = vector.load %arg7[%c0_51, %c0_52] : memref<64x64xf32, #tpu.memory_space<vmem>>, vector<64x64xf32>
    %cst_53 = arith.constant dense<0.000000e+00> : vector<512x64xf32>
    %55 = tpu.matmul %53, %54, %cst_53 {dimension_numbers = #tpu.dot_dimension_numbers<[1], [0], [0], [1], [0, 0, 1, 1], [], []>} : vector<512x64xf32>, vector<64x64xf32>, vector<512x64xf32> -> vector<512x64xf32>
    %c0_54 = arith.constant 0 : index
    %c0_55 = arith.constant 0 : index
    %56 = vector.load %arg8[%c0_54, %c0_55] : memref<1x64xf32, #tpu.memory_space<vmem>>, vector<1x64xf32>
    %57 = vector.broadcast %56 : vector<1x64xf32> to vector<512x64xf32>
    %58 = arith.addf %55, %57 : vector<512x64xf32>
    %cst_56 = arith.constant 0.000000e+00 : f32
    %59 = vector.broadcast %cst_56 : f32 to vector<512x64xf32>
    %60 = arith.maximumf %58, %59 : vector<512x64xf32>
    %61 = vector.shape_cast %60 : vector<512x64xf32> to vector<4x128x64xf32>
    %cst_57 = arith.constant dense<0xFF800000> : vector<4x64xf32>
    %62 = vector.multi_reduction <maximumf>, %61, %cst_57 [1] : vector<4x128x64xf32> to vector<4x64xf32>
    %c0_58 = arith.constant 0 : index
    %c0_59 = arith.constant 0 : index
    %63 = vector.load %arg23[%c0_58, %c0_59] : memref<64x64xf32, #tpu.memory_space<vmem>>, vector<64x64xf32>
    %cst_60 = arith.constant dense<0.000000e+00> : vector<4x64xf32>
    %64 = tpu.matmul %62, %63, %cst_60 {dimension_numbers = #tpu.dot_dimension_numbers<[1], [0], [0], [1], [0, 0, 1, 1], [], []>} : vector<4x64xf32>, vector<64x64xf32>, vector<4x64xf32> -> vector<4x64xf32>
    %c0_61 = arith.constant 0 : index
    %c0_62 = arith.constant 0 : index
    %65 = vector.load %arg24[%c0_61, %c0_62] : memref<16x64xf32, #tpu.memory_space<vmem>>, vector<16x64xf32>
    %cst_63 = arith.constant dense<0.000000e+00> : vector<4x64xf32>
    %66 = tpu.matmul %12, %65, %cst_63 {dimension_numbers = #tpu.dot_dimension_numbers<[1], [0], [0], [1], [0, 0, 1, 1], [], []>} : vector<4x16xf32>, vector<16x64xf32>, vector<4x64xf32> -> vector<4x64xf32>
    %67 = arith.addf %64, %66 : vector<4x64xf32>
    %c0_64 = arith.constant 0 : index
    %c0_65 = arith.constant 0 : index
    %68 = vector.load %arg25[%c0_64, %c0_65] : memref<16x64xf32, #tpu.memory_space<vmem>>, vector<16x64xf32>
    %cst_66 = arith.constant dense<0.000000e+00> : vector<4x64xf32>
    %69 = tpu.matmul %32, %68, %cst_66 {dimension_numbers = #tpu.dot_dimension_numbers<[1], [0], [0], [1], [0, 0, 1, 1], [], []>} : vector<4x16xf32>, vector<16x64xf32>, vector<4x64xf32> -> vector<4x64xf32>
    %70 = arith.addf %67, %69 : vector<4x64xf32>
    %c0_67 = arith.constant 0 : index
    %c0_68 = arith.constant 0 : index
    %71 = vector.load %arg26[%c0_67, %c0_68] : memref<8x64xf32, #tpu.memory_space<vmem>>, vector<8x64xf32>
    %cst_69 = arith.constant dense<0.000000e+00> : vector<4x64xf32>
    %72 = tpu.matmul %45, %71, %cst_69 {dimension_numbers = #tpu.dot_dimension_numbers<[1], [0], [0], [1], [0, 0, 1, 1], [], []>} : vector<4x8xf32>, vector<8x64xf32>, vector<4x64xf32> -> vector<4x64xf32>
    %73 = arith.addf %70, %72 : vector<4x64xf32>
    %c0_70 = arith.constant 0 : index
    %c0_71 = arith.constant 0 : index
    %74 = vector.load %arg27[%c0_70, %c0_71] : memref<1x64xf32, #tpu.memory_space<vmem>>, vector<1x64xf32>
    %75 = vector.broadcast %74 : vector<1x64xf32> to vector<4x64xf32>
    %76 = arith.addf %73, %75 : vector<4x64xf32>
    %cst_72 = arith.constant 0.000000e+00 : f32
    %77 = vector.broadcast %cst_72 : f32 to vector<4x64xf32>
    %78 = arith.maximumf %76, %77 : vector<4x64xf32>
    %c0_73 = arith.constant 0 : index
    %c0_74 = arith.constant 0 : index
    %79 = vector.load %arg28[%c0_73, %c0_74] : memref<64x32xf32, #tpu.memory_space<vmem>>, vector<64x32xf32>
    %cst_75 = arith.constant dense<0.000000e+00> : vector<4x32xf32>
    %80 = tpu.matmul %78, %79, %cst_75 {dimension_numbers = #tpu.dot_dimension_numbers<[1], [0], [0], [1], [0, 0, 1, 1], [], []>} : vector<4x64xf32>, vector<64x32xf32>, vector<4x32xf32> -> vector<4x32xf32>
    %c0_76 = arith.constant 0 : index
    %c0_77 = arith.constant 0 : index
    %81 = vector.load %arg29[%c0_76, %c0_77] : memref<1x32xf32, #tpu.memory_space<vmem>>, vector<1x32xf32>
    %82 = vector.broadcast %81 : vector<1x32xf32> to vector<4x32xf32>
    %83 = arith.addf %80, %82 : vector<4x32xf32>
    %cst_78 = arith.constant 0.000000e+00 : f32
    %84 = vector.broadcast %cst_78 : f32 to vector<4x32xf32>
    %85 = arith.maximumf %83, %84 : vector<4x32xf32>
    %c0_79 = arith.constant 0 : index
    %c0_80 = arith.constant 0 : index
    %86 = vector.load %arg30[%c0_79, %c0_80] : memref<32x96xf32, #tpu.memory_space<vmem>>, vector<32x96xf32>
    %cst_81 = arith.constant dense<0.000000e+00> : vector<4x96xf32>
    %87 = tpu.matmul %85, %86, %cst_81 {dimension_numbers = #tpu.dot_dimension_numbers<[1], [0], [0], [1], [0, 0, 1, 1], [], []>} : vector<4x32xf32>, vector<32x96xf32>, vector<4x96xf32> -> vector<4x96xf32>
    %c0_82 = arith.constant 0 : index
    %c0_83 = arith.constant 0 : index
    %88 = vector.load %arg32[%c0_82, %c0_83] : memref<1x96xf32, #tpu.memory_space<vmem>>, vector<1x96xf32>
    %89 = vector.broadcast %88 : vector<1x96xf32> to vector<4x96xf32>
    %90 = arith.addf %87, %89 : vector<4x96xf32>
    %c0_84 = arith.constant 0 : index
    %c0_85 = arith.constant 0 : index
    %91 = vector.load %arg50[%c0_84, %c0_85] : memref<4x96xf32, #tpu.memory_space<vmem>>, vector<4x96xf32>
    tpu.vector_store %arg50[%c0_84, %c0_85], %90 {strides = array<i32>} : memref<4x96xf32, #tpu.memory_space<vmem>>, vector<4x96xf32>,
    %c0_86 = arith.constant 0 : index
    %c0_87 = arith.constant 0 : index
    %92 = vector.load %arg31[%c0_86, %c0_87] : memref<32x96xf32, #tpu.memory_space<vmem>>, vector<32x96xf32>
    %c0_88 = arith.constant 0 : index
    %c0_89 = arith.constant 0 : index
    %93 = vector.load %arg33[%c0_88, %c0_89] : memref<1x96xf32, #tpu.memory_space<vmem>>, vector<1x96xf32>
    %c0_90 = arith.constant 0 : index
    %c0_91 = arith.constant 0 : index
    %94 = vector.load %arg4[%c0_90, %c0_91] : memref<1x32xf32, #tpu.memory_space<vmem>>, vector<1x32xf32>
    %c0_i32 = arith.constant 0 : i32
    %95 = arith.index_cast %c0_i32 : i32 to index
    %c0_92 = arith.constant 0 : index
    %96 = vector.load %arg50[%95, %c0_92] : memref<4x96xf32, #tpu.memory_space<vmem>>, vector<1x96xf32>
    %cst_93 = arith.constant dense<0.000000e+00> : vector<1x96xf32>
    %97 = tpu.matmul %94, %92, %cst_93 {dimension_numbers = #tpu.dot_dimension_numbers<[1], [0], [0], [1], [0, 0, 1, 1], [], []>} : vector<1x32xf32>, vector<32x96xf32>, vector<1x96xf32> -> vector<1x96xf32>
    %98 = arith.addf %97, %93 : vector<1x96xf32>
    %99 = vector.extract_strided_slice %96 {offsets = [0, 0], sizes = [1, 32], strides = [1, 1]} : vector<1x96xf32> to vector<1x32xf32>
    %100 = vector.extract_strided_slice %98 {offsets = [0, 0], sizes = [1, 32], strides = [1, 1]} : vector<1x96xf32> to vector<1x32xf32>
    %101 = arith.addf %99, %100 : vector<1x32xf32>
    %102 = arith.negf %101 : vector<1x32xf32>
    %103 = math.exp %102 : vector<1x32xf32>
    %cst_94 = arith.constant 1.000000e+00 : f32
    %104 = vector.broadcast %cst_94 : f32 to vector<1x32xf32>
    %105 = arith.addf %104, %103 : vector<1x32xf32>
    %106 = arith.divf %104, %105 : vector<1x32xf32>
    %107 = vector.extract_strided_slice %96 {offsets = [0, 32], sizes = [1, 32], strides = [1, 1]} : vector<1x96xf32> to vector<1x32xf32>
    %108 = vector.extract_strided_slice %98 {offsets = [0, 32], sizes = [1, 32], strides = [1, 1]} : vector<1x96xf32> to vector<1x32xf32>
    %109 = arith.addf %107, %108 : vector<1x32xf32>
    %110 = arith.negf %109 : vector<1x32xf32>
    %111 = math.exp %110 : vector<1x32xf32>
    %cst_95 = arith.constant 1.000000e+00 : f32
    %112 = vector.broadcast %cst_95 : f32 to vector<1x32xf32>
    %113 = arith.addf %112, %111 : vector<1x32xf32>
    %114 = arith.divf %112, %113 : vector<1x32xf32>
    %115 = vector.extract_strided_slice %96 {offsets = [0, 64], sizes = [1, 32], strides = [1, 1]} : vector<1x96xf32> to vector<1x32xf32>
    %116 = vector.extract_strided_slice %98 {offsets = [0, 64], sizes = [1, 32], strides = [1, 1]} : vector<1x96xf32> to vector<1x32xf32>
    %117 = arith.mulf %106, %116 : vector<1x32xf32>
    %118 = arith.addf %115, %117 : vector<1x32xf32>
    %119 = math.tanh %118 : vector<1x32xf32>
    %cst_96 = arith.constant 1.000000e+00 : f32
    %120 = vector.broadcast %cst_96 : f32 to vector<1x32xf32>
    %121 = arith.subf %120, %114 : vector<1x32xf32>
    %122 = arith.mulf %121, %119 : vector<1x32xf32>
    %123 = arith.mulf %114, %94 : vector<1x32xf32>
    %124 = arith.addf %122, %123 : vector<1x32xf32>
    %125 = arith.index_cast %c0_i32 : i32 to index
    %c0_97 = arith.constant 0 : index
    %126 = vector.load %arg51[%125, %c0_97] : memref<4x32xf32, #tpu.memory_space<vmem>>, vector<1x32xf32>
    tpu.vector_store %arg51[%125, %c0_97], %124 {strides = array<i32>} : memref<4x32xf32, #tpu.memory_space<vmem>>, vector<1x32xf32>,
    %c1_i32 = arith.constant 1 : i32
    %127 = arith.index_cast %c1_i32 : i32 to index
    %c0_98 = arith.constant 0 : index
    %128 = vector.load %arg50[%127, %c0_98] : memref<4x96xf32, #tpu.memory_space<vmem>>, vector<1x96xf32>
    %cst_99 = arith.constant dense<0.000000e+00> : vector<1x96xf32>
    %129 = tpu.matmul %124, %92, %cst_99 {dimension_numbers = #tpu.dot_dimension_numbers<[1], [0], [0], [1], [0, 0, 1, 1], [], []>} : vector<1x32xf32>, vector<32x96xf32>, vector<1x96xf32> -> vector<1x96xf32>
    %130 = arith.addf %129, %93 : vector<1x96xf32>
    %131 = vector.extract_strided_slice %128 {offsets = [0, 0], sizes = [1, 32], strides = [1, 1]} : vector<1x96xf32> to vector<1x32xf32>
    %132 = vector.extract_strided_slice %130 {offsets = [0, 0], sizes = [1, 32], strides = [1, 1]} : vector<1x96xf32> to vector<1x32xf32>
    %133 = arith.addf %131, %132 : vector<1x32xf32>
    %134 = arith.negf %133 : vector<1x32xf32>
    %135 = math.exp %134 : vector<1x32xf32>
    %cst_100 = arith.constant 1.000000e+00 : f32
    %136 = vector.broadcast %cst_100 : f32 to vector<1x32xf32>
    %137 = arith.addf %136, %135 : vector<1x32xf32>
    %138 = arith.divf %136, %137 : vector<1x32xf32>
    %139 = vector.extract_strided_slice %128 {offsets = [0, 32], sizes = [1, 32], strides = [1, 1]} : vector<1x96xf32> to vector<1x32xf32>
    %140 = vector.extract_strided_slice %130 {offsets = [0, 32], sizes = [1, 32], strides = [1, 1]} : vector<1x96xf32> to vector<1x32xf32>
    %141 = arith.addf %139, %140 : vector<1x32xf32>
    %142 = arith.negf %141 : vector<1x32xf32>
    %143 = math.exp %142 : vector<1x32xf32>
    %cst_101 = arith.constant 1.000000e+00 : f32
    %144 = vector.broadcast %cst_101 : f32 to vector<1x32xf32>
    %145 = arith.addf %144, %143 : vector<1x32xf32>
    %146 = arith.divf %144, %145 : vector<1x32xf32>
    %147 = vector.extract_strided_slice %128 {offsets = [0, 64], sizes = [1, 32], strides = [1, 1]} : vector<1x96xf32> to vector<1x32xf32>
    %148 = vector.extract_strided_slice %130 {offsets = [0, 64], sizes = [1, 32], strides = [1, 1]} : vector<1x96xf32> to vector<1x32xf32>
    %149 = arith.mulf %138, %148 : vector<1x32xf32>
    %150 = arith.addf %147, %149 : vector<1x32xf32>
    %151 = math.tanh %150 : vector<1x32xf32>
    %cst_102 = arith.constant 1.000000e+00 : f32
    %152 = vector.broadcast %cst_102 : f32 to vector<1x32xf32>
    %153 = arith.subf %152, %146 : vector<1x32xf32>
    %154 = arith.mulf %153, %151 : vector<1x32xf32>
    %155 = arith.mulf %146, %124 : vector<1x32xf32>
    %156 = arith.addf %154, %155 : vector<1x32xf32>
    %157 = arith.index_cast %c1_i32 : i32 to index
    %c0_103 = arith.constant 0 : index
    %158 = vector.load %arg51[%157, %c0_103] : memref<4x32xf32, #tpu.memory_space<vmem>>, vector<1x32xf32>
    tpu.vector_store %arg51[%157, %c0_103], %156 {strides = array<i32>} : memref<4x32xf32, #tpu.memory_space<vmem>>, vector<1x32xf32>,
    %c2_i32 = arith.constant 2 : i32
    %159 = arith.index_cast %c2_i32 : i32 to index
    %c0_104 = arith.constant 0 : index
    %160 = vector.load %arg50[%159, %c0_104] : memref<4x96xf32, #tpu.memory_space<vmem>>, vector<1x96xf32>
    %cst_105 = arith.constant dense<0.000000e+00> : vector<1x96xf32>
    %161 = tpu.matmul %156, %92, %cst_105 {dimension_numbers = #tpu.dot_dimension_numbers<[1], [0], [0], [1], [0, 0, 1, 1], [], []>} : vector<1x32xf32>, vector<32x96xf32>, vector<1x96xf32> -> vector<1x96xf32>
    %162 = arith.addf %161, %93 : vector<1x96xf32>
    %163 = vector.extract_strided_slice %160 {offsets = [0, 0], sizes = [1, 32], strides = [1, 1]} : vector<1x96xf32> to vector<1x32xf32>
    %164 = vector.extract_strided_slice %162 {offsets = [0, 0], sizes = [1, 32], strides = [1, 1]} : vector<1x96xf32> to vector<1x32xf32>
    %165 = arith.addf %163, %164 : vector<1x32xf32>
    %166 = arith.negf %165 : vector<1x32xf32>
    %167 = math.exp %166 : vector<1x32xf32>
    %cst_106 = arith.constant 1.000000e+00 : f32
    %168 = vector.broadcast %cst_106 : f32 to vector<1x32xf32>
    %169 = arith.addf %168, %167 : vector<1x32xf32>
    %170 = arith.divf %168, %169 : vector<1x32xf32>
    %171 = vector.extract_strided_slice %160 {offsets = [0, 32], sizes = [1, 32], strides = [1, 1]} : vector<1x96xf32> to vector<1x32xf32>
    %172 = vector.extract_strided_slice %162 {offsets = [0, 32], sizes = [1, 32], strides = [1, 1]} : vector<1x96xf32> to vector<1x32xf32>
    %173 = arith.addf %171, %172 : vector<1x32xf32>
    %174 = arith.negf %173 : vector<1x32xf32>
    %175 = math.exp %174 : vector<1x32xf32>
    %cst_107 = arith.constant 1.000000e+00 : f32
    %176 = vector.broadcast %cst_107 : f32 to vector<1x32xf32>
    %177 = arith.addf %176, %175 : vector<1x32xf32>
    %178 = arith.divf %176, %177 : vector<1x32xf32>
    %179 = vector.extract_strided_slice %160 {offsets = [0, 64], sizes = [1, 32], strides = [1, 1]} : vector<1x96xf32> to vector<1x32xf32>
    %180 = vector.extract_strided_slice %162 {offsets = [0, 64], sizes = [1, 32], strides = [1, 1]} : vector<1x96xf32> to vector<1x32xf32>
    %181 = arith.mulf %170, %180 : vector<1x32xf32>
    %182 = arith.addf %179, %181 : vector<1x32xf32>
    %183 = math.tanh %182 : vector<1x32xf32>
    %cst_108 = arith.constant 1.000000e+00 : f32
    %184 = vector.broadcast %cst_108 : f32 to vector<1x32xf32>
    %185 = arith.subf %184, %178 : vector<1x32xf32>
    %186 = arith.mulf %185, %183 : vector<1x32xf32>
    %187 = arith.mulf %178, %156 : vector<1x32xf32>
    %188 = arith.addf %186, %187 : vector<1x32xf32>
    %189 = arith.index_cast %c2_i32 : i32 to index
    %c0_109 = arith.constant 0 : index
    %190 = vector.load %arg51[%189, %c0_109] : memref<4x32xf32, #tpu.memory_space<vmem>>, vector<1x32xf32>
    tpu.vector_store %arg51[%189, %c0_109], %188 {strides = array<i32>} : memref<4x32xf32, #tpu.memory_space<vmem>>, vector<1x32xf32>,
    %c3_i32 = arith.constant 3 : i32
    %191 = arith.index_cast %c3_i32 : i32 to index
    %c0_110 = arith.constant 0 : index
    %192 = vector.load %arg50[%191, %c0_110] : memref<4x96xf32, #tpu.memory_space<vmem>>, vector<1x96xf32>
    %cst_111 = arith.constant dense<0.000000e+00> : vector<1x96xf32>
    %193 = tpu.matmul %188, %92, %cst_111 {dimension_numbers = #tpu.dot_dimension_numbers<[1], [0], [0], [1], [0, 0, 1, 1], [], []>} : vector<1x32xf32>, vector<32x96xf32>, vector<1x96xf32> -> vector<1x96xf32>
    %194 = arith.addf %193, %93 : vector<1x96xf32>
    %195 = vector.extract_strided_slice %192 {offsets = [0, 0], sizes = [1, 32], strides = [1, 1]} : vector<1x96xf32> to vector<1x32xf32>
    %196 = vector.extract_strided_slice %194 {offsets = [0, 0], sizes = [1, 32], strides = [1, 1]} : vector<1x96xf32> to vector<1x32xf32>
    %197 = arith.addf %195, %196 : vector<1x32xf32>
    %198 = arith.negf %197 : vector<1x32xf32>
    %199 = math.exp %198 : vector<1x32xf32>
    %cst_112 = arith.constant 1.000000e+00 : f32
    %200 = vector.broadcast %cst_112 : f32 to vector<1x32xf32>
    %201 = arith.addf %200, %199 : vector<1x32xf32>
    %202 = arith.divf %200, %201 : vector<1x32xf32>
    %203 = vector.extract_strided_slice %192 {offsets = [0, 32], sizes = [1, 32], strides = [1, 1]} : vector<1x96xf32> to vector<1x32xf32>
    %204 = vector.extract_strided_slice %194 {offsets = [0, 32], sizes = [1, 32], strides = [1, 1]} : vector<1x96xf32> to vector<1x32xf32>
    %205 = arith.addf %203, %204 : vector<1x32xf32>
    %206 = arith.negf %205 : vector<1x32xf32>
    %207 = math.exp %206 : vector<1x32xf32>
    %cst_113 = arith.constant 1.000000e+00 : f32
    %208 = vector.broadcast %cst_113 : f32 to vector<1x32xf32>
    %209 = arith.addf %208, %207 : vector<1x32xf32>
    %210 = arith.divf %208, %209 : vector<1x32xf32>
    %211 = vector.extract_strided_slice %192 {offsets = [0, 64], sizes = [1, 32], strides = [1, 1]} : vector<1x96xf32> to vector<1x32xf32>
    %212 = vector.extract_strided_slice %194 {offsets = [0, 64], sizes = [1, 32], strides = [1, 1]} : vector<1x96xf32> to vector<1x32xf32>
    %213 = arith.mulf %202, %212 : vector<1x32xf32>
    %214 = arith.addf %211, %213 : vector<1x32xf32>
    %215 = math.tanh %214 : vector<1x32xf32>
    %cst_114 = arith.constant 1.000000e+00 : f32
    %216 = vector.broadcast %cst_114 : f32 to vector<1x32xf32>
    %217 = arith.subf %216, %210 : vector<1x32xf32>
    %218 = arith.mulf %217, %215 : vector<1x32xf32>
    %219 = arith.mulf %210, %188 : vector<1x32xf32>
    %220 = arith.addf %218, %219 : vector<1x32xf32>
    %221 = arith.index_cast %c3_i32 : i32 to index
    %c0_115 = arith.constant 0 : index
    %222 = vector.load %arg51[%221, %c0_115] : memref<4x32xf32, #tpu.memory_space<vmem>>, vector<1x32xf32>
    tpu.vector_store %arg51[%221, %c0_115], %220 {strides = array<i32>} : memref<4x32xf32, #tpu.memory_space<vmem>>, vector<1x32xf32>,
    %c4_i32 = arith.constant 4 : i32
    %c0_116 = arith.constant 0 : index
    %c0_117 = arith.constant 0 : index
    %223 = vector.load %arg51[%c0_116, %c0_117] : memref<4x32xf32, #tpu.memory_space<vmem>>, vector<4x32xf32>
    %c0_118 = arith.constant 0 : index
    %c0_119 = arith.constant 0 : index
    %224 = vector.load %arg34[%c0_118, %c0_119] : memref<32x64xf32, #tpu.memory_space<vmem>>, vector<32x64xf32>
    %cst_120 = arith.constant dense<0.000000e+00> : vector<4x64xf32>
    %225 = tpu.matmul %223, %224, %cst_120 {dimension_numbers = #tpu.dot_dimension_numbers<[1], [0], [0], [1], [0, 0, 1, 1], [], []>} : vector<4x32xf32>, vector<32x64xf32>, vector<4x64xf32> -> vector<4x64xf32>
    %c0_121 = arith.constant 0 : index
    %c0_122 = arith.constant 0 : index
    %226 = vector.load %arg35[%c0_121, %c0_122] : memref<1x64xf32, #tpu.memory_space<vmem>>, vector<1x64xf32>
    %227 = vector.broadcast %226 : vector<1x64xf32> to vector<4x64xf32>
    %228 = arith.addf %225, %227 : vector<4x64xf32>
    %cst_123 = arith.constant 0.000000e+00 : f32
    %229 = vector.broadcast %cst_123 : f32 to vector<4x64xf32>
    %230 = arith.maximumf %228, %229 : vector<4x64xf32>
    %c0_124 = arith.constant 0 : index
    %c0_125 = arith.constant 0 : index
    %231 = vector.load %arg36[%c0_124, %c0_125] : memref<64x32xf32, #tpu.memory_space<vmem>>, vector<64x32xf32>
    %cst_126 = arith.constant dense<0.000000e+00> : vector<4x32xf32>
    %232 = tpu.matmul %230, %231, %cst_126 {dimension_numbers = #tpu.dot_dimension_numbers<[1], [0], [0], [1], [0, 0, 1, 1], [], []>} : vector<4x64xf32>, vector<64x32xf32>, vector<4x32xf32> -> vector<4x32xf32>
    %c0_127 = arith.constant 0 : index
    %c0_128 = arith.constant 0 : index
    %233 = vector.load %arg37[%c0_127, %c0_128] : memref<1x32xf32, #tpu.memory_space<vmem>>, vector<1x32xf32>
    %234 = vector.broadcast %233 : vector<1x32xf32> to vector<4x32xf32>
    %235 = arith.addf %232, %234 : vector<4x32xf32>
    %cst_129 = arith.constant 0.000000e+00 : f32
    %236 = vector.broadcast %cst_129 : f32 to vector<4x32xf32>
    %237 = arith.maximumf %235, %236 : vector<4x32xf32>
    %c0_130 = arith.constant 0 : index
    %c0_131 = arith.constant 0 : index
    %238 = vector.load %arg38[%c0_130, %c0_131] : memref<32x8xf32, #tpu.memory_space<vmem>>, vector<32x8xf32>
    %cst_132 = arith.constant dense<0.000000e+00> : vector<4x8xf32>
    %239 = tpu.matmul %237, %238, %cst_132 {dimension_numbers = #tpu.dot_dimension_numbers<[1], [0], [0], [1], [0, 0, 1, 1], [], []>} : vector<4x32xf32>, vector<32x8xf32>, vector<4x8xf32> -> vector<4x8xf32>
    %c0_133 = arith.constant 0 : index
    %c0_134 = arith.constant 0 : index
    %240 = vector.load %arg39[%c0_133, %c0_134] : memref<1x8xf32, #tpu.memory_space<vmem>>, vector<1x8xf32>
    %241 = vector.broadcast %240 : vector<1x8xf32> to vector<4x8xf32>
    %242 = arith.addf %239, %241 : vector<4x8xf32>
    %243 = tpu.iota {dimensions = array<i32: 1>} : vector<4x8xi32>
    %c3_i32_135 = arith.constant 3 : i32
    %244 = vector.broadcast %c3_i32_135 : i32 to vector<4x8xi32>
    %245 = arith.cmpi sge, %243, %244 : vector<4x8xi32>
    %c7_i32 = arith.constant 7 : i32
    %246 = vector.broadcast %c7_i32 : i32 to vector<4x8xi32>
    %247 = arith.cmpi slt, %243, %246 : vector<4x8xi32>
    %248 = arith.andi %245, %247 : vector<4x8xi1>
    %249 = arith.mulf %242, %242 : vector<4x8xf32>
    %cst_136 = arith.constant 0.000000e+00 : f32
    %250 = vector.broadcast %cst_136 : f32 to vector<4x8xf32>
    %251 = arith.select %248, %249, %250 : vector<4x8xi1>, vector<4x8xf32>
    %cst_137 = arith.constant dense<0.000000e+00> : vector<4xf32>
    %252 = vector.multi_reduction <add>, %251, %cst_137 [1] : vector<4x8xf32> to vector<4xf32>
    %253 = vector.shape_cast %252 : vector<4xf32> to vector<4x1xf32>
    %cst_138 = arith.constant 9.99999993E-9 : f32
    %254 = vector.broadcast %cst_138 : f32 to vector<4x1xf32>
    %255 = arith.addf %253, %254 : vector<4x1xf32>
    %256 = math.rsqrt %255 : vector<4x1xf32>
    %257 = vector.broadcast %256 : vector<4x1xf32> to vector<4x8xf32>
    %258 = arith.mulf %242, %257 : vector<4x8xf32>
    %259 = arith.select %248, %258, %242 : vector<4x8xi1>, vector<4x8xf32>
    %c0_139 = arith.constant 0 : index
    %c0_140 = arith.constant 0 : index
    %260 = vector.load %arg40[%c0_139, %c0_140] : memref<16x32xf32, #tpu.memory_space<vmem>>, vector<16x32xf32>
    %cst_141 = arith.constant dense<0.000000e+00> : vector<4x32xf32>
    %261 = tpu.matmul %12, %260, %cst_141 {dimension_numbers = #tpu.dot_dimension_numbers<[1], [0], [0], [1], [0, 0, 1, 1], [], []>} : vector<4x16xf32>, vector<16x32xf32>, vector<4x32xf32> -> vector<4x32xf32>
    %c0_142 = arith.constant 0 : index
    %c0_143 = arith.constant 0 : index
    %262 = vector.load %arg41[%c0_142, %c0_143] : memref<16x32xf32, #tpu.memory_space<vmem>>, vector<16x32xf32>
    %cst_144 = arith.constant dense<0.000000e+00> : vector<4x32xf32>
    %263 = tpu.matmul %32, %262, %cst_144 {dimension_numbers = #tpu.dot_dimension_numbers<[1], [0], [0], [1], [0, 0, 1, 1], [], []>} : vector<4x16xf32>, vector<16x32xf32>, vector<4x32xf32> -> vector<4x32xf32>
    %264 = arith.addf %261, %263 : vector<4x32xf32>
    %c0_145 = arith.constant 0 : index
    %c0_146 = arith.constant 0 : index
    %265 = vector.load %arg42[%c0_145, %c0_146] : memref<8x32xf32, #tpu.memory_space<vmem>>, vector<8x32xf32>
    %cst_147 = arith.constant dense<0.000000e+00> : vector<4x32xf32>
    %266 = tpu.matmul %45, %265, %cst_147 {dimension_numbers = #tpu.dot_dimension_numbers<[1], [0], [0], [1], [0, 0, 1, 1], [], []>} : vector<4x8xf32>, vector<8x32xf32>, vector<4x32xf32> -> vector<4x32xf32>
    %267 = arith.addf %264, %266 : vector<4x32xf32>
    %c0_148 = arith.constant 0 : index
    %c0_149 = arith.constant 0 : index
    %268 = vector.load %arg43[%c0_148, %c0_149] : memref<1x32xf32, #tpu.memory_space<vmem>>, vector<1x32xf32>
    %269 = vector.broadcast %268 : vector<1x32xf32> to vector<4x32xf32>
    %270 = arith.addf %267, %269 : vector<4x32xf32>
    %cst_150 = arith.constant 0.000000e+00 : f32
    %271 = vector.broadcast %cst_150 : f32 to vector<4x32xf32>
    %272 = arith.maximumf %270, %271 : vector<4x32xf32>
    %c0_151 = arith.constant 0 : index
    %c0_152 = arith.constant 0 : index
    %273 = vector.load %arg44[%c0_151, %c0_152] : memref<32x16xf32, #tpu.memory_space<vmem>>, vector<32x16xf32>
    %cst_153 = arith.constant dense<0.000000e+00> : vector<4x16xf32>
    %274 = tpu.matmul %272, %273, %cst_153 {dimension_numbers = #tpu.dot_dimension_numbers<[1], [0], [0], [1], [0, 0, 1, 1], [], []>} : vector<4x32xf32>, vector<32x16xf32>, vector<4x16xf32> -> vector<4x16xf32>
    %c0_154 = arith.constant 0 : index
    %c0_155 = arith.constant 0 : index
    %275 = vector.load %arg45[%c0_154, %c0_155] : memref<1x16xf32, #tpu.memory_space<vmem>>, vector<1x16xf32>
    %276 = vector.broadcast %275 : vector<1x16xf32> to vector<4x16xf32>
    %277 = arith.addf %274, %276 : vector<4x16xf32>
    %cst_156 = arith.constant 0.000000e+00 : f32
    %278 = vector.broadcast %cst_156 : f32 to vector<4x16xf32>
    %279 = arith.maximumf %277, %278 : vector<4x16xf32>
    %c0_157 = arith.constant 0 : index
    %c0_158 = arith.constant 0 : index
    %280 = vector.load %arg46[%c0_157, %c0_158] : memref<16x1xf32, #tpu.memory_space<vmem>>, vector<16x1xf32>
    %cst_159 = arith.constant dense<0.000000e+00> : vector<4x1xf32>
    %281 = tpu.matmul %279, %280, %cst_159 {dimension_numbers = #tpu.dot_dimension_numbers<[1], [0], [0], [1], [0, 0, 1, 1], [], []>} : vector<4x16xf32>, vector<16x1xf32>, vector<4x1xf32> -> vector<4x1xf32>
    %c0_160 = arith.constant 0 : index
    %c0_161 = arith.constant 0 : index
    %282 = vector.load %arg47[%c0_160, %c0_161] : memref<1x1xf32, #tpu.memory_space<vmem>>, vector<1x1xf32>
    %283 = vector.broadcast %282 : vector<1x1xf32> to vector<4x1xf32>
    %284 = arith.addf %281, %283 : vector<4x1xf32>
    %285 = arith.negf %284 : vector<4x1xf32>
    %286 = math.exp %285 : vector<4x1xf32>
    %cst_162 = arith.constant 1.000000e+00 : f32
    %287 = vector.broadcast %cst_162 : f32 to vector<4x1xf32>
    %288 = arith.addf %287, %286 : vector<4x1xf32>
    %289 = arith.divf %287, %288 : vector<4x1xf32>
    %c7_i32_163 = arith.constant 7 : i32
    %290 = vector.broadcast %c7_i32_163 : i32 to vector<4x8xi32>
    %291 = arith.cmpi eq, %243, %290 : vector<4x8xi32>
    %292 = vector.shape_cast %289 : vector<4x1xf32> to vector<4x1xf32>
    %293 = vector.broadcast %292 : vector<4x1xf32> to vector<4x8xf32>
    %294 = arith.select %291, %293, %259 : vector<4x8xi1>, vector<4x8xf32>
    %c0_164 = arith.constant 0 : index
    %c0_165 = arith.constant 0 : index
    %295 = vector.load %arg48[%c0_164, %c0_165] : memref<4x8xf32, #tpu.memory_space<vmem>>, vector<4x8xf32>
    tpu.vector_store %arg48[%c0_164, %c0_165], %294 {strides = array<i32>} : memref<4x8xf32, #tpu.memory_space<vmem>>, vector<4x8xf32>,
    %c0_166 = arith.constant 0 : index
    %c0_167 = arith.constant 0 : index
    %296 = vector.load %arg49[%c0_166, %c0_167] : memref<1x32xf32, #tpu.memory_space<vmem>>, vector<1x32xf32>
    tpu.vector_store %arg49[%c0_166, %c0_167], %220 {strides = array<i32>} : memref<1x32xf32, #tpu.memory_space<vmem>>, vector<1x32xf32>,
    return
  }
}

</mosaic_0001>

<bundles_post_ra>
// kernel: fused_forward.1
= control target key start
LH: loop header
LB: loop body
LE: loop exit
PB: predicated region body
PF: predicated region fallthrough
CT: control target
= control target key end

     0   :  { %s3038_s6 = smov 1   ;;  %s3039_s10 = smov 2   ;;  %s4022_s0 = inlined_call_operand.smem [shape: u32[50], index: -1, kind: input, shape index: {}] }
   0x1   :  { %s3108_s5 = sld [smem:[%s4022_s0]]   ;;  %s3040_s14 = smov 3  }
   0x2   :  { %s3113_s9 = sld [smem:[%s4022_s0 + %s3038_s6]]   ;;  %s3041_s18 = smov 4  }
   0x3   :  { %s3118_s13 = sld [smem:[%s4022_s0 + %s3039_s10]]   ;;  %s3042_s22 = smov 5  }
   0x4   :  { %s3123_s17 = sld [smem:[%s4022_s0 + %s3040_s14]]   ;;  %s3043_s26 = smov 6  }
   0x5   :  { %s3128_s21 = sld [smem:[%s4022_s0 + %s3041_s18]]   ;;  %s3044_s30 = smov 7  }
   0x6   :  { %s3133_s25 = sld [smem:[%s4022_s0 + %s3042_s22]]   ;;  %s3045_s4 = smov 8  }
   0x7   :  { %4041 = sst [smem:[#allocation26_spill]] %s3108_s5  ;;  %s3046_s10 = smov 9  }
   0x8   :  { %s3138_s29 = sld [smem:[%s4022_s0 + %s3043_s26]]   ;;  %s3047_s15 = smov 10  }
   0x9   :  { %4042 = sst [smem:[#allocation27_spill]] %s3118_s13  ;;  %s3048_s20 = smov 11  }
   0xa   :  { %s3143_s3 = sld [smem:[%s4022_s0 + %s3044_s30]]   ;;  %s3049_s26 = smov 12  }
   0xb   :  { %4043 = sst [smem:[#allocation28_spill]] %s3128_s21  ;;  %s3050_s1 = smov 13  }
   0xc   :  { %4044 = sst [smem:[#allocation29_spill]] %s3133_s25  ;;  %s3051_s7 = smov 14  }
   0xd   :  { %s3148_s8 = sld [smem:[%s4022_s0 + %s3045_s4]]   ;;  %s3053_s22 = smov 16  }
   0xe   :  { %4045 = sst [smem:[#allocation30_spill]] %s3138_s29  ;;  %s3054_s28 = smov 17  }
   0xf   :  { %s3153_s14 = sld [smem:[%s4022_s0 + %s3046_s10]]   ;;  %s3085_s23 = smov 48  }
  0x10   :  { %4046 = sst [smem:[#allocation31_spill]] %s3143_s3 }
  0x11   :  { %s3158_s19 = sld [smem:[%s4022_s0 + %s3047_s15]]   ;;  %s3052_s15 = smov 15  }
  0x12   :  { %s3163_s24 = sld [smem:[%s4022_s0 + %s3048_s20]]  }
  0x13   :  { %4047 = sst [smem:[#allocation32_spill]] %s3148_s8 }
  0x14   :  { %s3168_s30 = sld [smem:[%s4022_s0 + %s3049_s26]]  }
  0x15   :  { %s3173_s6 = sld [smem:[%s4022_s0 + %s3050_s1]]   ;;  %s3086_s1 = smov 49  }
  0x16   :  { %s3178_s12 = sld [smem:[%s4022_s0 + %s3051_s7]]   ;;  %s3055_s7 = smov 18  }
  0x17   :  { %4048 = sst [smem:[#allocation33_spill]] %s3158_s19 }
  0x18   :  { %s3183_s20 = sld [smem:[%s4022_s0 + %s3052_s15]]   ;;  %s3056_s15 = smov 19  }
  0x19   :  { %s3188_s27 = sld [smem:[%s4022_s0 + %s3053_s22]]   ;;  %s3057_s22 = smov 20  }
  0x1a   :  { %4049 = sst [smem:[#allocation34_spill]] %s3168_s30 }
  0x1b   :  { %s3193_s4 = sld [smem:[%s4022_s0 + %s3054_s28]]   ;;  %s3058_s28 = smov 21  }
  0x1c   :  { %4050 = sst [smem:[#allocation35_spill]] %s3178_s12 }
  0x1d   :  { %s3198_s21 = sld [smem:[%s4022_s0 + %s3055_s7]]   ;;  %s3059_s7 = smov 22  }
  0x1e   :  { %s3203_s8 = sld [smem:[%s4022_s0 + %s3056_s15]]   ;;  %s3060_s15 = smov 23  }
  0x1f   :  { %4051 = sst [smem:[#allocation36_spill]] %s3188_s27 }
  0x20   :  { %s3208_s27 = sld [smem:[%s4022_s0 + %s3057_s22]]   ;;  %s3061_s22 = smov 24  }
  0x21   :  { %4052 = sst [smem:[#allocation37_spill]] %s3193_s4 }
  0x22   :  { %s3213_s4 = sld [smem:[%s4022_s0 + %s3058_s28]]   ;;  %s3062_s28 = smov 25  }
  0x23   :  { %4053 = sst [smem:[#allocation38_spill]] %s3198_s21 }
  0x24   :  { %4054 = sst [smem:[#allocation39_spill]] %s3203_s8 }
  0x25   :  { %s3218_s21 = sld [smem:[%s4022_s0 + %s3059_s7]]   ;;  %s3063_s7 = smov 26  }
  0x26   :  { %4055 = sst [smem:[#allocation40_spill]] %s3208_s27 }
  0x27   :  { %s3223_s30 = sld [smem:[%s4022_s0 + %s3060_s15]]   ;;  %s3064_s15 = smov 27  }
  0x28   :  { %4056 = sst [smem:[#allocation41_spill]] %s3213_s4 }
  0x29   :  { %s3228_s29 = sld [smem:[%s4022_s0 + %s3061_s22]]   ;;  %s3065_s22 = smov 28  }
  0x2a   :  { %s3233_s27 = sld [smem:[%s4022_s0 + %s3062_s28]]   ;;  %s3066_s28 = smov 29  }
  0x2b   :  { %4057 = sst [smem:[#allocation42_spill]] %s3218_s21 }
  0x2c   :  { %s3238_s21 = sld [smem:[%s4022_s0 + %s3063_s7]]   ;;  %s3067_s7 = smov 30  }
  0x2d   :  { %4058 = sst [smem:[#allocation43_spill]] %s3223_s30 }
  0x2e   :  { %s3243_s30 = sld [smem:[%s4022_s0 + %s3064_s15]]   ;;  %s3068_s15 = smov 31  }
  0x2f   :  { %4059 = sst [smem:[#allocation44_spill]] %s3228_s29 }
  0x30   :  { %4060 = sst [smem:[#allocation45_spill]] %s3233_s27 }
  0x31   :  { %s3248_s29 = sld [smem:[%s4022_s0 + %s3065_s22]]   ;;  %s3069_s22 = smov 32  }
  0x32   :  { %4061 = sst [smem:[#allocation46_spill]] %s3238_s21 }
  0x33   :  { %s3253_s27 = sld [smem:[%s4022_s0 + %s3066_s28]]   ;;  %s3070_s28 = smov 33  }
  0x34   :  { %4062 = sst [smem:[#allocation47_spill]] %s3243_s30 }
  0x35   :  { %s3258_s21 = sld [smem:[%s4022_s0 + %s3067_s7]]   ;;  %s3071_s7 = smov 34  }
  0x36   :  { %s3263_s30 = sld [smem:[%s4022_s0 + %s3068_s15]]   ;;  %s3072_s15 = smov 35  }
  0x37   :  { %4063 = sst [smem:[#allocation48_spill]] %s3248_s29 }
  0x38   :  { %s3268_s29 = sld [smem:[%s4022_s0 + %s3069_s22]]   ;;  %s3073_s22 = smov 36  }
  0x39   :  { %s3273_s3 = sld [smem:[%s4022_s0 + %s3070_s28]]   ;;  %s3074_s28 = smov 37  }
  0x3a   :  { %s3288_s4 = sld [smem:[%s4022_s0 + %s3073_s22]]   ;;  %s3077_s22 = smov 40  }
  0x3b   :  { %4064 = sst [smem:[#allocation49_spill]] %s3258_s21 }
  0x3c   :  { %4065 = sst [smem:[#allocation50_spill]] %s3263_s30 }
  0x3d   :  { %s3278_s21 = sld [smem:[%s4022_s0 + %s3071_s7]]   ;;  %s3075_s7 = smov 38  }
  0x3e   :  { %s3283_s30 = sld [smem:[%s4022_s0 + %s3072_s15]]   ;;  %s3076_s15 = smov 39  }
  0x3f   :  { %s3293_s5 = sld [smem:[%s4022_s0 + %s3074_s28]]   ;;  %s3078_s28 = smov 41  }
  0x40   :  { %4067 = sst [smem:[#allocation52_spill]] %s3288_s4 }
  0x41   :  { %s3303_s13 = sld [smem:[%s4022_s0 + %s3076_s15]]   ;;  %s3080_s15 = smov 43  }
  0x42   :  { %s3308_s4 = sld [smem:[%s4022_s0 + %s3077_s22]]   ;;  %s3081_s22 = smov 44  }
  0x43   :  { %4066 = sst [smem:[#allocation51_spill]] %s3278_s21 }
  0x44   :  { %s3298_s21 = sld [smem:[%s4022_s0 + %s3075_s7]]   ;;  %s3079_s7 = smov 42  }
  0x45   :  { %s3313_s12 = sld [smem:[%s4022_s0 + %s3078_s28]]   ;;  %s3082_s28 = smov 45  }
  0x46   :  { %s3323_s19 = sld [smem:[%s4022_s0 + %s3080_s15]]   ;;  %s3084_s15 = smov 47  }
  0x47   :  { %s2525_s8 = sld [smem:[%s4022_s0 + %s3084_s15]]  }
  0x48   :  { %4069 = sst [smem:[#allocation54_spill]] %s3308_s4 }
  0x49   :  { %s3328_s4 = sld [smem:[%s4022_s0 + %s3081_s22]]  }
  0x4a   :  { %4068 = sst [smem:[#allocation53_spill]] %s3298_s21 }
  0x4b   :  { %4070 = sst [smem:[#allocation55_spill]] %s3313_s12 }
  0x4c   :  { %s3318_s21 = sld [smem:[%s4022_s0 + %s3079_s7]]   ;;  %s3083_s7 = smov 46  }
  0x4d   :  { %s3333_s12 = sld [smem:[%s4022_s0 + %s3082_s28]]   ;;  %v105_v0 = vstv %s2525_s8 }
  0x4e   :  { %s3351_s25 = sld [smem:[%s4022_s0 + %s3086_s1]]   ;;  %106 = vst [vmem:[#allocation4] sm:$0x1] %v105_v0 }
  0x4f   :  { %4072 = sst [smem:[#allocation57_spill]] %s3328_s4 }
  0x50   :  { %s3346_s4 = sld [smem:[%s4022_s0 + %s3085_s23]]  }
  0x52   :  { %4071 = sst [smem:[#allocation56_spill]] %s3318_s21 }
  0x53   :  { %s3338_s21 = sld [smem:[%s4022_s0 + %s3083_s7]]  }
  0x54   :  { %107 = vsyncpa [#allocation6], 0 }
  0x55   :  { %108 = vsyncpa [#allocation9], 0 }
  0x56   :  { %109 = vsyncpa [#allocation12], 0 }
  0x57   :  { %110 = vsyncpa [#allocation15], 0 }
  0x58   :  { %111 = vsyncpa [#allocation18], 0  ;;  %s191_s7 = sshll.u32 %s3268_s29, 4  ;;  %s192_s7 = int_to_ptr.hbm [resolvable:$true] %s191_s7 }
  0x59   :  { %112 = vsyncpa [#allocation7], 0  ;;  %s3087_s10 = smov [#allocation8]   ;;  %s215_s15 = sshll.u32 %s3283_s30, 4  ;;  %s216_s15 = int_to_ptr.hbm [resolvable:$true] %s215_s15 }
  0x5a   :  { %s193_s11 = sshll.u32 %s3087_s10, 4  ;;  %s2810_s0 = sshra.s32 %s192_s7, 4  ;;  %s194_s11 = int_to_ptr.vmem [resolvable:$true] %s193_s11  ;;  %s2811_s0 = int_to_ptr.hbm [resolvable:$true] %s2810_s0 }
  0x5b   :  { %s2812_s8 = scalar_lea.hbm %s2811_s0, 1  ;;  %s2814_s16 = scalar_lea.hbm %s3268_s29, 1 }
  0x5c   :  { %p2813_p0 = scmp.ne.s32.totalorder %s2811_s0, %s2812_s8  ;;  %p2815_p1 = scmp.lt.s32.totalorder %s2811_s0, %s3268_s29 }
  0x5d   :  { %p2816_p2 = scmp.lt.s32.totalorder %s2814_s16, %s2812_s8 }
  0x5f   :  { %p2817_p3 = por %p2816_p2, %p2815_p1 }
  0x61   :  { %p2818_p4 = pnand %p2817_p3, %p2813_p0 }
  0x63   :  { %2821 = shalt.err (!%p2818_p4)
}
  0x64   :  { %196 = dma.hbm_to_vmem [thread:$0]  %s192_s7, 16, %s194_s11, [#allocation9]  }
  0x65   :  { %s3088_s18 = smov [#allocation11]   ;;  %s241_s22 = sshll.u32 %s3303_s13, 4  ;;  %s242_s22 = int_to_ptr.hbm [resolvable:$true] %s241_s22 }
  0x66   :  { %s217_s23 = sshll.u32 %s3088_s18, 4  ;;  %s2834_s26 = sshra.s32 %s216_s15, 4  ;;  %s218_s23 = int_to_ptr.vmem [resolvable:$true] %s217_s23  ;;  %s2835_s26 = int_to_ptr.hbm [resolvable:$true] %s2834_s26 }
  0x67   :  { %s2836_s1 = scalar_lea.hbm %s2835_s26, 1  ;;  %s2838_s28 = scalar_lea.hbm %s3283_s30, 1 }
  0x68   :  { %p2837_p5 = scmp.ne.s32.totalorder %s2835_s26, %s2836_s1  ;;  %p2839_p6 = scmp.lt.s32.totalorder %s2835_s26, %s3283_s30 }
  0x69   :  { %p2840_p7 = scmp.lt.s32.totalorder %s2838_s28, %s2836_s1 }
  0x6b   :  { %p2841_p8 = por %p2840_p7, %p2839_p6 }
  0x6d   :  { %p2842_p9 = pnand %p2841_p8, %p2837_p5 }
  0x6f   :  { %2845 = shalt.err (!%p2842_p9)
}
  0x70   :  { %220 = dma.hbm_to_vmem [thread:$0]  %s216_s15, 16, %s218_s23, [#allocation12]  }
  0x71   :  { %s176_s29 = sshll.u32 %s3253_s27, 4  ;;  %s3089_s2 = smov [#allocation14]   ;;  %s177_s29 = int_to_ptr.hbm [resolvable:$true] %s176_s29 }
  0x72   :  { %s243_s7 = sshll.u32 %s3089_s2, 4  ;;  %s2858_s10 = sshra.s32 %s242_s22, 4  ;;  %s244_s7 = int_to_ptr.vmem [resolvable:$true] %s243_s7  ;;  %s2859_s10 = int_to_ptr.hbm [resolvable:$true] %s2858_s10 }
  0x73   :  { %s2860_s11 = scalar_lea.hbm %s2859_s10, 1  ;;  %s2862_s0 = scalar_lea.hbm %s3303_s13, 1 }
  0x74   :  { %p2861_p10 = scmp.ne.s32.totalorder %s2859_s10, %s2860_s11  ;;  %p2863_p11 = scmp.lt.s32.totalorder %s2859_s10, %s3303_s13 }
  0x75   :  { %p2864_p12 = scmp.lt.s32.totalorder %s2862_s0, %s2860_s11 }
  0x77   :  { %p2865_p13 = por %p2864_p12, %p2863_p11 }
  0x79   :  { %p2866_p0 = pnand %p2865_p13, %p2861_p10 }
  0x7b   :  { %2869 = shalt.err (!%p2866_p0)
}
  0x7c   :  { %246 = dma.hbm_to_vmem [thread:$0]  %s242_s22, 16, %s244_s7, [#allocation15]  }
  0x7d   :  { %s3090_s30 = smov [#allocation5]   ;;  %s202_s8 = sshll.u32 %s3273_s3, 4  ;;  %s203_s8 = int_to_ptr.hbm [resolvable:$true] %s202_s8 }
  0x7e   :  { %s178_s15 = sshll.u32 %s3090_s30, 4  ;;  %s2882_s16 = sshra.s32 %s177_s29, 4  ;;  %s179_s15 = int_to_ptr.vmem [resolvable:$true] %s178_s15  ;;  %s2883_s16 = int_to_ptr.hbm [resolvable:$true] %s2882_s16 }
  0x7f   :  { %s2884_s18 = scalar_lea.hbm %s2883_s16, 1  ;;  %s2886_s23 = scalar_lea.hbm %s3253_s27, 1 }
  0x80   :  { %p2885_p1 = scmp.ne.s32.totalorder %s2883_s16, %s2884_s18  ;;  %p2887_p2 = scmp.lt.s32.totalorder %s2883_s16, %s3253_s27 }
  0x81   :  { %p2888_p3 = scmp.lt.s32.totalorder %s2886_s23, %s2884_s18 }
  0x83   :  { %p2889_p4 = por %p2888_p3, %p2887_p2 }
  0x85   :  { %p2890_p5 = pnand %p2889_p4, %p2885_p1 }
  0x87   :  { %2893 = shalt.err (!%p2890_p5)
}
  0x88   :  { %181 = dma.hbm_to_vmem [thread:$0]  %s177_s29, 16, %s179_s15, [#allocation6]  }
  0x89   :  { %s228_s13 = sshll.u32 %s3293_s5, 4  ;;  %s3091_s22 = smov [#allocation10]   ;;  %s229_s13 = int_to_ptr.hbm [resolvable:$true] %s228_s13 }
  0x8a   :  { %s204_s26 = sshll.u32 %s3091_s22, 4  ;;  %s2906_s1 = sshra.s32 %s203_s8, 4  ;;  %s205_s26 = int_to_ptr.vmem [resolvable:$true] %s204_s26  ;;  %s2907_s1 = int_to_ptr.hbm [resolvable:$true] %s2906_s1 }
  0x8b   :  { %s2908_s28 = scalar_lea.hbm %s2907_s1, 1  ;;  %s2910_s2 = scalar_lea.hbm %s3273_s3, 1 }
  0x8c   :  { %p2909_p6 = scmp.ne.s32.totalorder %s2907_s1, %s2908_s28  ;;  %p2911_p7 = scmp.lt.s32.totalorder %s2907_s1, %s3273_s3 }
  0x8d   :  { %p2912_p8 = scmp.lt.s32.totalorder %s2910_s2, %s2908_s28 }
  0x8f   :  { %p2913_p9 = por %p2912_p8, %p2911_p7 }
  0x91   :  { %p2914_p10 = pnand %p2913_p9, %p2909_p6 }
  0x93   :  { %2917 = shalt.err (!%p2914_p10)
}
  0x94   :  { %207 = dma.hbm_to_vmem [thread:$0]  %s203_s8, 16, %s205_s26, [#allocation9]  }
  0x95   :  { %s3092_s27 = smov [#allocation13]   ;;  %s258_s7 = sshll.u32 %s3323_s19, 4  ;;  %s259_s7 = int_to_ptr.hbm [resolvable:$true] %s258_s7 }
  0x96   :  { %s230_s29 = sshll.u32 %s3092_s27, 4  ;;  %s2930_s10 = sshra.s32 %s229_s13, 4  ;;  %s231_s29 = int_to_ptr.vmem [resolvable:$true] %s230_s29  ;;  %s2931_s10 = int_to_ptr.hbm [resolvable:$true] %s2930_s10 }
  0x97   :  { %s2932_s11 = scalar_lea.hbm %s2931_s10, 1  ;;  %s2934_s0 = scalar_lea.hbm %s3293_s5, 1 }
  0x98   :  { %p2933_p11 = scmp.ne.s32.totalorder %s2931_s10, %s2932_s11  ;;  %p2935_p12 = scmp.lt.s32.totalorder %s2931_s10, %s3293_s5 }
  0x99   :  { %p2936_p13 = scmp.lt.s32.totalorder %s2934_s0, %s2932_s11 }
  0x9b   :  { %p2937_p0 = por %p2936_p13, %p2935_p12 }
  0x9d   :  { %p2938_p1 = pnand %p2937_p0, %p2933_p11 }
  0x9f   :  { %2941 = shalt.err (!%p2938_p1)
}
  0xa0   :  { %233 = dma.hbm_to_vmem [thread:$0]  %s229_s13, 16, %s231_s29, [#allocation12]  }
  0xa1   :  { %s271_s3 = sshll.u32 %s3333_s12, 4  ;;  %s3093_s30 = smov [#allocation16]   ;;  %s272_s3 = int_to_ptr.hbm [resolvable:$true] %s271_s3 }
  0xa2   :  { %s260_s15 = sshll.u32 %s3093_s30, 4  ;;  %s2954_s8 = sshra.s32 %s259_s7, 4  ;;  %s261_s15 = int_to_ptr.vmem [resolvable:$true] %s260_s15  ;;  %s2955_s8 = int_to_ptr.hbm [resolvable:$true] %s2954_s8 }
  0xa3   :  { %s2956_s16 = scalar_lea.hbm %s2955_s8, 1  ;;  %s2958_s18 = scalar_lea.hbm %s3323_s19, 1 }
  0xa4   :  { %p2957_p2 = scmp.ne.s32.totalorder %s2955_s8, %s2956_s16  ;;  %p2959_p3 = scmp.lt.s32.totalorder %s2955_s8, %s3323_s19 }
  0xa5   :  { %p2960_p4 = scmp.lt.s32.totalorder %s2958_s18, %s2956_s16 }
  0xa7   :  { %p2961_p5 = por %p2960_p4, %p2959_p3 }
  0xa9   :  { %p2962_p6 = pnand %p2961_p5, %p2957_p2 }
  0xab   :  { %2965 = shalt.err (!%p2962_p6)
}
  0xac   :  { %263 = dma.hbm_to_vmem [thread:$0]  %s259_s7, 16, %s261_s15, [#allocation15]  }
  0xad   :  { %s3094_s5 = smov [#allocation17]   ;;  %s2978_s13 = sshra.s32 %s272_s3, 4  ;;  %s2979_s13 = int_to_ptr.hbm [resolvable:$true] %s2978_s13 }
  0xae   :  { %s273_s23 = sshll.u32 %s3094_s5, 4  ;;  %s2980_s22 = scalar_lea.hbm %s2979_s13, 1  ;;  %s274_s23 = int_to_ptr.vmem [resolvable:$true] %s273_s23 }
  0xaf   :  { %p2981_p7 = scmp.ne.s32.totalorder %s2979_s13, %s2980_s22  ;;  %s2982_s26 = scalar_lea.hbm %s3333_s12, 1 }
  0xb0   :  { %p2983_p8 = scmp.lt.s32.totalorder %s2979_s13, %s3333_s12  ;;  %p2984_p9 = scmp.lt.s32.totalorder %s2982_s26, %s2980_s22 }
  0xb2   :  { %p2985_p10 = por %p2984_p9, %p2983_p8 }
  0xb4   :  { %p2986_p11 = pnand %p2985_p10, %p2981_p7 }
  0xb6   :  { %2989 = shalt.err (!%p2986_p11)
}
  0xb7   :  { %276 = dma.hbm_to_vmem [thread:$0]  %s272_s3, 16, %s274_s23, [#allocation18]  }
  0xb8   :  { %3026 = dma.done.wait [#allocation6], 16  }
  0xb9   :  { %3027 = vsyncadd [#allocation6], 4294967280 }
  0xba   :  { %3028 = dma.done.wait [#allocation9], 32  }
  0xbb   :  { %3029 = vsyncadd [#allocation9], 4294967264 }
  0xbc   :  { %3030 = dma.done.wait [#allocation12], 32  }
  0xbd   :  { %3031 = vsyncadd [#allocation12], 4294967264 }
  0xbe   :  { %3032 = dma.done.wait [#allocation15], 32  }
  0xbf   :  { %3033 = vsyncadd [#allocation15], 4294967264 }
  0xc0   :  { %3034 = dma.done.wait [#allocation18], 16  }
  0xc1   :  { %3035 = vsyncadd [#allocation18], 4294967280  ;;  %vm384_vm0 = vcmask 64512   ;;  %v317_v1 = vld [vmem:[%s3153_s14 + $0x18] sm:$0xff]  ;;  %v379_v2 = vld [vmem:[%s3173_s6] sm:$0xff]  ;;  %vm322_vm1 = vcmask 261120  }
  0xc2   :  { %v378_v3 = vld [vmem:[%s3113_s9] sm:$0xf]  ;;  %338 = vmatpush.msra.mxu0 %v317_v1  ;;  %403 = vmatpush.msra.mxu2 %v379_v2  ;;  %v316_v4 = vld [vmem:[%s3153_s14 + $0x10] sm:$0xff]  ;;  %v315_v5 = vld [vmem:[%s3153_s14 + $0x8] sm:$0xff]  ;;  %s4073_s19 = sld [smem:[#allocation29_spill]]  ;;  %vm795_vm2 = vcmask 1045504  }
  0xc3   :  { %2530 = vmatmul.msk.f32.vlgmr.msra.gmra.mxu2 %vm384_vm0, %v378_v3  ;;  %v314_v6 = vld [vmem:[%s3153_s14] sm:$0xff]  ;;  %v350_v7 = vld [vmem:[%s3163_s24 + $0x18] sm:$0xff]  ;;  %s4074_s6 = sld [smem:[#allocation39_spill]]  ;;  %v349_v9 = vld [vmem:[%s3163_s24 + $0x10] sm:$0xff]  ;;  %vm479_vm3 = vcmask 1043456   ;;  %vm415_vm4 = vcmask 130048  }
  0xc4   :  { %339 = vmatpush.msra.mxu0 %v316_v4  ;;  %v313_v8 = vld [vmem:[%s3123_s17] sm:$0xf]  ;;  %370 = vmatpush.msra.mxu1 %v350_v7  ;;  %s4075_s9 = sld [smem:[#allocation33_spill]]  ;;  %v348_v10 = vld [vmem:[%s3163_s24 + $0x8] sm:$0xff]  ;;  %vm475_vm5 = vcmask 31744   ;;  %vm602_vm6 = vcmask 48128  }
  0xc5   :  { %s4076_s12 = sld [smem:[#allocation35_spill]]  ;;  %v410_v11 = vld [vmem:[%s3183_s20 + $0x8] sm:$0xff]  ;;  %v347_v12 = vld [vmem:[%s3163_s24] sm:$0xff]  ;;  %vm1084_vm7 = vcmask 523264   ;;  %vm1735_vm8 = vcmask 1041409   ;;  %vm1737_vm9 = vcmask 1042434  }
  0xc6   :  { %340 = vmatpush.msra.mxu0 %v315_v5  ;;  %371 = vmatpush.msra.mxu1 %v349_v9  ;;  %v409_v13 = vld [vmem:[%s3183_s20] sm:$0xff]  ;;  %s4077_s17 = sld [smem:[#allocation27_spill]]  ;;  %vm1739_vm10 = vcmask 1043459   ;;  %vm1887_vm11 = vcmask 781312   ;;  %s3095_s13 = smov 64  }
  0xc7   :  { %433 = vmatpush.msra.mxu3 %v410_v11  ;;  %s4078_s14 = sld [smem:[#allocation26_spill]]  ;;  %s3096_s22 = smov 96  }
  0xc8   :  { %341 = vmatpush.msra.mxu0 %v314_v6  ;;  %372 = vmatpush.msra.mxu1 %v348_v10  ;;  %v597_v14 = vld [vmem:[%s4073_s19] sm:$0x3f]  ;;  %s4079_s24 = sld [smem:[#allocation41_spill]]  ;;  %s3097_s26 = smov 32  }
  0xc9   :  { %2528 = vmatmul.msk.f32.vlgmr.msra.gmra.mxu0 %vm322_vm1, %v313_v8  ;;  %434 = vmatpush.msra.mxu3 %v409_v13  ;;  %v470_v15 = vld [vmem:[%s4074_s6] sm:$0xf]  ;;  %s4080_s20 = sld [smem:[#allocation31_spill]] }
  0xca   :  { %373 = vmatpush.msra.mxu1 %v347_v12  ;;  %v2760_v16 = vld [vmem:[%s4075_s9] ss:$0 sm:$0xff]  ;;  %s4081_s1 = sld [smem:[#allocation40_spill]] }
  0xcb   :  { %2533 = vmatpush.msk.msrb.mxu3 %vm479_vm3, %v470_v15  ;;  %v2761_v17 = vld [vmem:[%s4076_s12] ss:$0 sm:$0xff]  ;;  %s4082_s28 = sld [smem:[#allocation30_spill]] }
  0xcc   :  { %2536 = vmatpush.msk.msrb.mxu1 %vm795_vm2, %v597_v14  ;;  %v469_v24 = vld [vmem:[%s4077_s17] sm:$0xf]  ;;  %s4083_s2 = sld [smem:[#allocation44_spill]] }
  0xcd   :  { %v533_v25 = vld [vmem:[%s4078_s14] sm:$0xff]  ;;  %v534_v26 = vld [vmem:[%s4078_s14 + $0x8] sm:$0xff]  ;;  %v571_v27 = vld [vmem:[%s4078_s14 + $0x130] sm:$0xff]  ;;  %s4084_s27 = sld [smem:[#allocation34_spill]] }
  0xce   :  { %v535_v28 = vld [vmem:[%s4078_s14 + $0x10] sm:$0xff]  ;;  %v572_v29 = vld [vmem:[%s4078_s14 + $0x138] sm:$0xff]  ;;  %v573_v31 = vld [vmem:[%s4078_s14 + $0x140] sm:$0xff]  ;;  %s4085_s29 = sld [smem:[#allocation36_spill]] }
  0xcf   :  { %v536_v30 = vld [vmem:[%s4078_s14 + $0x18] sm:$0xff]  ;;  %v537_v32 = vld [vmem:[%s4078_s14 + $0x20] sm:$0xff]  ;;  %v574_v33 = vld [vmem:[%s4078_s14 + $0x148] sm:$0xff]  ;;  %s4086_s7 = sld [smem:[#allocation37_spill]] }
  0xd0   :  { %v538_v34 = vld [vmem:[%s4078_s14 + $0x28] sm:$0xff]  ;;  %v575_v35 = vld [vmem:[%s4078_s14 + $0x150] sm:$0xff]  ;;  %v576_v37 = vld [vmem:[%s4078_s14 + $0x158] sm:$0xff]  ;;  %s4087_s10 = sld [smem:[#allocation32_spill]] }
  0xd1   :  { %v539_v36 = vld [vmem:[%s4078_s14 + $0x30] sm:$0xff]  ;;  %v540_v38 = vld [vmem:[%s4078_s14 + $0x38] sm:$0xff]  ;;  %v577_v39 = vld [vmem:[%s4078_s14 + $0x160] sm:$0xff]  ;;  %s4088_s11 = sld [smem:[#allocation38_spill]] }
  0xd2   :  { %v541_v40 = vld [vmem:[%s4078_s14 + $0x40] sm:$0xff]  ;;  %v578_v41 = vld [vmem:[%s4078_s14 + $0x168] sm:$0xff]  ;;  %v579_v43 = vld [vmem:[%s4078_s14 + $0x170] sm:$0xff]  ;;  %s4089_s0 = sld [smem:[#allocation45_spill]] }
  0xd3   :  { %v542_v42 = vld [vmem:[%s4078_s14 + $0x48] sm:$0xff]  ;;  %v543_v44 = vld [vmem:[%s4078_s14 + $0x50] sm:$0xff]  ;;  %v580_v45 = vld [vmem:[%s4078_s14 + $0x178] sm:$0xff]  ;;  %s4090_s3 = sld [smem:[#allocation42_spill]] }
  0xd4   :  { %v544_v46 = vld [vmem:[%s4078_s14 + $0x58] sm:$0xff]  ;;  %v581_v47 = vld [vmem:[%s4078_s14 + $0x180] sm:$0xff]  ;;  %v582_v49 = vld [vmem:[%s4078_s14 + $0x188] sm:$0xff]  ;;  %s4091_s30 = sld [smem:[#allocation46_spill]] }
  0xd5   :  { %v545_v48 = vld [vmem:[%s4078_s14 + $0x60] sm:$0xff]  ;;  %v505_v50 = vld [vmem:[%s4079_s24 + $0x8] sm:$0xff]  ;;  %v3454_v52 = vld [vmem:[%s4080_s20 + $0x38] sm:$0xff]  ;;  %s4092_s15 = sld [smem:[#allocation43_spill]] }
  0xd6   :  { %527 = vmatpush.msrb.mxu0 %v505_v50  ;;  %v504_v51 = vld [vmem:[%s4079_s24] sm:$0xff]  ;;  %v3458_v53 = vld [vmem:[%s4080_s20 + $0x30] sm:$0xff]  ;;  %v3462_v54 = vld [vmem:[%s4080_s20 + $0x28] sm:$0xff]  ;;  %s4093_s8 = sld [smem:[#allocation48_spill]] }
  0xd7   :  { %v546_v55 = vld [vmem:[%s4078_s14 + $0x68] sm:$0xff]  ;;  %v583_v56 = vld [vmem:[%s4078_s14 + $0x190] sm:$0xff]  ;;  %v3468_v57 = vld [vmem:[%s4080_s20 + $0x20] sm:$0xff]  ;;  %s4094_s16 = sld [smem:[#allocation49_spill]] }
  0xd8   :  { %528 = vmatpush.msrb.mxu0 %v504_v51  ;;  %v3474_v58 = vld [vmem:[%s4080_s20 + $0x18] sm:$0xff]  ;;  %v3478_v59 = vld [vmem:[%s4080_s20 + $0x10] sm:$0xff]  ;;  %v3484_v62 = vld [vmem:[%s4080_s20 + $0x8] sm:$0xff]  ;;  %s4095_s18 = sld [smem:[#allocation47_spill]] }
  0xd9   :  { %v547_v60 = vld [vmem:[%s4078_s14 + $0x70] sm:$0xff]  ;;  %v584_v61 = vld [vmem:[%s4078_s14 + $0x198] sm:$0xff]  ;;  %v3488_v63 = vld [vmem:[%s4080_s20] sm:$0xff]  ;;  %s4096_s5 = sld [smem:[#allocation50_spill]] }
  0xda   :  { %1285 = vmatpush.msra.mxu0 %v3454_v52  ;;  %v548_v1 = vld [vmem:[%s4078_s14 + $0x78] sm:$0xff]  ;;  %v585_v2 = vld [vmem:[%s4078_s14 + $0x1a0] sm:$0xff]  ;;  %v586_v6 = vld [vmem:[%s4078_s14 + $0x1a8] sm:$0xff]  ;;  %s4097_s23 = sld [smem:[#allocation28_spill]] }
  0xdb   :  { %v549_v5 = vld [vmem:[%s4078_s14 + $0x80] sm:$0xff]  ;;  %v550_v11 = vld [vmem:[%s4078_s14 + $0x88] sm:$0xff]  ;;  %s4098_s19 = sld [smem:[#allocation51_spill]] }
  0xdc   :  { %1286 = vmatpush.msra.mxu0 %v3458_v53  ;;  %v2765_v7 = vld [vmem:[%s4081_s1] ss:$0 sm:$0xff]  ;;  %v594_v51 = vld [vmem:[%s4078_s14 + $0x1e8] sm:$0xff]  ;;  %s4099_s6 = sld [smem:[#allocation52_spill]]  ;;  %s2463_s1 = sshll.u32 %s3351_s25, 4  ;;  %s2464_s1 = int_to_ptr.hbm [resolvable:$true] %s2463_s1 }
  0xdd   :  { %v3508_v12 = vld [vmem:[%s4082_s28] ss:$0 sm:$0xff]  ;;  %s4100_s9 = sld [smem:[#allocation54_spill]] }
  0xde   :  { %1287 = vmatpush.msra.mxu0 %v3462_v54  ;;  %s4101_s12 = sld [smem:[#allocation53_spill]] }
  0xdf   :  { %s4102_s17 = sld [smem:[#allocation55_spill]] }
  0xe0   :  { %1288 = vmatpush.msra.mxu0 %v3468_v57  ;;  %s4104_s24 = sld [smem:[#allocation57_spill]] }
  0xe2   :  { %1289 = vmatpush.msra.mxu0 %v3474_v58 }
  0xe4   :  { %1290 = vmatpush.msra.mxu0 %v3478_v59 }
  0xe6   :  { %1291 = vmatpush.msra.mxu0 %v3484_v62 }
  0xe8   :  { %1292 = vmatpush.msra.mxu0 %v3488_v63 }
 0x146   :  { %v343_v18 = vpop.f32.mrf.mxu0  ;;  %v405_v19 = vpop.f32.mrf.mxu2 }
 0x147   :  { %v344_v20 = vadd.f32 %v2760_v16, %v343_v18  ;;  %v406_v21 = vadd.f32 %v2761_v17, %v405_v19  ;;  %v551_v17 = vld [vmem:[%s4078_s14 + $0x90] sm:$0xff]  ;;  %v588_v19 = vld [vmem:[%s4078_s14 + $0x1b8] sm:$0xff] }
 0x149   :  { %v346_v22 = vmax.f32 %v344_v20, 0.0  ;;  %v408_v23 = vmax.f32 %v406_v21, 0.0 }
 0x14b   :  { %2529 = vmatmul.msk.f32.vlgmr.msra.gmra.mxu1 %vm322_vm1, %v346_v22  ;;  %2531 = vmatmul.msk.f32.vlgmr.msra.gmra.mxu3 %vm415_vm4, %v408_v23  ;;  %v552_v22 = vld [vmem:[%s4078_s14 + $0x98] sm:$0xff] }
 0x14c   :  { %2688 = vmatpush.msk.msra.mxu3 %vm795_vm2, %v597_v14  ;;  %v587_v14 = vld [vmem:[%s4078_s14 + $0x1b0] sm:$0xff]  ;;  %vm1966_vm2 = vcmask 253952  }
 0x153   :  { %2534 = vmatmul.msk.f32.vlgmr.msrb.gmra.mxu3 %vm475_vm5, %v469_v24  ;;  %2537 = vmatmul.msk.f32.vlgmr.msrb.gmra.mxu1 %vm602_vm6, %v533_v25  ;;  %v589_v24 = vld [vmem:[%s4078_s14 + $0x1c0] sm:$0xff] }
 0x15b   :  { %2538 = vmatmul.msk.f32.gmra.mxu1 %vm602_vm6, %v534_v26  ;;  %2575 = vmatmul.msk.f32.vlgmr.msra.gmra.mxu3 %vm602_vm6, %v571_v27  ;;  %v553_v27 = vld [vmem:[%s4078_s14 + $0xa0] sm:$0xff] }
 0x163   :  { %2539 = vmatmul.msk.f32.gmra.mxu1 %vm602_vm6, %v535_v28  ;;  %2576 = vmatmul.msk.f32.gmra.mxu3 %vm602_vm6, %v572_v29  ;;  %v590_v29 = vld [vmem:[%s4078_s14 + $0x1c8] sm:$0xff] }
 0x16b   :  { %2540 = vmatmul.msk.f32.gmra.mxu1 %vm602_vm6, %v536_v30  ;;  %2577 = vmatmul.msk.f32.gmra.mxu3 %vm602_vm6, %v573_v31 }
 0x173   :  { %2541 = vmatmul.msk.f32.gmra.mxu1 %vm602_vm6, %v537_v32  ;;  %2578 = vmatmul.msk.f32.gmra.mxu3 %vm602_vm6, %v574_v33  ;;  %v554_v32 = vld [vmem:[%s4078_s14 + $0xa8] sm:$0xff] }
 0x17b   :  { %2542 = vmatmul.msk.f32.gmra.mxu1 %vm602_vm6, %v538_v34  ;;  %2579 = vmatmul.msk.f32.gmra.mxu3 %vm602_vm6, %v575_v35  ;;  %v591_v34 = vld [vmem:[%s4078_s14 + $0x1d0] sm:$0xff] }
 0x183   :  { %2543 = vmatmul.msk.f32.gmra.mxu1 %vm602_vm6, %v539_v36  ;;  %2580 = vmatmul.msk.f32.gmra.mxu3 %vm602_vm6, %v576_v37  ;;  %v555_v37 = vld [vmem:[%s4078_s14 + $0xb0] sm:$0xff] }
 0x18b   :  { %2544 = vmatmul.msk.f32.gmra.mxu1 %vm602_vm6, %v540_v38  ;;  %2581 = vmatmul.msk.f32.gmra.mxu3 %vm602_vm6, %v577_v39  ;;  %v592_v39 = vld [vmem:[%s4078_s14 + $0x1d8] sm:$0xff] }
 0x193   :  { %2545 = vmatmul.msk.f32.gmra.mxu1 %vm602_vm6, %v541_v40  ;;  %2582 = vmatmul.msk.f32.gmra.mxu3 %vm602_vm6, %v578_v41 }
 0x19b   :  { %2546 = vmatmul.msk.f32.gmra.mxu1 %vm602_vm6, %v542_v42  ;;  %2583 = vmatmul.msk.f32.gmra.mxu3 %vm602_vm6, %v579_v43  ;;  %v556_v42 = vld [vmem:[%s4078_s14 + $0xb8] sm:$0xff]  ;;  %v1707_v43 = vld [vmem:[%s4083_s2 + $0x8] sm:$0xff] }
 0x19c   :  { %1725 = vmatpush.msrb.mxu3 %v1707_v43 }
 0x1a3   :  { %2547 = vmatmul.msk.f32.gmra.mxu1 %vm602_vm6, %v543_v44  ;;  %2584 = vmatmul.msk.f32.gmra.mxu3 %vm602_vm6, %v580_v45  ;;  %v593_v45 = vld [vmem:[%s4078_s14 + $0x1e0] sm:$0xff] }
 0x1ab   :  { %2548 = vmatmul.msk.f32.gmra.mxu1 %vm602_vm6, %v544_v46  ;;  %2585 = vmatmul.msk.f32.gmra.mxu3 %vm602_vm6, %v581_v47  ;;  %v1706_v46 = vld [vmem:[%s4083_s2] sm:$0xff] }
 0x1ac   :  { %1726 = vmatpush.msrb.mxu3 %v1706_v46 }
 0x1b3   :  { %2549 = vmatmul.msk.f32.gmra.mxu1 %vm602_vm6, %v545_v48  ;;  %2586 = vmatmul.msk.f32.gmra.mxu3 %vm602_vm6, %v582_v49  ;;  %v557_v49 = vld [vmem:[%s4078_s14 + $0xc0] sm:$0xff] }
 0x1bb   :  { %2550 = vmatmul.msk.f32.gmra.mxu1 %vm602_vm6, %v546_v55  ;;  %2587 = vmatmul.msk.f32.gmra.mxu3 %vm602_vm6, %v583_v56 }
 0x1c3   :  { %2551 = vmatmul.msk.f32.gmra.mxu1 %vm602_vm6, %v547_v60  ;;  %2588 = vmatmul.msk.f32.gmra.mxu3 %vm602_vm6, %v584_v61  ;;  %v558_v61 = vld [vmem:[%s4078_s14 + $0xc8] sm:$0xff] }
 0x1c8   :  { %v3493_v0 = vpop.f32.mrf.mxu1 }
 0x1cb   :  { %2552 = vmatmul.msk.f32.gmra.mxu1 %vm602_vm6, %v548_v1  ;;  %2589 = vmatmul.msk.f32.gmra.mxu3 %vm602_vm6, %v585_v2  ;;  %v595_v2 = vld [vmem:[%s4078_s14 + $0x1f0] sm:$0xff] }
 0x1ce   :  { %v3499_v3 = vpop.f32.mrf.mxu3 }
 0x1d0   :  { %v816_v4 = vpop.f32.mrf.mxu1 }
 0x1d1   :  { %v817_v15 = vadd.f32 %v3508_v12, %v816_v4 }
 0x1d3   :  { %2553 = vmatmul.msk.f32.gmra.mxu1 %vm602_vm6, %v549_v5  ;;  %2590 = vmatmul.msk.f32.gmra.mxu3 %vm602_vm6, %v586_v6  ;;  %v1008_v18 = vmax.f32 %v817_v15, 0.0  ;;  %v559_v6 = vld [vmem:[%s4078_s14 + $0xd0] sm:$0xff] }
 0x1d6   :  { %v500_v8 = vpop.f32.mrf.mxu3 }
 0x1d7   :  { %v501_v9 = vadd.f32 %v2765_v7, %v500_v8  ;;  %v596_v8 = vld [vmem:[%s4078_s14 + $0x1f8] sm:$0xff] }
 0x1d8   :  { %v819_v10 = vpop.f32.mrf.mxu1 }
 0x1d9   :  { %v503_v13 = vmax.f32 %v501_v9, 0.0  ;;  %v820_v20 = vadd.f32 %v3508_v12, %v819_v10 }
 0x1db   :  { %2535 = vmatmul.msk.f32.vlgmr.msrb.gmra.mxu0 %vm415_vm4, %v503_v13  ;;  %2554 = vmatmul.msk.f32.gmra.mxu1 %vm602_vm6, %v550_v11  ;;  %v1009_v23 = vmax.f32 %v820_v20, 0.0  ;;  %v2762_v11 = vld [vmem:[%s4084_s27] ss:$0 sm:$0xff]  ;;  %s3018_s27 = scalar_lea.hbm %s3351_s25, 1 }
 0x1dc   :  { %2591 = vmatmul.msk.f32.gmra.mxu3 %vm602_vm6, %v587_v14  ;;  %v560_v14 = vld [vmem:[%s4078_s14 + $0xd8] sm:$0xff]  ;;  %v561_v20 = vld [vmem:[%s4078_s14 + $0xe0] sm:$0xff] }
 0x1de   :  { %v3559_v56 = vpop.f32.mrf.mxu3 }
 0x1e0   :  { %v822_v16 = vpop.f32.mrf.mxu1 }
 0x1e1   :  { %v823_v25 = vadd.f32 %v3508_v12, %v822_v16  ;;  %v3578_v16 = vadd.f32 %v2762_v11, %v3493_v0 }
 0x1e3   :  { %2555 = vmatmul.msk.f32.gmra.mxu1 %vm602_vm6, %v551_v17  ;;  %2601 = vmatmul.msk.f32.vlgmr.msra.gmra.mxu0 %vm1084_vm7, %v1008_v18  ;;  %v1010_v28 = vmax.f32 %v823_v25, 0.0 }
 0x1e4   :  { %2592 = vmatmul.msk.f32.gmra.mxu3 %vm602_vm6, %v588_v19 }
 0x1e6   :  { %v3569_v9 = vpop.f32.mrf.mxu3 }
 0x1e8   :  { %v825_v21 = vpop.f32.mrf.mxu1 }
 0x1e9   :  { %v826_v30 = vadd.f32 %v3508_v12, %v825_v21 }
 0x1eb   :  { %2556 = vmatmul.msk.f32.gmra.mxu1 %vm602_vm6, %v552_v22  ;;  %2602 = vmatmul.msk.f32.gmra.mxu0 %vm1084_vm7, %v1009_v23  ;;  %v1011_v33 = vmax.f32 %v826_v30, 0.0  ;;  %v562_v23 = vld [vmem:[%s4078_s14 + $0xe8] sm:$0xff] }
 0x1ec   :  { %2593 = vmatmul.msk.f32.gmra.mxu3 %vm602_vm6, %v589_v24 }
 0x1ee   :  { %v3582_v17 = vpop.f32.mrf.mxu3 }
 0x1f0   :  { %v828_v26 = vpop.f32.mrf.mxu1 }
 0x1f1   :  { %v829_v35 = vadd.f32 %v3508_v12, %v828_v26 }
 0x1f3   :  { %2557 = vmatmul.msk.f32.gmra.mxu1 %vm602_vm6, %v553_v27  ;;  %2603 = vmatmul.msk.f32.gmra.mxu0 %vm1084_vm7, %v1010_v28  ;;  %v1012_v38 = vmax.f32 %v829_v35, 0.0  ;;  %v563_v27 = vld [vmem:[%s4078_s14 + $0xf0] sm:$0xff]  ;;  %v565_v35 = vld [vmem:[%s4078_s14 + $0x100] sm:$0xff] }
 0x1f4   :  { %2594 = vmatmul.msk.f32.gmra.mxu3 %vm602_vm6, %v590_v29 }
 0x1f8   :  { %v831_v31 = vpop.f32.mrf.mxu1 }
 0x1f9   :  { %v832_v40 = vadd.f32 %v3508_v12, %v831_v31  ;;  %v564_v31 = vld [vmem:[%s4078_s14 + $0xf8] sm:$0xff] }
 0x1fb   :  { %2558 = vmatmul.msk.f32.gmra.mxu1 %vm602_vm6, %v554_v32  ;;  %2604 = vmatmul.msk.f32.gmra.mxu0 %vm1084_vm7, %v1011_v33  ;;  %v1013_v44 = vmax.f32 %v832_v40, 0.0  ;;  %v566_v40 = vld [vmem:[%s4078_s14 + $0x108] sm:$0xff] }
 0x1fc   :  { %2595 = vmatmul.msk.f32.gmra.mxu3 %vm602_vm6, %v591_v34 }
 0x200   :  { %v834_v36 = vpop.f32.mrf.mxu1 }
 0x201   :  { %v835_v47 = vadd.f32 %v3508_v12, %v834_v36 }
 0x203   :  { %2559 = vmatmul.msk.f32.gmra.mxu1 %vm602_vm6, %v555_v37  ;;  %2605 = vmatmul.msk.f32.gmra.mxu0 %vm1084_vm7, %v1012_v38  ;;  %v1014_v50 = vmax.f32 %v835_v47, 0.0 }
 0x204   :  { %2596 = vmatmul.msk.f32.gmra.mxu3 %vm602_vm6, %v592_v39 }
 0x208   :  { %v837_v41 = vpop.f32.mrf.mxu1 }
 0x209   :  { %v838_v55 = vadd.f32 %v3508_v12, %v837_v41 }
 0x20b   :  { %2560 = vmatmul.msk.f32.gmra.mxu1 %vm602_vm6, %v556_v42  ;;  %2606 = vmatmul.msk.f32.gmra.mxu0 %vm1084_vm7, %v1013_v44  ;;  %v1015_v1 = vmax.f32 %v838_v55, 0.0 }
 0x20c   :  { %2597 = vmatmul.msk.f32.gmra.mxu3 %vm602_vm6, %v593_v45  ;;  %v567_v45 = vld [vmem:[%s4078_s14 + $0x110] sm:$0xff] }
 0x210   :  { %v840_v48 = vpop.f32.mrf.mxu1 }
 0x211   :  { %v841_v4 = vadd.f32 %v3508_v12, %v840_v48 }
 0x213   :  { %2561 = vmatmul.msk.f32.gmra.mxu1 %vm602_vm6, %v557_v49  ;;  %2607 = vmatmul.msk.f32.gmra.mxu0 %vm1084_vm7, %v1014_v50  ;;  %v1016_v7 = vmax.f32 %v841_v4, 0.0  ;;  %v568_v50 = vld [vmem:[%s4078_s14 + $0x118] sm:$0xff]  ;;  %v2763_v4 = vld [vmem:[%s4085_s29] ss:$0 sm:$0xff] }
 0x214   :  { %2598 = vmatmul.msk.f32.gmra.mxu3 %vm602_vm6, %v594_v51 }
 0x218   :  { %v843_v60 = vpop.f32.mrf.mxu1 }
 0x219   :  { %v844_v10 = vadd.f32 %v3508_v12, %v843_v60 }
 0x21b   :  { %2562 = vmatmul.msk.f32.gmra.mxu1 %vm602_vm6, %v558_v61  ;;  %2608 = vmatmul.msk.f32.gmra.mxu0 %vm1084_vm7, %v1015_v1  ;;  %v1017_v15 = vmax.f32 %v844_v10, 0.0  ;;  %v569_v1 = vld [vmem:[%s4078_s14 + $0x120] sm:$0xff]  ;;  %v570_v10 = vld [vmem:[%s4078_s14 + $0x128] sm:$0xff]  ;;  %s4103_s14 = sld [smem:[#allocation56_spill]] }
 0x21c   :  { %2599 = vmatmul.msk.f32.gmra.mxu3 %vm602_vm6, %v595_v2 }
 0x220   :  { %v846_v5 = vpop.f32.mrf.mxu1 }
 0x221   :  { %v847_v18 = vadd.f32 %v3508_v12, %v846_v5 }
 0x223   :  { %2563 = vmatmul.msk.f32.gmra.mxu1 %vm602_vm6, %v559_v6  ;;  %2609 = vmatmul.msk.f32.gmra.mxu0 %vm1084_vm7, %v1016_v7  ;;  %v1018_v21 = vmax.f32 %v847_v18, 0.0  ;;  %v437_v6 = vadd.f32 %v2763_v4, %v3499_v3  ;;  %v440_v18 = vld [vmem:[%s4086_s7] sm:$0xff] }
 0x224   :  { %2600 = vmatmul.msk.f32.gmra.mxu3 %vm602_vm6, %v596_v8 }
 0x228   :  { %v849_v13 = vpop.f32.mrf.mxu1 }
 0x229   :  { %v850_v0 = vadd.f32 %v3508_v12, %v849_v13  ;;  %v441_v13 = vld [vmem:[%s4086_s7 + $0x8] sm:$0xff] }
 0x22a   :  { %463 = vmatpush.msrb.mxu2 %v441_v13 }
 0x22b   :  { %2564 = vmatmul.msk.f32.gmra.mxu1 %vm602_vm6, %v560_v14  ;;  %2610 = vmatmul.msk.f32.gmra.mxu0 %vm1084_vm7, %v1017_v15  ;;  %v1019_v24 = vmax.f32 %v850_v0, 0.0  ;;  %v439_v14 = vmax.f32 %v437_v6, 0.0 }
 0x22c   :  { %2665 = vmatmul.msk.f32.vlgmr.msrb.gmra.mxu3 %vm415_vm4, %v3578_v16  ;;  %464 = vmatpush.msrb.mxu2 %v440_v18 }
 0x22d   :  { %2532 = vmatmul.msk.f32.vlgmr.msrb.gmra.mxu2 %vm415_vm4, %v439_v14 }
 0x22e   :  { %2689 = vmatpush.msra.mxu2 %v3454_v52 }
 0x230   :  { %v852_v19 = vpop.f32.mrf.mxu1  ;;  %2690 = vmatpush.msra.mxu2 %v3458_v53 }
 0x231   :  { %v853_v25 = vadd.f32 %v3508_v12, %v852_v19 }
 0x232   :  { %2691 = vmatpush.msra.mxu2 %v3462_v54 }
 0x233   :  { %2565 = vmatmul.msk.f32.gmra.mxu1 %vm602_vm6, %v561_v20  ;;  %2611 = vmatmul.msk.f32.gmra.mxu0 %vm1084_vm7, %v1018_v21  ;;  %v1020_v28 = vmax.f32 %v853_v25, 0.0 }
 0x234   :  { %2692 = vmatpush.msra.mxu2 %v3468_v57 }
 0x236   :  { %2693 = vmatpush.msra.mxu2 %v3474_v58 }
 0x238   :  { %v855_v22 = vpop.f32.mrf.mxu1  ;;  %2694 = vmatpush.msra.mxu2 %v3478_v59  ;;  %v3652_v59 = vld [vmem:[%s4087_s10] ss:$0 sm:$0xff] }
 0x239   :  { %v856_v29 = vadd.f32 %v3508_v12, %v855_v22 }
 0x23a   :  { %2695 = vmatpush.msra.mxu2 %v3484_v62 }
 0x23b   :  { %2566 = vmatmul.msk.f32.gmra.mxu1 %vm602_vm6, %v562_v23  ;;  %2612 = vmatmul.msk.f32.gmra.mxu0 %vm1084_vm7, %v1019_v24  ;;  %v1021_v32 = vmax.f32 %v856_v29, 0.0 }
 0x23c   :  { %2696 = vmatpush.msra.mxu2 %v3488_v63 }
 0x240   :  { %v858_v26 = vpop.f32.mrf.mxu1 }
 0x241   :  { %v859_v33 = vadd.f32 %v3508_v12, %v858_v26 }
 0x243   :  { %2567 = vmatmul.msk.f32.gmra.mxu1 %vm602_vm6, %v563_v27  ;;  %2613 = vmatmul.msk.f32.gmra.mxu0 %vm1084_vm7, %v1020_v28  ;;  %v1022_v36 = vmax.f32 %v859_v33, 0.0 }
 0x248   :  { %v861_v30 = vpop.f32.mrf.mxu1 }
 0x249   :  { %v862_v37 = vadd.f32 %v3508_v12, %v861_v30 }
 0x24b   :  { %2568 = vmatmul.msk.f32.gmra.mxu1 %vm602_vm6, %v564_v31  ;;  %2614 = vmatmul.msk.f32.gmra.mxu0 %vm1084_vm7, %v1021_v32  ;;  %v1023_v41 = vmax.f32 %v862_v37, 0.0 }
 0x250   :  { %v864_v34 = vpop.f32.mrf.mxu1 }
 0x251   :  { %v865_v42 = vadd.f32 %v3508_v12, %v864_v34 }
 0x253   :  { %2569 = vmatmul.msk.f32.gmra.mxu1 %vm602_vm6, %v565_v35  ;;  %2615 = vmatmul.msk.f32.gmra.mxu0 %vm1084_vm7, %v1022_v36  ;;  %v1024_v46 = vmax.f32 %v865_v42, 0.0 }
 0x258   :  { %v3607_v38 = vpop.f32.mrf.mxu0  ;;  %v867_v39 = vpop.f32.mrf.mxu1 }
 0x259   :  { %v868_v47 = vadd.f32 %v3508_v12, %v867_v39 }
 0x25b   :  { %2570 = vmatmul.msk.f32.gmra.mxu1 %vm602_vm6, %v566_v40  ;;  %2616 = vmatmul.msk.f32.gmra.mxu0 %vm1084_vm7, %v1023_v41  ;;  %v1025_v51 = vmax.f32 %v868_v47, 0.0 }
 0x260   :  { %v870_v43 = vpop.f32.mrf.mxu1  ;;  %v3613_v44 = vpop.f32.mrf.mxu0 }
 0x261   :  { %v871_v55 = vadd.f32 %v3508_v12, %v870_v43  ;;  %v1295_v63 = vadd.f32 %v3652_v59, %v3613_v44 }
 0x263   :  { %2571 = vmatmul.msk.f32.gmra.mxu1 %vm602_vm6, %v567_v45  ;;  %2617 = vmatmul.msk.f32.gmra.mxu0 %vm1084_vm7, %v1024_v46  ;;  %v1026_v2 = vmax.f32 %v871_v55, 0.0  ;;  %v1486_v34 = vmax.f32 %v1295_v63, 0.0 }
 0x265   :  { %v1550_v42 = vsel %vm1084_vm7, %v1486_v34, -inf }
 0x268   :  { %v873_v48 = vpop.f32.mrf.mxu1  ;;  %v1297_v49 = vpop.f32.mrf.mxu0 }
 0x269   :  { %v874_v5 = vadd.f32 %v3508_v12, %v873_v48  ;;  %v1298_v27 = vadd.f32 %v3652_v59, %v1297_v49 }
 0x26b   :  { %2572 = vmatmul.msk.f32.gmra.mxu1 %vm602_vm6, %v568_v50  ;;  %2618 = vmatmul.msk.f32.gmra.mxu0 %vm1084_vm7, %v1025_v51  ;;  %v1027_v11 = vmax.f32 %v874_v5, 0.0  ;;  %v1487_v32 = vmax.f32 %v1298_v27, 0.0 }
 0x26d   :  { %v1551_v39 = vsel %vm1084_vm7, %v1487_v32, -inf }
 0x26e   :  { %v1552_v50 = vmax.f32 %v1550_v42, %v1551_v39 }
 0x270   :  { %v876_v60 = vpop.f32.mrf.mxu1  ;;  %v1300_v61 = vpop.f32.mrf.mxu0 }
 0x271   :  { %v877_v15 = vadd.f32 %v3508_v12, %v876_v60  ;;  %v1301_v30 = vadd.f32 %v3652_v59, %v1300_v61 }
 0x273   :  { %2573 = vmatmul.msk.f32.gmra.mxu1 %vm602_vm6, %v569_v1  ;;  %2619 = vmatmul.msk.f32.gmra.mxu0 %vm1084_vm7, %v1026_v2  ;;  %v1028_v3 = vmax.f32 %v877_v15, 0.0  ;;  %v1488_v35 = vmax.f32 %v1301_v30, 0.0 }
 0x275   :  { %v1553_v46 = vsel %vm1084_vm7, %v1488_v35, -inf }
 0x276   :  { %v1554_v1 = vmax.f32 %v1552_v50, %v1553_v46 }
 0x278   :  { %v879_v7 = vpop.f32.mrf.mxu1  ;;  %v1303_v8 = vpop.f32.mrf.mxu0 }
 0x279   :  { %v880_v21 = vadd.f32 %v3508_v12, %v879_v7  ;;  %v1304_v33 = vadd.f32 %v3652_v59, %v1303_v8 }
 0x27b   :  { %2574 = vmatmul.msk.f32.gmra.mxu1 %vm602_vm6, %v570_v10  ;;  %2620 = vmatmul.msk.f32.gmra.mxu0 %vm1084_vm7, %v1027_v11  ;;  %v1029_v52 = vmax.f32 %v880_v21, 0.0  ;;  %v1489_v40 = vmax.f32 %v1304_v33, 0.0 }
 0x27d   :  { %v1555_v51 = vsel %vm1084_vm7, %v1489_v40, -inf }
 0x27e   :  { %v1556_v7 = vmax.f32 %v1554_v1, %v1555_v51 }
 0x280   :  { %v882_v19 = vpop.f32.mrf.mxu1  ;;  %v1306_v20 = vpop.f32.mrf.mxu0 }
 0x281   :  { %v883_v53 = vadd.f32 %v3508_v12, %v882_v19  ;;  %v1307_v36 = vadd.f32 %v3652_v59, %v1306_v20 }
 0x283   :  { %2621 = vmatmul.msk.f32.gmra.mxu0 %vm1084_vm7, %v1028_v3  ;;  %v1030_v24 = vmax.f32 %v883_v53, 0.0  ;;  %v1490_v47 = vmax.f32 %v1307_v36, 0.0 }
 0x285   :  { %v1557_v4 = vsel %vm1084_vm7, %v1490_v47, -inf }
 0x286   :  { %v1558_v13 = vmax.f32 %v1556_v7, %v1557_v4 }
 0x288   :  { %v885_v0 = vpop.f32.mrf.mxu1  ;;  %v1309_v22 = vpop.f32.mrf.mxu0 }
 0x289   :  { %v886_v57 = vadd.f32 %v3508_v12, %v885_v0  ;;  %v1310_v41 = vadd.f32 %v3652_v59, %v1309_v22 }
 0x28b   :  { %2622 = vmatmul.msk.f32.gmra.mxu0 %vm1084_vm7, %v1029_v52  ;;  %v1031_v26 = vmax.f32 %v886_v57, 0.0  ;;  %v1491_v55 = vmax.f32 %v1310_v41, 0.0 }
 0x28d   :  { %v1559_v8 = vsel %vm1084_vm7, %v1491_v55, -inf }
 0x28e   :  { %v1560_v0 = vmax.f32 %v1558_v13, %v1559_v8 }
 0x290   :  { %v888_v54 = vpop.f32.mrf.mxu1  ;;  %v1312_v23 = vpop.f32.mrf.mxu0 }
 0x291   :  { %v889_v62 = vadd.f32 %v3508_v12, %v888_v54  ;;  %v1313_v43 = vadd.f32 %v3652_v59, %v1312_v23 }
 0x293   :  { %2623 = vmatmul.msk.f32.gmra.mxu0 %vm1084_vm7, %v1030_v24  ;;  %v1032_v31 = vmax.f32 %v889_v62, 0.0  ;;  %v1492_v2 = vmax.f32 %v1313_v43, 0.0 }
 0x295   :  { %v1561_v14 = vsel %vm1084_vm7, %v1492_v2, -inf }
 0x296   :  { %v1562_v54 = vmax.f32 %v1560_v0, %v1561_v14  ;;  %v939_v0 = vpop.f32.mrf.mxu3 }
 0x298   :  { %v891_v58 = vpop.f32.mrf.mxu1  ;;  %v1315_v25 = vpop.f32.mrf.mxu0 }
 0x299   :  { %v892_v37 = vadd.f32 %v3508_v12, %v891_v58  ;;  %v1316_v60 = vadd.f32 %v3652_v59, %v1315_v25 }
 0x29b   :  { %2624 = vmatmul.msk.f32.gmra.mxu0 %vm1084_vm7, %v1031_v26  ;;  %v1033_v48 = vmax.f32 %v892_v37, 0.0  ;;  %v1493_v10 = vmax.f32 %v1316_v60, 0.0 }
 0x29d   :  { %v1563_v22 = vsel %vm1084_vm7, %v1493_v10, -inf }
 0x29e   :  { %v1564_v57 = vmax.f32 %v1562_v54, %v1563_v22 }
 0x2a0   :  { %v894_v28 = vpop.f32.mrf.mxu1  ;;  %v1318_v29 = vpop.f32.mrf.mxu0 }
 0x2a1   :  { %v895_v5 = vadd.f32 %v3508_v12, %v894_v28  ;;  %v1319_v6 = vadd.f32 %v3652_v59, %v1318_v29 }
 0x2a3   :  { %2625 = vmatmul.msk.f32.gmra.mxu0 %vm1084_vm7, %v1032_v31  ;;  %v1034_v19 = vmax.f32 %v895_v5, 0.0  ;;  %v1494_v20 = vmax.f32 %v1319_v6, 0.0 }
 0x2a5   :  { %v1565_v23 = vsel %vm1084_vm7, %v1494_v20, -inf }
 0x2a6   :  { %v1566_v25 = vmax.f32 %v1564_v57, %v1565_v23 }
 0x2a8   :  { %v897_v44 = vpop.f32.mrf.mxu1  ;;  %v1321_v45 = vpop.f32.mrf.mxu0 }
 0x2a9   :  { %v898_v49 = vadd.f32 %v3508_v12, %v897_v44  ;;  %v1322_v11 = vadd.f32 %v3652_v59, %v1321_v45 }
 0x2ab   :  { %v1035_v61 = vmax.f32 %v898_v49, 0.0  ;;  %2626 = vmatmul.msk.f32.gmra.mxu0 %vm1084_vm7, %v1033_v48  ;;  %v1495_v52 = vmax.f32 %v1322_v11, 0.0 }
 0x2ad   :  { %2628 = vmatmul.msk.f32.vlgmr.msra.gmra.mxu2 %vm1084_vm7, %v1035_v61  ;;  %v1567_v58 = vsel %vm1084_vm7, %v1495_v52, -inf }
 0x2ae   :  { %v1568_v29 = vmax.f32 %v1566_v25, %v1567_v58  ;;  %v942_v58 = vpop.f32.mrf.mxu3 }
 0x2b0   :  { %v900_v15 = vpop.f32.mrf.mxu1  ;;  %v1324_v18 = vpop.f32.mrf.mxu0 }
 0x2b1   :  { %v901_v3 = vadd.f32 %v3508_v12, %v900_v15  ;;  %v1325_v21 = vadd.f32 %v3652_v59, %v1324_v18 }
 0x2b3   :  { %v1036_v53 = vmax.f32 %v901_v3, 0.0  ;;  %2627 = vmatmul.msk.f32.gmra.mxu0 %vm1084_vm7, %v1034_v19  ;;  %v1496_v24 = vmax.f32 %v1325_v21, 0.0 }
 0x2b5   :  { %2629 = vmatmul.msk.f32.gmra.mxu2 %vm1084_vm7, %v1036_v53  ;;  %v1569_v27 = vsel %vm1084_vm7, %v1496_v24, -inf }
 0x2b6   :  { %v1570_v32 = vmax.f32 %v1568_v29, %v1569_v27  ;;  %v931_v29 = vadd.f32 %v3508_v12, %v3559_v56  ;;  %v937_v56 = vadd.f32 %v3508_v12, %v3582_v17 }
 0x2b8   :  { %v903_v26 = vpop.f32.mrf.mxu1  ;;  %v1327_v62 = vpop.f32.mrf.mxu0 }
 0x2b9   :  { %v904_v63 = vadd.f32 %v3508_v12, %v903_v26  ;;  %v1328_v28 = vadd.f32 %v3652_v59, %v1327_v62 }
 0x2bb   :  { %v1037_v30 = vmax.f32 %v904_v63, 0.0  ;;  %v1497_v31 = vmax.f32 %v1328_v28, 0.0  ;;  %v945_v28 = vpop.f32.mrf.mxu3 }
 0x2bd   :  { %v1571_v33 = vsel %vm1084_vm7, %v1497_v31, -inf  ;;  %2630 = vmatmul.msk.f32.gmra.mxu2 %vm1084_vm7, %v1037_v30  ;;  %v1046_v31 = vmax.f32 %v931_v29, 0.0 }
 0x2be   :  { %v1572_v34 = vmax.f32 %v1570_v32, %v1571_v33  ;;  %v934_v32 = vadd.f32 %v3508_v12, %v3569_v9 }
 0x2c0   :  { %v906_v35 = vpop.f32.mrf.mxu1  ;;  %v1330_v36 = vpop.f32.mrf.mxu0 }
 0x2c1   :  { %v907_v37 = vadd.f32 %v3508_v12, %v906_v35  ;;  %v1331_v39 = vadd.f32 %v3652_v59, %v1330_v36  ;;  %v466_v35 = vpop.f32.mrf.mxu2 }
 0x2c3   :  { %v1038_v40 = vmax.f32 %v907_v37, 0.0  ;;  %v1498_v41 = vmax.f32 %v1331_v39, 0.0  ;;  %v948_v33 = vpop.f32.mrf.mxu3  ;;  %v1764_v39 = vld [vmem:[%s4089_s0 + $0x8] sm:$0xff] }
 0x2c4   :  { %1782 = vmatpush.msra.mxu3 %v1764_v39 }
 0x2c5   :  { %v1573_v42 = vsel %vm1084_vm7, %v1498_v41, -inf  ;;  %2631 = vmatmul.msk.f32.gmra.mxu2 %vm1084_vm7, %v1038_v40  ;;  %v1047_v40 = vmax.f32 %v934_v32, 0.0  ;;  %v1763_v41 = vld [vmem:[%s4089_s0] sm:$0xff] }
 0x2c6   :  { %v1574_v43 = vmax.f32 %v1572_v34, %v1573_v42  ;;  %v2768_v34 = vld [vmem:[%s4088_s11] ss:$0 sm:$0xff]  ;;  %1783 = vmatpush.msra.mxu3 %v1763_v41 }
 0x2c7   :  { %v3723_v37 = vadd.f32 %v2768_v34, %v466_v35 }
 0x2c8   :  { %v909_v44 = vpop.f32.mrf.mxu1  ;;  %v1333_v45 = vpop.f32.mrf.mxu0 }
 0x2c9   :  { %v910_v46 = vadd.f32 %v3508_v12, %v909_v44  ;;  %v1334_v47 = vadd.f32 %v3652_v59, %v1333_v45  ;;  %2667 = vmatmul.msk.f32.vlgmr.msra.gmra.mxu3 %vm415_vm4, %v3723_v37  ;;  %v940_v44 = vadd.f32 %v3508_v12, %v939_v0 }
 0x2cb   :  { %v1039_v48 = vmax.f32 %v910_v46, 0.0  ;;  %v1499_v49 = vmax.f32 %v1334_v47, 0.0  ;;  %v3732_v9 = vpop.f32.mrf.mxu3  ;;  %v1049_v46 = vmax.f32 %v940_v44, 0.0 }
 0x2cc   :  { %v952_v44 = vadd.f32 %v3508_v12, %v3732_v9 }
 0x2cd   :  { %v1575_v50 = vsel %vm1084_vm7, %v1499_v49, -inf  ;;  %2632 = vmatmul.msk.f32.gmra.mxu2 %vm1084_vm7, %v1039_v48  ;;  %v943_v49 = vadd.f32 %v3508_v12, %v942_v58 }
 0x2ce   :  { %v1576_v51 = vmax.f32 %v1574_v43, %v1575_v50  ;;  %v1048_v43 = vmax.f32 %v937_v56, 0.0 }
 0x2d0   :  { %v912_v55 = vpop.f32.mrf.mxu1  ;;  %v1336_v60 = vpop.f32.mrf.mxu0 }
 0x2d1   :  { %v913_v61 = vadd.f32 %v3508_v12, %v912_v55  ;;  %v1337_v1 = vadd.f32 %v3652_v59, %v1336_v60 }
 0x2d3   :  { %v1040_v2 = vmax.f32 %v913_v61, 0.0  ;;  %v1500_v4 = vmax.f32 %v1337_v1, 0.0  ;;  %v3736_v47 = vpop.f32.mrf.mxu3  ;;  %v1050_v61 = vmax.f32 %v943_v49, 0.0 }
 0x2d4   :  { %v955_v9 = vadd.f32 %v3508_v12, %v3736_v47  ;;  %v2766_v47 = vld [vmem:[%s4090_s3] ss:$0 sm:$0xff] }
 0x2d5   :  { %v1577_v5 = vsel %vm1084_vm7, %v1500_v4, -inf  ;;  %2633 = vmatmul.msk.f32.gmra.mxu2 %vm1084_vm7, %v1040_v2 }
 0x2d6   :  { %v1578_v6 = vmax.f32 %v1576_v51, %v1577_v5 }
 0x2d8   :  { %v915_v7 = vpop.f32.mrf.mxu1  ;;  %v1339_v8 = vpop.f32.mrf.mxu0 }
 0x2d9   :  { %v916_v10 = vadd.f32 %v3508_v12, %v915_v7  ;;  %v1340_v11 = vadd.f32 %v3652_v59, %v1339_v8  ;;  %v946_v8 = vadd.f32 %v3508_v12, %v945_v28 }
 0x2db   :  { %v1041_v13 = vmax.f32 %v916_v10, 0.0  ;;  %v1501_v14 = vmax.f32 %v1340_v11, 0.0  ;;  %v957_v10 = vpop.f32.mrf.mxu3 }
 0x2dd   :  { %v1579_v15 = vsel %vm1084_vm7, %v1501_v14, -inf  ;;  %2634 = vmatmul.msk.f32.gmra.mxu2 %vm1084_vm7, %v1041_v13 }
 0x2de   :  { %v3707_v18 = vmax.f32 %v1578_v6, %v1579_v15 }
 0x2e0   :  { %v918_v19 = vpop.f32.mrf.mxu1  ;;  %v1342_v20 = vpop.f32.mrf.mxu0 }
 0x2e1   :  { %v919_v3 = vadd.f32 %v3508_v12, %v918_v19  ;;  %v1343_v17 = vadd.f32 %v3652_v59, %v1342_v20 }
 0x2e3   :  { %v1042_v21 = vmax.f32 %v919_v3, 0.0  ;;  %v1502_v1 = vmax.f32 %v1343_v17, 0.0  ;;  %v960_v28 = vpop.f32.mrf.mxu3 }
 0x2e5   :  { %2635 = vmatmul.msk.f32.gmra.mxu2 %vm1084_vm7, %v1042_v21  ;;  %v1587_v11 = vsel %vm1084_vm7, %v1502_v1, -inf }
 0x2e8   :  { %v921_v22 = vpop.f32.mrf.mxu1  ;;  %v1345_v52 = vpop.f32.mrf.mxu0 }
 0x2e9   :  { %v922_v53 = vadd.f32 %v3508_v12, %v921_v22  ;;  %v1346_v48 = vadd.f32 %v3652_v59, %v1345_v52  ;;  %v1051_v52 = vmax.f32 %v946_v8, 0.0 }
 0x2eb   :  { %v1043_v54 = vmax.f32 %v922_v53, 0.0  ;;  %v1503_v51 = vmax.f32 %v1346_v48, 0.0  ;;  %v963_v49 = vpop.f32.mrf.mxu3 }
 0x2ed   :  { %2636 = vmatmul.msk.f32.gmra.mxu2 %vm1084_vm7, %v1043_v54  ;;  %v1588_v5 = vsel %vm1084_vm7, %v1503_v51, -inf  ;;  %v1053_v51 = vmax.f32 %v952_v44, 0.0 }
 0x2ee   :  { %v1589_v19 = vmax.f32 %v1587_v11, %v1588_v5 }
 0x2f0   :  { %v924_v23 = vpop.f32.mrf.mxu1  ;;  %v1348_v24 = vpop.f32.mrf.mxu0 }
 0x2f1   :  { %v925_v57 = vadd.f32 %v3508_v12, %v924_v23  ;;  %v1349_v50 = vadd.f32 %v3652_v59, %v1348_v24 }
 0x2f3   :  { %v1044_v25 = vmax.f32 %v925_v57, 0.0  ;;  %v1504_v2 = vmax.f32 %v1349_v50, 0.0  ;;  %v966_v8 = vpop.f32.mrf.mxu3 }
 0x2f5   :  { %2637 = vmatmul.msk.f32.gmra.mxu2 %vm1084_vm7, %v1044_v25  ;;  %v1590_v13 = vsel %vm1084_vm7, %v1504_v2, -inf }
 0x2f6   :  { %v1591_v0 = vmax.f32 %v1589_v19, %v1590_v13  ;;  %v958_v13 = vadd.f32 %v3508_v12, %v957_v10 }
 0x2f8   :  { %v927_v26 = vpop.f32.mrf.mxu1  ;;  %v1351_v62 = vpop.f32.mrf.mxu0 }
 0x2f9   :  { %v928_v27 = vadd.f32 %v3508_v12, %v927_v26  ;;  %v1352_v55 = vadd.f32 %v3652_v59, %v1351_v62  ;;  %v949_v62 = vadd.f32 %v3508_v12, %v948_v33 }
 0x2fb   :  { %v1045_v63 = vmax.f32 %v928_v27, 0.0  ;;  %v1505_v6 = vmax.f32 %v1352_v55, 0.0 }
 0x2fd   :  { %2638 = vmatmul.msk.f32.gmra.mxu2 %vm1084_vm7, %v1045_v63  ;;  %v1592_v20 = vsel %vm1084_vm7, %v1505_v6, -inf  ;;  %v1054_v6 = vmax.f32 %v955_v9, 0.0 }
 0x2fe   :  { %v1593_v24 = vmax.f32 %v1591_v0, %v1592_v20  ;;  %v1055_v20 = vmax.f32 %v958_v13, 0.0  ;;  %v969_v0 = vpop.f32.mrf.mxu3 }
 0x300   :  { %v1354_v30 = vpop.f32.mrf.mxu0 }
 0x301   :  { %v1355_v4 = vadd.f32 %v3652_v59, %v1354_v30 }
 0x303   :  { %v1506_v14 = vmax.f32 %v1355_v4, 0.0 }
 0x305   :  { %2639 = vmatmul.msk.f32.gmra.mxu2 %vm1084_vm7, %v1046_v31  ;;  %v1594_v53 = vsel %vm1084_vm7, %v1506_v14, -inf }
 0x306   :  { %v1595_v26 = vmax.f32 %v1593_v24, %v1594_v53  ;;  %v1581_v53 = vrot.slane %v3707_v18, 4 }
 0x308   :  { %v1357_v36 = vpop.f32.mrf.mxu0 }
 0x309   :  { %v1358_v7 = vadd.f32 %v3652_v59, %v1357_v36  ;;  %v1052_v36 = vmax.f32 %v949_v62, 0.0 }
 0x30b   :  { %v1507_v3 = vmax.f32 %v1358_v7, 0.0 }
 0x30d   :  { %2640 = vmatmul.msk.f32.gmra.mxu2 %vm1084_vm7, %v1047_v40  ;;  %v1596_v57 = vsel %vm1084_vm7, %v1507_v3, -inf }
 0x30e   :  { %v1597_v29 = vmax.f32 %v1595_v26, %v1596_v57  ;;  %v964_v26 = vadd.f32 %v3508_v12, %v963_v49 }
 0x310   :  { %v1360_v42 = vpop.f32.mrf.mxu0 }
 0x311   :  { %v1361_v15 = vadd.f32 %v3652_v59, %v1360_v42 }
 0x313   :  { %v1508_v54 = vmax.f32 %v1361_v15, 0.0 }
 0x315   :  { %2641 = vmatmul.msk.f32.gmra.mxu2 %vm1084_vm7, %v1048_v43  ;;  %v1598_v27 = vsel %vm1084_vm7, %v1508_v54, -inf }
 0x316   :  { %v1599_v32 = vmax.f32 %v1597_v29, %v1598_v27  ;;  %v972_v27 = vpop.f32.mrf.mxu3 }
 0x318   :  { %v1363_v45 = vpop.f32.mrf.mxu0 }
 0x319   :  { %v1364_v21 = vadd.f32 %v3652_v59, %v1363_v45 }
 0x31b   :  { %v1509_v58 = vmax.f32 %v1364_v21, 0.0 }
 0x31d   :  { %2642 = vmatmul.msk.f32.gmra.mxu2 %vm1084_vm7, %v1049_v46  ;;  %v1600_v30 = vsel %vm1084_vm7, %v1509_v58, -inf }
 0x31e   :  { %v1601_v41 = vmax.f32 %v1599_v32, %v1600_v30 }
 0x320   :  { %v1366_v60 = vpop.f32.mrf.mxu0 }
 0x321   :  { %v1367_v23 = vadd.f32 %v3652_v59, %v1366_v60 }
 0x323   :  { %v1510_v63 = vmax.f32 %v1367_v23, 0.0  ;;  %v1789_v23 = vld [vmem:[%s4091_s30] sm:$0xff] }
 0x324   :  { %1808 = vmatpush.msrb.mxu3 %v1789_v23 }
 0x325   :  { %2643 = vmatmul.msk.f32.gmra.mxu2 %vm1084_vm7, %v1050_v61  ;;  %v1602_v39 = vsel %vm1084_vm7, %v1510_v63, -inf }
 0x326   :  { %v1603_v43 = vmax.f32 %v1601_v41, %v1602_v39  ;;  %v975_v41 = vpop.f32.mrf.mxu3 }
 0x328   :  { %v1369_v22 = vpop.f32.mrf.mxu0 }
 0x329   :  { %v1370_v25 = vadd.f32 %v3652_v59, %v1369_v22  ;;  %v3783_v22 = vadd.f32 %v2766_v47, %v3607_v38  ;;  %v1582_v38 = vmax.f32 %v3707_v18, %v1581_v53  ;;  %v976_v47 = vadd.f32 %v3508_v12, %v975_v41 }
 0x32b   :  { %v1511_v31 = vmax.f32 %v1370_v25, 0.0  ;;  %2668 = vmatmul.msk.f32.vlgmr.msrb.gmra.mxu3 %vm384_vm0, %v3783_v22  ;;  %v1583_v63 = vrot.slane %v1582_v38, 2 }
 0x32d   :  { %2644 = vmatmul.msk.f32.gmra.mxu2 %vm1084_vm7, %v1051_v52  ;;  %v1604_v33 = vsel %vm1084_vm7, %v1511_v31, -inf  ;;  %v961_v52 = vadd.f32 %v3508_v12, %v960_v28  ;;  %v1057_v31 = vmax.f32 %v964_v26, 0.0  ;;  %v1584_v32 = vmax.f32 %v1582_v38, %v1583_v63 }
 0x32e   :  { %v1605_v46 = vmax.f32 %v1603_v43, %v1604_v33  ;;  %v978_v9 = vpop.f32.mrf.mxu3 }
 0x32f   :  { %v1056_v57 = vmax.f32 %v961_v52, 0.0  ;;  %v1585_v39 = vrot.slane %v1584_v32, 1 }
 0x330   :  { %v1372_v34 = vpop.f32.mrf.mxu0  ;;  %v1375_v35 = vpop.f32.mrf.mxu2 }
 0x331   :  { %v1373_v40 = vadd.f32 %v3652_v59, %v1372_v34  ;;  %v1376_v42 = vadd.f32 %v3652_v59, %v1375_v35 }
 0x333   :  { %v1512_v56 = vmax.f32 %v1373_v40, 0.0  ;;  %v1513_v48 = vmax.f32 %v1376_v42, 0.0 }
 0x335   :  { %v1606_v45 = vsel %vm1084_vm7, %v1512_v56, -inf  ;;  %2645 = vmatmul.msk.f32.gmra.mxu2 %vm1084_vm7, %v1052_v36  ;;  %v1608_v60 = vsel %vm1084_vm7, %v1513_v48, -inf  ;;  %v967_v36 = vadd.f32 %v3508_v12, %v966_v8 }
 0x336   :  { %v1607_v17 = vmax.f32 %v1605_v46, %v1606_v45  ;;  %v1586_v45 = vmax.f32 %v1584_v32, %v1585_v39 }
 0x337   :  { %v1058_v42 = vmax.f32 %v967_v36, 0.0 }
 0x338   :  { %v1378_v50 = vpop.f32.mrf.mxu2  ;;  %v1609_v1 = vmax.f32 %v1607_v17, %v1608_v60  ;;  %v970_v17 = vadd.f32 %v3508_v12, %v969_v0 }
 0x339   :  { %v1379_v55 = vadd.f32 %v3652_v59, %v1378_v50 }
 0x33b   :  { %v1514_v61 = vmax.f32 %v1379_v55, 0.0 }
 0x33d   :  { %v1610_v2 = vsel %vm1084_vm7, %v1514_v61, -inf  ;;  %2646 = vmatmul.msk.f32.gmra.mxu2 %vm1084_vm7, %v1053_v51  ;;  %v1059_v61 = vmax.f32 %v970_v17, 0.0 }
 0x33e   :  { %v1611_v4 = vmax.f32 %v1609_v1, %v1610_v2 }
 0x340   :  { %v1381_v5 = vpop.f32.mrf.mxu2 }
 0x341   :  { %v1382_v7 = vadd.f32 %v3652_v59, %v1381_v5 }
 0x343   :  { %v1515_v11 = vmax.f32 %v1382_v7, 0.0  ;;  %v1705_v7 = vld [vmem:[%s4092_s15 + $0x38] sm:$0xff] }
 0x344   :  { %1751 = vmatpush.msrb.mxu0 %v1705_v7 }
 0x345   :  { %v1612_v14 = vsel %vm1084_vm7, %v1515_v11, -inf  ;;  %2647 = vmatmul.msk.f32.gmra.mxu2 %vm1084_vm7, %v1054_v6 }
 0x346   :  { %v1613_v15 = vmax.f32 %v1611_v4, %v1612_v14  ;;  %v973_v4 = vadd.f32 %v3508_v12, %v972_v27 }
 0x348   :  { %v1384_v19 = vpop.f32.mrf.mxu2  ;;  %v1060_v11 = vmax.f32 %v973_v4, 0.0 }
 0x349   :  { %v1385_v3 = vadd.f32 %v3652_v59, %v1384_v19 }
 0x34b   :  { %v1516_v21 = vmax.f32 %v1385_v3, 0.0 }
 0x34d   :  { %v1614_v10 = vsel %vm1084_vm7, %v1516_v21, -inf  ;;  %2648 = vmatmul.msk.f32.gmra.mxu2 %vm1084_vm7, %v1055_v20  ;;  %v1061_v21 = vmax.f32 %v976_v47, 0.0 }
 0x34e   :  { %v1615_v54 = vmax.f32 %v1613_v15, %v1614_v10  ;;  %v981_v15 = vpop.f32.mrf.mxu3  ;;  %v3818_v10 = vld [vmem:[%s4082_s28] ss:$0 sm:$0xff]  ;;  %s3014_s28 = sshra.s32 %s2464_s1, 4  ;;  %s3015_s28 = int_to_ptr.hbm [resolvable:$true] %s3014_s28 }
 0x34f   :  { %v979_v53 = vadd.f32 %v3818_v10, %v978_v9  ;;  %s3016_s2 = scalar_lea.hbm %s3015_s28, 1  ;;  %p3019_p13 = scmp.lt.s32.totalorder %s3015_s28, %s3351_s25 }
 0x350   :  { %v1387_v24 = vpop.f32.mrf.mxu2  ;;  %p3017_p12 = scmp.ne.s32.totalorder %s3015_s28, %s3016_s2  ;;  %p3020_p0 = scmp.lt.s32.totalorder %s3018_s27, %s3016_s2 }
 0x351   :  { %v1388_v58 = vadd.f32 %v3652_v59, %v1387_v24 }
 0x352   :  { %p3021_p1 = por %p3020_p0, %p3019_p13 }
 0x353   :  { %v1517_v25 = vmax.f32 %v1388_v58, 0.0 }
 0x354   :  { %p3022_p2 = pnand %p3021_p1, %p3017_p12 }
 0x355   :  { %v1616_v62 = vsel %vm1084_vm7, %v1517_v25, -inf  ;;  %2649 = vmatmul.msk.f32.gmra.mxu2 %vm1084_vm7, %v1056_v57  ;;  %v1062_v57 = vmax.f32 %v979_v53, 0.0  ;;  %v982_v25 = vadd.f32 %v3818_v10, %v981_v15 }
 0x356   :  { %v1617_v28 = vmax.f32 %v1615_v54, %v1616_v62  ;;  %v984_v23 = vpop.f32.mrf.mxu3 }
 0x358   :  { %v1618_v29 = vrot.slane %v1617_v28, 4  ;;  %v1390_v30 = vpop.f32.mrf.mxu2 }
 0x359   :  { %v1391_v18 = vadd.f32 %v3652_v59, %v1390_v30 }
 0x35a   :  { %v1619_v34 = vmax.f32 %v1617_v28, %v1618_v29  ;;  %v1063_v28 = vmax.f32 %v982_v25, 0.0 }
 0x35b   :  { %v1518_v43 = vmax.f32 %v1391_v18, 0.0 }
 0x35c   :  { %v1620_v35 = vrot.slane %v1619_v34, 2 }
 0x35d   :  { %2650 = vmatmul.msk.f32.gmra.mxu2 %vm1084_vm7, %v1057_v31  ;;  %v1624_v50 = vsel %vm1084_vm7, %v1518_v43, -inf  ;;  %v985_v31 = vadd.f32 %v3818_v10, %v984_v23 }
 0x35e   :  { %v1621_v40 = vmax.f32 %v1619_v34, %v1620_v35  ;;  %v987_v27 = vpop.f32.mrf.mxu3  ;;  %v1704_v35 = vld [vmem:[%s4092_s15 + $0x30] sm:$0xff] }
 0x35f   :  { %1752 = vmatpush.msrb.mxu0 %v1704_v35  ;;  %v1064_v18 = vmax.f32 %v985_v31, 0.0 }
 0x360   :  { %v1622_v33 = vrot.slane %v1621_v40, 1  ;;  %v1393_v56 = vpop.f32.mrf.mxu2 }
 0x361   :  { %v1394_v44 = vadd.f32 %v3652_v59, %v1393_v56 }
 0x362   :  { %v1623_v46 = vmax.f32 %v1621_v40, %v1622_v33  ;;  %v988_v33 = vadd.f32 %v3818_v10, %v987_v27 }
 0x363   :  { %v1519_v48 = vmax.f32 %v1394_v44, 0.0 }
 0x364   :  { %v3801_v49 = vsel %vm1735_vm8, %v1623_v46, %v1586_v45  ;;  %v1065_v44 = vmax.f32 %v988_v33, 0.0 }
 0x365   :  { %v1625_v51 = vsel %vm1084_vm7, %v1519_v48, -inf  ;;  %2651 = vmatmul.msk.f32.gmra.mxu2 %vm1084_vm7, %v1058_v42 }
 0x366   :  { %v1626_v55 = vmax.f32 %v1624_v50, %v1625_v51  ;;  %v990_v40 = vpop.f32.mrf.mxu3 }
 0x367   :  { %v991_v17 = vadd.f32 %v3818_v10, %v990_v40 }
 0x368   :  { %v1396_v60 = vpop.f32.mrf.mxu2 }
 0x369   :  { %v1397_v1 = vadd.f32 %v3652_v59, %v1396_v60  ;;  %v1066_v60 = vmax.f32 %v991_v17, 0.0 }
 0x36b   :  { %v1520_v2 = vmax.f32 %v1397_v1, 0.0 }
 0x36d   :  { %v1627_v5 = vsel %vm1084_vm7, %v1520_v2, -inf  ;;  %2652 = vmatmul.msk.f32.gmra.mxu2 %vm1084_vm7, %v1059_v61 }
 0x36e   :  { %v1628_v6 = vmax.f32 %v1626_v55, %v1627_v5  ;;  %v993_v48 = vpop.f32.mrf.mxu3 }
 0x36f   :  { %v994_v9 = vadd.f32 %v3818_v10, %v993_v48 }
 0x370   :  { %v1399_v8 = vpop.f32.mrf.mxu2 }
 0x371   :  { %v1400_v13 = vadd.f32 %v3652_v59, %v1399_v8  ;;  %v1067_v8 = vmax.f32 %v994_v9, 0.0 }
 0x373   :  { %v1521_v14 = vmax.f32 %v1400_v13, 0.0 }
 0x375   :  { %v1629_v19 = vsel %vm1084_vm7, %v1521_v14, -inf  ;;  %2653 = vmatmul.msk.f32.gmra.mxu2 %vm1084_vm7, %v1060_v11 }
 0x376   :  { %v1630_v20 = vmax.f32 %v1628_v6, %v1629_v19  ;;  %v996_v4 = vpop.f32.mrf.mxu3  ;;  %v1703_v6 = vld [vmem:[%s4092_s15 + $0x28] sm:$0xff] }
 0x377   :  { %1753 = vmatpush.msrb.mxu0 %v1703_v6  ;;  %v997_v14 = vadd.f32 %v3818_v10, %v996_v4 }
 0x378   :  { %v1402_v3 = vpop.f32.mrf.mxu2 }
 0x379   :  { %v1403_v0 = vadd.f32 %v3652_v59, %v1402_v3  ;;  %v1068_v3 = vmax.f32 %v997_v14, 0.0 }
 0x37b   :  { %v1522_v52 = vmax.f32 %v1403_v0, 0.0 }
 0x37d   :  { %v1631_v54 = vsel %vm1084_vm7, %v1522_v52, -inf  ;;  %2654 = vmatmul.msk.f32.gmra.mxu2 %vm1084_vm7, %v1061_v21 }
 0x37e   :  { %v1632_v12 = vmax.f32 %v1630_v20, %v1631_v54  ;;  %v999_v19 = vpop.f32.mrf.mxu3 }
 0x37f   :  { %v1000_v52 = vadd.f32 %v3818_v10, %v999_v19 }
 0x380   :  { %v1405_v24 = vpop.f32.mrf.mxu2 }
 0x381   :  { %v1406_v58 = vadd.f32 %v3652_v59, %v1405_v24 }
 0x383   :  { %v1523_v38 = vmax.f32 %v1406_v58, 0.0 }
 0x385   :  { %v1633_v26 = vsel %vm1084_vm7, %v1523_v38, -inf  ;;  %2655 = vmatmul.msk.f32.gmra.mxu2 %vm1084_vm7, %v1062_v57 }
 0x386   :  { %v1634_v62 = vmax.f32 %v1632_v12, %v1633_v26  ;;  %v1069_v12 = vmax.f32 %v1000_v52, 0.0  ;;  %v1002_v57 = vpop.f32.mrf.mxu3 }
 0x387   :  { %v1003_v38 = vadd.f32 %v3818_v10, %v1002_v57  ;;  %v1699_v57 = vld [vmem:[%s4092_s15 + $0x8] sm:$0xff] }
 0x388   :  { %v1408_v63 = vpop.f32.mrf.mxu2 }
 0x389   :  { %v1409_v29 = vadd.f32 %v3652_v59, %v1408_v63  ;;  %v1070_v27 = vmax.f32 %v1003_v38, 0.0 }
 0x38b   :  { %v1524_v30 = vmax.f32 %v1409_v29, 0.0 }
 0x38d   :  { %v1635_v32 = vsel %vm1084_vm7, %v1524_v30, -inf  ;;  %2656 = vmatmul.msk.f32.gmra.mxu2 %vm1084_vm7, %v1063_v28  ;;  %v1702_v28 = vld [vmem:[%s4092_s15 + $0x20] sm:$0xff] }
 0x38e   :  { %v1636_v34 = vmax.f32 %v1634_v62, %v1635_v32  ;;  %1754 = vmatpush.msrb.mxu0 %v1702_v28  ;;  %v1005_v30 = vpop.f32.mrf.mxu3 }
 0x38f   :  { %v1006_v31 = vadd.f32 %v3818_v10, %v1005_v30 }
 0x390   :  { %v1411_v36 = vpop.f32.mrf.mxu2 }
 0x391   :  { %v1412_v39 = vadd.f32 %v3652_v59, %v1411_v36  ;;  %v1071_v36 = vmax.f32 %v1006_v31, 0.0 }
 0x393   :  { %v1525_v41 = vmax.f32 %v1412_v39, 0.0 }
 0x395   :  { %v1637_v56 = vsel %vm1084_vm7, %v1525_v41, -inf  ;;  %2657 = vmatmul.msk.f32.gmra.mxu2 %vm1084_vm7, %v1064_v18 }
 0x396   :  { %v1638_v42 = vmax.f32 %v1636_v34, %v1637_v56 }
 0x398   :  { %v1414_v43 = vpop.f32.mrf.mxu2 }
 0x399   :  { %v1415_v45 = vadd.f32 %v3652_v59, %v1414_v43 }
 0x39b   :  { %v1526_v46 = vmax.f32 %v1415_v45, 0.0 }
 0x39d   :  { %v1639_v50 = vsel %vm1084_vm7, %v1526_v46, -inf  ;;  %2658 = vmatmul.msk.f32.gmra.mxu2 %vm1084_vm7, %v1065_v44 }
 0x39e   :  { %v1640_v51 = vmax.f32 %v1638_v42, %v1639_v50 }
 0x3a0   :  { %v1417_v55 = vpop.f32.mrf.mxu2 }
 0x3a1   :  { %v1418_v61 = vadd.f32 %v3652_v59, %v1417_v55 }
 0x3a3   :  { %v1527_v1 = vmax.f32 %v1418_v61, 0.0 }
 0x3a5   :  { %v1641_v2 = vsel %vm1084_vm7, %v1527_v1, -inf  ;;  %2659 = vmatmul.msk.f32.gmra.mxu2 %vm1084_vm7, %v1066_v60 }
 0x3a6   :  { %v1642_v5 = vmax.f32 %v1640_v51, %v1641_v2  ;;  %v1701_v51 = vld [vmem:[%s4092_s15 + $0x18] sm:$0xff] }
 0x3a7   :  { %1755 = vmatpush.msrb.mxu0 %v1701_v51 }
 0x3a8   :  { %v1420_v7 = vpop.f32.mrf.mxu2 }
 0x3a9   :  { %v1421_v11 = vadd.f32 %v3652_v59, %v1420_v7 }
 0x3ab   :  { %v1528_v13 = vmax.f32 %v1421_v11, 0.0 }
 0x3ad   :  { %v1643_v15 = vsel %vm1084_vm7, %v1528_v13, -inf  ;;  %2660 = vmatmul.msk.f32.gmra.mxu2 %vm1084_vm7, %v1067_v8 }
 0x3ae   :  { %v1644_v47 = vmax.f32 %v1642_v5, %v1643_v15 }
 0x3b0   :  { %v1423_v20 = vpop.f32.mrf.mxu2 }
 0x3b1   :  { %v1424_v21 = vadd.f32 %v3652_v59, %v1423_v20 }
 0x3b3   :  { %v1529_v0 = vmax.f32 %v1424_v21, 0.0  ;;  %v1700_v21 = vld [vmem:[%s4092_s15 + $0x10] sm:$0xff] }
 0x3b4   :  { %1756 = vmatpush.msrb.mxu0 %v1700_v21  ;;  %v2809_v21 = vld [vmem:[%s4087_s10] ss:$0 sm:$0xff] }
 0x3b5   :  { %v1645_v53 = vsel %vm1084_vm7, %v1529_v0, -inf  ;;  %2661 = vmatmul.msk.f32.gmra.mxu2 %vm1084_vm7, %v1068_v3 }
 0x3b6   :  { %v1646_v54 = vmax.f32 %v1644_v47, %v1645_v53  ;;  %1757 = vmatpush.msrb.mxu0 %v1699_v57 }
 0x3b8   :  { %v1426_v23 = vpop.f32.mrf.mxu2 }
 0x3b9   :  { %v1427_v24 = vadd.f32 %v3652_v59, %v1426_v23 }
 0x3bb   :  { %v1530_v58 = vmax.f32 %v1427_v24, 0.0 }
 0x3bd   :  { %v1647_v25 = vsel %vm1084_vm7, %v1530_v58, -inf  ;;  %2662 = vmatmul.msk.f32.gmra.mxu2 %vm1084_vm7, %v1069_v12 }
 0x3be   :  { %v1648_v26 = vmax.f32 %v1646_v54, %v1647_v25 }
 0x3c0   :  { %v1429_v62 = vpop.f32.mrf.mxu2 }
 0x3c1   :  { %v1430_v63 = vadd.f32 %v3652_v59, %v1429_v62  ;;  %v1698_v62 = vld [vmem:[%s4092_s15] sm:$0xff] }
 0x3c2   :  { %1758 = vmatpush.msrb.mxu0 %v1698_v62  ;;  %v1825_v62 = vld [vmem:[%s4093_s8 + $0x28] sm:$0xff] }
 0x3c3   :  { %v1531_v29 = vmax.f32 %v1430_v63, 0.0 }
 0x3c5   :  { %v1649_v32 = vsel %vm1084_vm7, %v1531_v29, -inf  ;;  %2663 = vmatmul.msk.f32.gmra.mxu2 %vm1084_vm7, %v1070_v27 }
 0x3c6   :  { %v1650_v34 = vmax.f32 %v1648_v26, %v1649_v32 }
 0x3c8   :  { %v1432_v35 = vpop.f32.mrf.mxu2 }
 0x3c9   :  { %v1433_v18 = vadd.f32 %v3652_v59, %v1432_v35 }
 0x3cb   :  { %v1532_v39 = vmax.f32 %v1433_v18, 0.0 }
 0x3cd   :  { %v1651_v40 = vsel %vm1084_vm7, %v1532_v39, -inf  ;;  %2664 = vmatmul.msk.f32.gmra.mxu2 %vm1084_vm7, %v1071_v36 }
 0x3ce   :  { %v1652_v41 = vmax.f32 %v1650_v34, %v1651_v40 }
 0x3d0   :  { %v1435_v33 = vpop.f32.mrf.mxu2 }
 0x3d1   :  { %v1436_v56 = vadd.f32 %v3652_v59, %v1435_v33 }
 0x3d3   :  { %v1533_v10 = vmax.f32 %v1436_v56, 0.0 }
 0x3d5   :  { %v1653_v42 = vsel %vm1084_vm7, %v1533_v10, -inf }
 0x3d6   :  { %v1654_v43 = vmax.f32 %v1652_v41, %v1653_v42 }
 0x3d8   :  { %v1655_v44 = vrot.slane %v1654_v43, 4  ;;  %v1438_v45 = vpop.f32.mrf.mxu2 }
 0x3d9   :  { %v1439_v17 = vadd.f32 %v3652_v59, %v1438_v45 }
 0x3da   :  { %v1656_v46 = vmax.f32 %v1654_v43, %v1655_v44 }
 0x3db   :  { %v1534_v61 = vmax.f32 %v1439_v17, 0.0  ;;  %v1827_v17 = vld [vmem:[%s4093_s8 + $0x38] sm:$0xff] }
 0x3dc   :  { %v1657_v48 = vrot.slane %v1656_v46, 2  ;;  %1843 = vmatpush.msra.mxu0 %v1827_v17 }
 0x3dd   :  { %v1661_v5 = vsel %vm1084_vm7, %v1534_v61, -inf }
 0x3de   :  { %v1658_v50 = vmax.f32 %v1656_v46, %v1657_v48 }
 0x3e0   :  { %v1659_v55 = vrot.slane %v1658_v50, 1  ;;  %v1441_v60 = vpop.f32.mrf.mxu2 }
 0x3e1   :  { %v1442_v1 = vadd.f32 %v3652_v59, %v1441_v60 }
 0x3e2   :  { %v1660_v9 = vmax.f32 %v1658_v50, %v1659_v55  ;;  %v1826_v50 = vld [vmem:[%s4093_s8 + $0x30] sm:$0xff] }
 0x3e3   :  { %v1535_v2 = vmax.f32 %v1442_v1, 0.0  ;;  %1844 = vmatpush.msra.mxu0 %v1826_v50 }
 0x3e4   :  { %v3871_v4 = vsel %vm1737_vm9, %v1660_v9, %v3801_v49 }
 0x3e5   :  { %v1662_v6 = vsel %vm1084_vm7, %v1535_v2, -inf  ;;  %1845 = vmatpush.msra.mxu0 %v1825_v62 }
 0x3e6   :  { %v1663_v7 = vmax.f32 %v1661_v5, %v1662_v6 }
 0x3e8   :  { %v1444_v8 = vpop.f32.mrf.mxu2 }
 0x3e9   :  { %v1445_v11 = vadd.f32 %v3652_v59, %v1444_v8 }
 0x3eb   :  { %v1536_v13 = vmax.f32 %v1445_v11, 0.0 }
 0x3ed   :  { %v1664_v14 = vsel %vm1084_vm7, %v1536_v13, -inf }
 0x3ee   :  { %v1665_v15 = vmax.f32 %v1663_v7, %v1664_v14 }
 0x3f0   :  { %v1447_v47 = vpop.f32.mrf.mxu2 }
 0x3f1   :  { %v1448_v19 = vadd.f32 %v3652_v59, %v1447_v47 }
 0x3f3   :  { %v1537_v20 = vmax.f32 %v1448_v19, 0.0 }
 0x3f5   :  { %v1666_v49 = vsel %vm1084_vm7, %v1537_v20, -inf }
 0x3f6   :  { %v1667_v3 = vmax.f32 %v1665_v15, %v1666_v49 }
 0x3f8   :  { %v1450_v0 = vpop.f32.mrf.mxu2 }
 0x3f9   :  { %v1451_v52 = vadd.f32 %v3652_v59, %v1450_v0 }
 0x3fb   :  { %v1538_v53 = vmax.f32 %v1451_v52, 0.0 }
 0x3fd   :  { %v1668_v54 = vsel %vm1084_vm7, %v1538_v53, -inf }
 0x3fe   :  { %v1669_v23 = vmax.f32 %v1667_v3, %v1668_v54 }
 0x400   :  { %v1453_v12 = vpop.f32.mrf.mxu2 }
 0x401   :  { %v1454_v63 = vadd.f32 %v3652_v59, %v1453_v12 }
 0x403   :  { %v1539_v30 = vmax.f32 %v1454_v63, 0.0  ;;  %v1823_v63 = vld [vmem:[%s4093_s8 + $0x18] sm:$0xff] }
 0x405   :  { %v1670_v35 = vsel %vm1084_vm7, %v1539_v30, -inf  ;;  %v1820_v30 = vld [vmem:[%s4093_s8] sm:$0xff] }
 0x406   :  { %v1671_v56 = vmax.f32 %v1669_v23, %v1670_v35 }
 0x408   :  { %v1456_v24 = vpop.f32.mrf.mxu2 }
 0x409   :  { %v1457_v29 = vadd.f32 %v3652_v59, %v1456_v24 }
 0x40b   :  { %v1540_v32 = vmax.f32 %v1457_v29, 0.0  ;;  %v1821_v29 = vld [vmem:[%s4093_s8 + $0x8] sm:$0xff] }
 0x40d   :  { %v1672_v40 = vsel %vm1084_vm7, %v1540_v32, -inf  ;;  %v1858_v32 = vld [vmem:[%s4094_s16 + $0x10] sm:$0xff] }
 0x40e   :  { %v1673_v44 = vmax.f32 %v1671_v56, %v1672_v40 }
 0x410   :  { %v1459_v58 = vpop.f32.mrf.mxu2 }
 0x411   :  { %v1460_v31 = vadd.f32 %v3652_v59, %v1459_v58 }
 0x413   :  { %v1541_v36 = vmax.f32 %v1460_v31, 0.0  ;;  %v1859_v31 = vld [vmem:[%s4094_s16 + $0x18] sm:$0xff] }
 0x414   :  { %1879 = vmatpush.msra.mxu3 %v1859_v31 }
 0x415   :  { %v1674_v10 = vsel %vm1084_vm7, %v1541_v36, -inf }
 0x416   :  { %v1675_v51 = vmax.f32 %v1673_v44, %v1674_v10  ;;  %1880 = vmatpush.msra.mxu3 %v1858_v32  ;;  %v1857_v10 = vld [vmem:[%s4094_s16 + $0x8] sm:$0xff]  ;;  %v1891_v44 = vld [vmem:[%s4096_s5 + $0x10] sm:$0xff] }
 0x418   :  { %v1462_v38 = vpop.f32.mrf.mxu2  ;;  %1881 = vmatpush.msra.mxu3 %v1857_v10 }
 0x419   :  { %v1463_v34 = vadd.f32 %v3652_v59, %v1462_v38 }
 0x41b   :  { %v1542_v41 = vmax.f32 %v1463_v34, 0.0 }
 0x41d   :  { %v1676_v45 = vsel %vm1084_vm7, %v1542_v41, -inf }
 0x41e   :  { %v1677_v1 = vmax.f32 %v1675_v51, %v1676_v45  ;;  %v1890_v45 = vld [vmem:[%s4096_s5 + $0x8] sm:$0xff] }
 0x420   :  { %v1465_v25 = vpop.f32.mrf.mxu2 }
 0x421   :  { %v1466_v18 = vadd.f32 %v3652_v59, %v1465_v25 }
 0x423   :  { %v1543_v42 = vmax.f32 %v1466_v18, 0.0 }
 0x425   :  { %v1678_v55 = vsel %vm1084_vm7, %v1543_v42, -inf  ;;  %v1856_v42 = vld [vmem:[%s4094_s16] sm:$0xff] }
 0x426   :  { %v1679_v7 = vmax.f32 %v1677_v1, %v1678_v55  ;;  %1882 = vmatpush.msra.mxu3 %v1856_v42  ;;  %v1894_v55 = vld [vmem:[%s4097_s23] sm:$0x1] }
 0x428   :  { %v1468_v26 = vpop.f32.mrf.mxu2 }
 0x429   :  { %v1469_v33 = vadd.f32 %v3652_v59, %v1468_v26 }
 0x42b   :  { %v1544_v46 = vmax.f32 %v1469_v33, 0.0 }
 0x42d   :  { %v1680_v2 = vsel %vm1084_vm7, %v1544_v46, -inf  ;;  %v1889_v46 = vld [vmem:[%s4096_s5] sm:$0xff] }
 0x42e   :  { %v1681_v13 = vmax.f32 %v1679_v7, %v1680_v2 }
 0x430   :  { %v1471_v27 = vpop.f32.mrf.mxu2 }
 0x431   :  { %v1472_v43 = vadd.f32 %v3652_v59, %v1471_v27  ;;  %v1824_v27 = vld [vmem:[%s4093_s8 + $0x20] sm:$0xff] }
 0x432   :  { %1846 = vmatpush.msra.mxu0 %v1824_v27 }
 0x433   :  { %v1545_v60 = vmax.f32 %v1472_v43, 0.0  ;;  %v1892_v43 = vld [vmem:[%s4096_s5 + $0x18] sm:$0xff] }
 0x434   :  { %1847 = vmatpush.msra.mxu0 %v1823_v63  ;;  %1911 = vmatpush.msrb.mxu3 %v1892_v43 }
 0x435   :  { %v1682_v8 = vsel %vm1084_vm7, %v1545_v60, -inf  ;;  %v2771_v60 = vld [vmem:[#allocation8] ss:$0 sm:$0xff] }
 0x436   :  { %v1683_v47 = vmax.f32 %v1681_v13, %v1682_v8  ;;  %1912 = vmatpush.msrb.mxu3 %v1891_v44 }
 0x438   :  { %v1474_v28 = vpop.f32.mrf.mxu2  ;;  %1913 = vmatpush.msrb.mxu3 %v1890_v45 }
 0x439   :  { %v1475_v48 = vadd.f32 %v3652_v59, %v1474_v28  ;;  %v1822_v28 = vld [vmem:[%s4093_s8 + $0x10] sm:$0xff] }
 0x43a   :  { %1848 = vmatpush.msra.mxu0 %v1822_v28  ;;  %1914 = vmatpush.msrb.mxu3 %v1889_v46 }
 0x43b   :  { %v1546_v5 = vmax.f32 %v1475_v48, 0.0  ;;  %v2770_v48 = vld [vmem:[#allocation5] ss:$0 sm:$0xff] }
 0x43c   :  { %1849 = vmatpush.msra.mxu0 %v1821_v29 }
 0x43d   :  { %v1684_v14 = vsel %vm1084_vm7, %v1546_v5, -inf }
 0x43e   :  { %v1685_v20 = vmax.f32 %v1683_v47, %v1684_v14  ;;  %1850 = vmatpush.msra.mxu0 %v1820_v30 }
 0x440   :  { %v1477_v39 = vpop.f32.mrf.mxu2 }
 0x441   :  { %v1478_v61 = vadd.f32 %v3652_v59, %v1477_v39  ;;  %v2769_v39 = vld [vmem:[%s4095_s18] ss:$0 sm:$0xff] }
 0x443   :  { %v1547_v11 = vmax.f32 %v1478_v61, 0.0 }
 0x445   :  { %v1686_v19 = vsel %vm1084_vm7, %v1547_v11, -inf }
 0x446   :  { %v1687_v52 = vmax.f32 %v1685_v20, %v1686_v19 }
 0x448   :  { %v1480_v9 = vpop.f32.mrf.mxu2 }
 0x449   :  { %v1481_v6 = vadd.f32 %v3652_v59, %v1480_v9  ;;  %v3929_v9 = vld [vmem:[#allocation10] sm:$0x1] }
 0x44b   :  { %v1548_v15 = vmax.f32 %v1481_v6, 0.0 }
 0x44d   :  { %v1688_v3 = vsel %vm1084_vm7, %v1548_v15, -inf }
 0x44e   :  { %v1689_v53 = vmax.f32 %v1687_v52, %v1688_v3 }
 0x450   :  { %v1483_v49 = vpop.f32.mrf.mxu2 }
 0x451   :  { %v1484_v0 = vadd.f32 %v2809_v21, %v1483_v49 }
 0x453   :  { %v1549_v59 = vmax.f32 %v1484_v0, 0.0 }
 0x455   :  { %v1690_v54 = vsel %vm1084_vm7, %v1549_v59, -inf }
 0x456   :  { %v1691_v23 = vmax.f32 %v1689_v53, %v1690_v54 }
 0x458   :  { %v1692_v12 = vrot.slane %v1691_v23, 4 }
 0x45a   :  { %v1693_v24 = vmax.f32 %v1691_v23, %v1692_v12 }
 0x45c   :  { %v1694_v57 = vrot.slane %v1693_v24, 2 }
 0x45e   :  { %v1695_v58 = vmax.f32 %v1693_v24, %v1694_v57  ;;  %v1956_v24 = vperm.slane %v1894_v55, 0 }
 0x460   :  { %v1696_v38 = vrot.slane %v1695_v58, 1 }
 0x462   :  { %v1697_v25 = vmax.f32 %v1695_v58, %v1696_v38 }
 0x464   :  { %v1740_v26 = vsel %vm1739_vm10, %v1697_v25, %v3871_v4  ;;  %v1728_v4 = vpop.f32.mrf.mxu3 }
 0x465   :  { %2666 = vmatmul.msk.f32.vlgmr.msrb.gmra.mxu0 %vm1084_vm7, %v1740_v26 }
 0x466   :  { %1983 = vmatpush.msrb.mxu0 %v1892_v43 }
 0x468   :  { %1984 = vmatpush.msrb.mxu0 %v1891_v44 }
 0x46a   :  { %1985 = vmatpush.msrb.mxu0 %v1890_v45 }
 0x46c   :  { %v1785_v34 = vpop.f32.mrf.mxu3  ;;  %1986 = vmatpush.msrb.mxu0 %v1889_v46 }
 0x474   :  { %v1810_v40 = vpop.f32.mrf.mxu3 }
 0x4e2   :  { %v1760_v35 = vpop.f32.mrf.mxu0 }
 0x4e3   :  { %v1761_v36 = vadd.f32 %v1760_v35, %v1728_v4 }
 0x4e5   :  { %v1788_v18 = vadd.f32 %v1785_v34, %v1761_v36 }
 0x4e7   :  { %v1813_v41 = vadd.f32 %v1810_v40, %v1788_v18 }
 0x4e9   :  { %v1818_v33 = vadd.f32 %v2769_v39, %v1813_v41 }
 0x4eb   :  { %v1819_v56 = vmax.f32 %v1818_v33, 0.0 }
 0x4ed   :  { %2669 = vmatmul.msk.f32.vlgmr.msra.gmra.mxu0 %vm1084_vm7, %v1819_v56 }
 0x4ee   :  { %2117 = vmatpush.msra.mxu0 %v1892_v43 }
 0x4f0   :  { %2118 = vmatpush.msra.mxu0 %v1891_v44 }
 0x4f2   :  { %2119 = vmatpush.msra.mxu0 %v1890_v45 }
 0x4f4   :  { %2120 = vmatpush.msra.mxu0 %v1889_v46 }
 0x56a   :  { %v1852_v17 = vpop.f32.mrf.mxu0 }
 0x56b   :  { %v1853_v50 = vadd.f32 %v2770_v48, %v1852_v17 }
 0x56d   :  { %v1855_v51 = vmax.f32 %v1853_v50, 0.0 }
 0x56f   :  { %2670 = vmatmul.msk.f32.vlgmr.msra.gmra.mxu3 %vm322_vm1, %v1855_v51 }
 0x570   :  { %2050 = vmatpush.msra.mxu3 %v1892_v43 }
 0x572   :  { %2051 = vmatpush.msra.mxu3 %v1891_v44 }
 0x574   :  { %2052 = vmatpush.msra.mxu3 %v1890_v45 }
 0x576   :  { %2053 = vmatpush.msra.mxu3 %v1889_v46 }
 0x577   :  { %2671 = vmatmul.msk.f32.vlgmr.msrb.gmra.mxu3 %vm322_vm1, %v1894_v55 }
 0x5f2   :  { %v1884_v61 = vpop.f32.mrf.mxu3 }
 0x5f3   :  { %v1885_v1 = vadd.f32 %v2771_v60, %v1884_v61 }
 0x5f5   :  { %1888 = vst.msk [vmem:[#allocation2] sm:$0xf] %vm1887_vm11, %v1885_v1 }
 0x5fa   :  { %v1916_v2 = vpop.f32.mrf.mxu3 }
 0x5fb   :  { %v1917_v5 = vadd.f32 %v1916_v2, %v3929_v9 }
 0x5fc   :  { %v1895_v6 = vld [vmem:[#allocation2] sm:$0x1]  ;;  %v1968_v29 = vld [vmem:[#allocation2 + $0x1] sm:$0x1]  ;;  %v2035_v2 = vld [vmem:[#allocation2 + $0x2] sm:$0x1] }
 0x5fd   :  { %1940 = vrot.lane.b32.xlu0 %v1917_v5, %s3095_s13  ;;  %v1919_v7 = vadd.f32 %v1917_v5, %v1895_v6 }
 0x5ff   :  { %v2672_v8 = vmul.f32 -1.442695, %v1919_v7 }
 0x601   :  { %2778 = vpow2.f32 %v2672_v8 }
 0x607   :  { %v2779_v11 = vpop.eup %2778 }
 0x608   :  { %v1923_v13 = vadd.f32 1.0, %v2779_v11 }
 0x60a   :  { %2780 = vrcp.f32 %v1923_v13  ;;  %v1935_v49 = vand.u32 2147483648, %v1923_v13  ;;  %vm1929_vm13 = vweird.f32 %v1923_v13  ;;  %v1933_v3 = vand.u32 2147483647, %v1923_v13 }
 0x60c   :  { %v1936_v0 = vor.u32 1.1754944e-38, %v1935_v49  ;;  %vm1934_vm15 = vcmp.eq.f32.partialorder %v1933_v3, 8.507059e+37 }
 0x610   :  { %v2781_v14 = vpop.eup %2780 }
 0x611   :  { %v1925_v15 = vmul.f32 %v2781_v14, %v1923_v13  ;;  %vm1930_vm12 = vweird.f32 %v2781_v14 }
 0x612   :  { %vm1931_vm14 = vmor %vm1929_vm13, %vm1930_vm12 }
 0x613   :  { %v1926_v47 = vsub.f32 1.0, %v1925_v15 }
 0x615   :  { %v1927_v19 = vmul.f32 %v2781_v14, %v1926_v47 }
 0x617   :  { %v1928_v20 = vadd.f32 %v2781_v14, %v1927_v19 }
 0x619   :  { %v1932_v21 = vsel %vm1931_vm14, %v2781_v14, %v1928_v20 }
 0x61a   :  { %v1937_v59 = vsel %vm1934_vm15, %v1936_v0, %v1932_v21 }
 0x61b   :  { %v1950_v58 = vsub.f32 1.0, %v1937_v59 }
 0x66f   :  { %v1941_v52 = vpop.permute.xlu0 %1940 }
 0x670   :  { %v1943_v53 = vmul.f32 %v1941_v52, %v1937_v59 }
 0x672   :  { %1945 = vrot.lane.b32.xlu0 %v1943_v53, %s3095_s13 }
 0x6e4   :  { %v1946_v54 = vpop.permute.xlu0 %1945 }
 0x6e5   :  { %v1948_v23 = vadd.f32 %v1946_v54, %v1895_v6 }
 0x6e7   :  { %2782 = vtanh.f32 %v1948_v23 }
 0x6ed   :  { %v2783_v12 = vpop.eup %2782 }
 0x6ee   :  { %1952 = vrot.lane.b32.xlu1 %v2783_v12, %s3096_s22 }
 0x6f6   :  { %1957 = vrot.lane.b32.xlu1 %v1956_v24, %s3097_s26 }
 0x760   :  { %v1953_v57 = vpop.permute.xlu1 %1952 }
 0x761   :  { %v1955_v25 = vmul.f32 %v1953_v57, %v1950_v58 }
 0x768   :  { %v1958_v38 = vpop.permute.xlu1 %1957 }
 0x769   :  { %v1960_v26 = vmul.f32 %v1958_v38, %v1937_v59 }
 0x76b   :  { %v1961_v62 = vadd.f32 %v1960_v26, %v1955_v25 }
 0x76d   :  { %1963 = vrot.lane.b32.xlu2 %v1961_v62, %s3096_s22 }
 0x7c7   :  { %v1964_v27 = vpop.permute.xlu2 %1963 }
 0x7c8   :  { %1967 = vst.msk [vmem:[#allocation3] sm:$0x1] %vm1966_vm2, %v1964_v27  ;;  %2673 = vmatmul.msk.f32.vlgmr.msrb.gmra.mxu0 %vm322_vm1, %v1964_v27 }
 0x845   :  { %v1988_v63 = vpop.f32.mrf.mxu0 }
 0x846   :  { %v1989_v28 = vadd.f32 %v1988_v63, %v3929_v9 }
 0x848   :  { %2012 = vrot.lane.b32.xlu2 %v1989_v28, %s3095_s13  ;;  %v1991_v30 = vadd.f32 %v1989_v28, %v1968_v29 }
 0x84a   :  { %v2674_v31 = vmul.f32 -1.442695, %v1991_v30 }
 0x84c   :  { %2784 = vpow2.f32 %v2674_v31 }
 0x852   :  { %v2785_v32 = vpop.eup %2784 }
 0x853   :  { %v1995_v4 = vadd.f32 1.0, %v2785_v32 }
 0x855   :  { %2786 = vrcp.f32 %v1995_v4  ;;  %v2007_v40 = vand.u32 2147483648, %v1995_v4  ;;  %vm2001_vm5 = vweird.f32 %v1995_v4  ;;  %v2005_v41 = vand.u32 2147483647, %v1995_v4 }
 0x857   :  { %v2008_v56 = vor.u32 1.1754944e-38, %v2007_v40  ;;  %vm2006_vm8 = vcmp.eq.f32.partialorder %v2005_v41, 8.507059e+37 }
 0x85b   :  { %v2787_v34 = vpop.eup %2786 }
 0x85c   :  { %v1997_v35 = vmul.f32 %v2787_v34, %v1995_v4  ;;  %vm2002_vm3 = vweird.f32 %v2787_v34 }
 0x85d   :  { %vm2003_vm6 = vmor %vm2001_vm5, %vm2002_vm3  ;;  %vm2276_vm5 = vcmask 60416  }
 0x85e   :  { %v1998_v36 = vsub.f32 1.0, %v1997_v35 }
 0x860   :  { %v1999_v18 = vmul.f32 %v2787_v34, %v1998_v36 }
 0x862   :  { %v2000_v39 = vadd.f32 %v2787_v34, %v1999_v18 }
 0x864   :  { %v2004_v33 = vsel %vm2003_vm6, %v2787_v34, %v2000_v39 }
 0x865   :  { %v2009_v42 = vsel %vm2006_vm8, %v2008_v56, %v2004_v33 }
 0x866   :  { %v2022_v48 = vsub.f32 1.0, %v2009_v42  ;;  %v2028_v50 = vmul.f32 %v2009_v42, %v1961_v62  ;;  %v2102_v62 = vld [vmem:[#allocation2 + $0x3] sm:$0x1] }
 0x8a2   :  { %v2013_v10 = vpop.permute.xlu2 %2012 }
 0x8a3   :  { %v2015_v43 = vmul.f32 %v2013_v10, %v2009_v42 }
 0x8a5   :  { %2017 = vrot.lane.b32.xlu0 %v2015_v43, %s3095_s13 }
 0x917   :  { %v2018_v44 = vpop.permute.xlu0 %2017 }
 0x918   :  { %v2020_v45 = vadd.f32 %v2018_v44, %v1968_v29 }
 0x91a   :  { %2788 = vtanh.f32 %v2020_v45 }
 0x920   :  { %v2789_v46 = vpop.eup %2788 }
 0x921   :  { %2024 = vrot.lane.b32.xlu1 %v2789_v46, %s3096_s22 }
 0x993   :  { %v2025_v17 = vpop.permute.xlu1 %2024 }
 0x994   :  { %v2027_v51 = vmul.f32 %v2025_v17, %v2022_v48  ;;  %v2173_v48 = vld [vmem:[%s4098_s19 + $0x18] sm:$0xff]  ;;  %v2172_v17 = vld [vmem:[%s4098_s19 + $0x10] sm:$0xff] }
 0x995   :  { %2193 = vmatpush.msrb.mxu3 %v2173_v48 }
 0x996   :  { %v2029_v55 = vadd.f32 %v2028_v50, %v2027_v51  ;;  %v2171_v50 = vld [vmem:[%s4098_s19 + $0x8] sm:$0xff]  ;;  %v2170_v51 = vld [vmem:[%s4098_s19] sm:$0xff] }
 0x997   :  { %2194 = vmatpush.msrb.mxu3 %v2172_v17 }
 0x998   :  { %2031 = vrot.lane.b32.xlu2 %v2029_v55, %s3096_s22 }
 0x999   :  { %2195 = vmatpush.msrb.mxu3 %v2171_v50 }
 0x99b   :  { %2196 = vmatpush.msrb.mxu3 %v2170_v51 }
 0x9f2   :  { %v2032_v60 = vpop.permute.xlu2 %2031 }
 0x9f3   :  { %2034 = vst.msk [vmem:[#allocation3 + $0x1] sm:$0x1] %vm1966_vm2, %v2032_v60  ;;  %2675 = vmatmul.msk.f32.vlgmr.msra.gmra.mxu3 %vm322_vm1, %v2032_v60  ;;  %v2208_v60 = vld [vmem:[%s4099_s6 + $0x30] sm:$0xff] }
 0xa76   :  { %v2055_v61 = vpop.f32.mrf.mxu3 }
 0xa77   :  { %v2056_v1 = vadd.f32 %v2055_v61, %v3929_v9  ;;  %v2207_v61 = vld [vmem:[%s4099_s6 + $0x28] sm:$0xff] }
 0xa79   :  { %2079 = vrot.lane.b32.xlu0 %v2056_v1, %s3095_s13  ;;  %v2058_v5 = vadd.f32 %v2056_v1, %v2035_v2  ;;  %v2206_v1 = vld [vmem:[%s4099_s6 + $0x20] sm:$0xff] }
 0xa7b   :  { %v2676_v6 = vmul.f32 -1.442695, %v2058_v5 }
 0xa7d   :  { %2790 = vpow2.f32 %v2676_v6 }
 0xa83   :  { %v2791_v7 = vpop.eup %2790 }
 0xa84   :  { %v2062_v8 = vadd.f32 1.0, %v2791_v7  ;;  %v2204_v7 = vld [vmem:[%s4099_s6 + $0x10] sm:$0xff] }
 0xa86   :  { %2792 = vrcp.f32 %v2062_v8  ;;  %v2074_v19 = vand.u32 2147483648, %v2062_v8  ;;  %vm2068_vm10 = vweird.f32 %v2062_v8  ;;  %v2072_v20 = vand.u32 2147483647, %v2062_v8 }
 0xa88   :  { %v2075_v3 = vor.u32 1.1754944e-38, %v2074_v19  ;;  %vm2073_vm12 = vcmp.eq.f32.partialorder %v2072_v20, 8.507059e+37  ;;  %v2772_v19 = vld [vmem:[#allocation11] ss:$0 sm:$0xff] }
 0xa8c   :  { %v2793_v11 = vpop.eup %2792 }
 0xa8d   :  { %v2064_v13 = vmul.f32 %v2793_v11, %v2062_v8  ;;  %vm2069_vm9 = vweird.f32 %v2793_v11  ;;  %v2203_v8 = vld [vmem:[%s4099_s6 + $0x8] sm:$0xff] }
 0xa8e   :  { %vm2070_vm11 = vmor %vm2068_vm10, %vm2069_vm9 }
 0xa8f   :  { %v2065_v14 = vsub.f32 1.0, %v2064_v13  ;;  %v2294_v13 = vld [vmem:[%s4100_s9 + $0x8] sm:$0xff] }
 0xa91   :  { %v2066_v15 = vmul.f32 %v2793_v11, %v2065_v14  ;;  %v2293_v14 = vld [vmem:[%s4100_s9] sm:$0xff] }
 0xa93   :  { %v2067_v47 = vadd.f32 %v2793_v11, %v2066_v15  ;;  %v2241_v15 = vld [vmem:[%s4101_s12 + $0x18] sm:$0xff] }
 0xa94   :  { %2261 = vmatpush.msra.mxu3 %v2241_v15 }
 0xa95   :  { %v2071_v49 = vsel %vm2070_vm11, %v2793_v11, %v2067_v47  ;;  %v2202_v11 = vld [vmem:[%s4099_s6] sm:$0xff]  ;;  %v2240_v47 = vld [vmem:[%s4101_s12 + $0x10] sm:$0xff] }
 0xa96   :  { %v2076_v0 = vsel %vm2073_vm12, %v2075_v3, %v2071_v49  ;;  %2262 = vmatpush.msra.mxu3 %v2240_v47 }
 0xa97   :  { %v2089_v23 = vsub.f32 1.0, %v2076_v0  ;;  %v2095_v24 = vmul.f32 %v2076_v0, %v2029_v55  ;;  %v2209_v55 = vld [vmem:[%s4099_s6 + $0x38] sm:$0xff] }
 0xa98   :  { %2225 = vmatpush.msrb.mxu0 %v2209_v55 }
 0xa9a   :  { %2226 = vmatpush.msrb.mxu0 %v2208_v60 }
 0xa9c   :  { %2227 = vmatpush.msrb.mxu0 %v2207_v61 }
 0xa9e   :  { %2228 = vmatpush.msrb.mxu0 %v2206_v1 }
 0xaeb   :  { %v2080_v21 = vpop.permute.xlu0 %2079 }
 0xaec   :  { %v2082_v52 = vmul.f32 %v2080_v21, %v2076_v0  ;;  %v2239_v21 = vld [vmem:[%s4101_s12 + $0x8] sm:$0xff]  ;;  %v2238_v0 = vld [vmem:[%s4101_s12] sm:$0xff] }
 0xaed   :  { %2263 = vmatpush.msra.mxu3 %v2239_v21 }
 0xaee   :  { %2084 = vrot.lane.b32.xlu1 %v2082_v52, %s3095_s13  ;;  %v2296_v52 = vld [vmem:[%s4102_s17 + $0x8] sm:$0xff] }
 0xaef   :  { %2264 = vmatpush.msra.mxu3 %v2238_v0 }
 0xb60   :  { %v2085_v59 = vpop.permute.xlu1 %2084 }
 0xb61   :  { %v2087_v53 = vadd.f32 %v2085_v59, %v2035_v2  ;;  %v2205_v2 = vld [vmem:[%s4099_s6 + $0x18] sm:$0xff]  ;;  %v2295_v59 = vld [vmem:[%s4102_s17] sm:$0xff] }
 0xb62   :  { %2229 = vmatpush.msrb.mxu0 %v2205_v2 }
 0xb63   :  { %2794 = vtanh.f32 %v2087_v53  ;;  %v2773_v53 = vld [vmem:[#allocation13] ss:$0 sm:$0xff] }
 0xb64   :  { %2230 = vmatpush.msrb.mxu0 %v2204_v7 }
 0xb66   :  { %2231 = vmatpush.msrb.mxu0 %v2203_v8 }
 0xb68   :  { %2232 = vmatpush.msrb.mxu0 %v2202_v11 }
 0xb69   :  { %v2795_v54 = vpop.eup %2794 }
 0xb6a   :  { %2091 = vrot.lane.b32.xlu2 %v2795_v54, %s3096_s22 }
 0xbc4   :  { %v2092_v12 = vpop.permute.xlu2 %2091 }
 0xbc5   :  { %v2094_v57 = vmul.f32 %v2092_v12, %v2089_v23 }
 0xbc7   :  { %v2096_v58 = vadd.f32 %v2095_v24, %v2094_v57  ;;  %v2337_v24 = vld [vmem:[%s4103_s14] sm:$0xff]  ;;  %v2367_v57 = vld [vmem:[%s4104_s24 + $0x10] sm:$0xff] }
 0xbc9   :  { %2098 = vrot.lane.b32.xlu0 %v2096_v58, %s3096_s22 }
 0xc3b   :  { %v2099_v38 = vpop.permute.xlu0 %2098 }
 0xc3c   :  { %2101 = vst.msk [vmem:[#allocation3 + $0x2] sm:$0x1] %vm1966_vm2, %v2099_v38  ;;  %2677 = vmatmul.msk.f32.vlgmr.msra.gmra.mxu0 %vm322_vm1, %v2099_v38  ;;  %v2365_v38 = vld [vmem:[%s4104_s24] sm:$0xff] }
 0xc3d   :  { %2331 = vmatpush.msra.mxu0 %v2294_v13 }
 0xc3f   :  { %2332 = vmatpush.msra.mxu0 %v2293_v14 }
 0xcb9   :  { %v2122_v25 = vpop.f32.mrf.mxu0 }
 0xcba   :  { %v2123_v26 = vadd.f32 %v2122_v25, %v3929_v9  ;;  %v2269_v25 = vlaneseq }
 0xcbc   :  { %2146 = vrot.lane.b32.xlu1 %v2123_v26, %s3095_s13  ;;  %v2125_v27 = vadd.f32 %v2123_v26, %v2102_v62  ;;  %v3993_v26 = vand.u32 127, %v2269_v25 }
 0xcbe   :  { %v2678_v63 = vmul.f32 -1.442695, %v2125_v27 }
 0xcc0   :  { %2796 = vpow2.f32 %v2678_v63 }
 0xcc6   :  { %v2797_v28 = vpop.eup %2796 }
 0xcc7   :  { %v2129_v29 = vadd.f32 1.0, %v2797_v28 }
 0xcc9   :  { %2798 = vrcp.f32 %v2129_v29  ;;  %v2141_v35 = vand.u32 2147483648, %v2129_v29  ;;  %vm2135_vm14 = vweird.f32 %v2129_v29  ;;  %v2139_v36 = vand.u32 2147483647, %v2129_v29 }
 0xccb   :  { %v2142_v18 = vor.u32 1.1754944e-38, %v2141_v35  ;;  %vm2140_vm3 = vcmp.eq.f32.partialorder %v2139_v36, 8.507059e+37 }
 0xccf   :  { %v2799_v30 = vpop.eup %2798 }
 0xcd0   :  { %v2131_v31 = vmul.f32 %v2799_v30, %v2129_v29  ;;  %vm2136_vm13 = vweird.f32 %v2799_v30 }
 0xcd1   :  { %vm2137_vm15 = vmor %vm2135_vm14, %vm2136_vm13 }
 0xcd2   :  { %v2132_v32 = vsub.f32 1.0, %v2131_v31 }
 0xcd4   :  { %v2133_v4 = vmul.f32 %v2799_v30, %v2132_v32 }
 0xcd6   :  { %v2134_v34 = vadd.f32 %v2799_v30, %v2133_v4  ;;  %v2775_v4 = vld [vmem:[#allocation16] ss:$0 sm:$0xff] }
 0xcd8   :  { %v2138_v9 = vsel %vm2137_vm15, %v2799_v30, %v2134_v34 }
 0xcd9   :  { %v2143_v40 = vsel %vm2140_vm3, %v2142_v18, %v2138_v9  ;;  %v2398_v18 = vld [vmem:[%s3338_s21 + $0x8] sm:$0xff] }
 0xcda   :  { %v2156_v42 = vsub.f32 1.0, %v2143_v40  ;;  %v2162_v44 = vmul.f32 %v2143_v40, %v2096_v58  ;;  %v2366_v58 = vld [vmem:[%s4104_s24 + $0x8] sm:$0xff] }
 0xd2e   :  { %v2147_v39 = vpop.permute.xlu1 %2146 }
 0xd2f   :  { %v2149_v41 = vmul.f32 %v2147_v39, %v2143_v40  ;;  %v2397_v39 = vld [vmem:[%s3338_s21] sm:$0xff]  ;;  %v2776_v40 = vld [vmem:[#allocation17] ss:$0 sm:$0xff]  ;;  %s3099_s21 = smov [#allocation19]  }
 0xd30   :  { %s2461_s20 = sshll.u32 %s3099_s21, 4  ;;  %s2462_s20 = int_to_ptr.vmem [resolvable:$true] %s2461_s20 }
 0xd31   :  { %2151 = vrot.lane.b32.xlu2 %v2149_v41, %s3095_s13 }
 0xd8b   :  { %v2152_v33 = vpop.permute.xlu2 %2151 }
 0xd8c   :  { %v2154_v56 = vadd.f32 %v2152_v33, %v2102_v62  ;;  %v2774_v62 = vld [vmem:[#allocation14] ss:$0 sm:$0xff] }
 0xd8e   :  { %2800 = vtanh.f32 %v2154_v56 }
 0xd94   :  { %v2801_v10 = vpop.eup %2800 }
 0xd95   :  { %2158 = vrot.lane.b32.xlu0 %v2801_v10, %s3096_s22  ;;  %v3098_v10 = vmov 0  }
 0xd96   :  { %2759 = vset.pattern.permute.xlu0 %v3098_v10 }
 0xe07   :  { %v2159_v43 = vpop.permute.xlu0 %2158 }
 0xe08   :  { %v2161_v45 = vmul.f32 %v2159_v43, %v2156_v42  ;;  %v2777_v42 = vld [vmem:[#allocation4] ss:$0 sm:$0xff] }
 0xe0a   :  { %v2163_v46 = vadd.f32 %v2162_v44, %v2161_v45 }
 0xe0c   :  { %2165 = vrot.lane.b32.xlu1 %v2163_v46, %s3096_s22 }
 0xe7e   :  { %v2166_v5 = vpop.permute.xlu1 %2165 }
 0xe7f   :  { %2168 = vst.msk [vmem:[#allocation3 + $0x3] sm:$0x1] %vm1966_vm2, %v2166_v5 }
 0xe80   :  { %2453 = vst.msk [vmem:[#allocation19] sm:$0x1] %vm1966_vm2, %v2166_v5  ;;  %vm2272_vm2 = vcmp.lt.s32.totalorder %v3993_v26, 7 }
 0xe86   :  { %v2169_v6 = vld [vmem:[#allocation3] sm:$0xf] }
 0xe87   :  { %2679 = vmatmul.msk.f32.vlgmr.msrb.gmra.mxu3 %vm322_vm1, %v2169_v6 }
 0xe88   :  { %2311 = vmatpush.msrb.mxu3 %v2296_v52 }
 0xe8a   :  { %2312 = vmatpush.msrb.mxu3 %v2295_v59 }
 0xf0a   :  { %v2198_v20 = vpop.f32.mrf.mxu3 }
 0xf0b   :  { %v2199_v49 = vadd.f32 %v2772_v19, %v2198_v20 }
 0xf0d   :  { %v2201_v3 = vmax.f32 %v2199_v49, 0.0 }
 0xf0f   :  { %2680 = vmatmul.msk.f32.vlgmr.msrb.gmra.mxu0 %vm1084_vm7, %v2201_v3  ;;  %vm2271_vm7 = vcmp.ge.s32.totalorder %v3993_v26, 3 }
 0xf17   :  { %2683 = vmatmul.msk.f32.vlgmr.msra.gmra.mxu0 %vm415_vm4, %v3578_v16  ;;  %v2368_v16 = vld [vmem:[%s4104_s24 + $0x18] sm:$0xff] }
 0xf18   :  { %2388 = vmatpush.msrb.mxu0 %v2368_v16 }
 0xf1a   :  { %2389 = vmatpush.msrb.mxu0 %v2367_v57 }
 0xf1c   :  { %2390 = vmatpush.msrb.mxu0 %v2366_v58 }
 0xf1e   :  { %2391 = vmatpush.msrb.mxu0 %v2365_v38 }
 0xf8c   :  { %v2234_v54 = vpop.f32.mrf.mxu0 }
 0xf8d   :  { %v2235_v23 = vadd.f32 %v2773_v53, %v2234_v54 }
 0xf8f   :  { %v2237_v12 = vmax.f32 %v2235_v23, 0.0 }
 0xf91   :  { %2681 = vmatmul.msk.f32.vlgmr.msra.gmra.mxu3 %vm322_vm1, %v2237_v12 }
 0xf92   :  { %2353 = vmatpush.msra.mxu3 %v2337_v24 }
 0xf94   :  { %v2334_v31 = vpop.f32.mrf.mxu0 }
 0xf99   :  { %2682 = vmatmul.msk.f32.vlgmr.msrb.gmra.mxu3 %vm415_vm4, %v3723_v37 }
 0xf9a   :  { %2420 = vmatpush.msrb.mxu3 %v2398_v18 }
 0xf9c   :  { %2421 = vmatpush.msrb.mxu3 %v2397_v39 }
 0xfa1   :  { %2684 = vmatmul.msk.f32.vlgmr.msra.gmra.mxu3 %vm384_vm0, %v3783_v22  ;;  %vm3999_vm0 = vmand %vm2271_vm7, %vm2272_vm2 }
0x1014   :  { %v2266_v37 = vpop.f32.mrf.mxu3 }
0x1015   :  { %v3997_v27 = vadd.f32 %v2774_v62, %v2266_v37 }
0x1017   :  { %v2274_v63 = vmul.f32 %v3997_v27, %v3997_v27 }
0x1019   :  { %v2275_v28 = vsel %vm3999_vm0, %v2274_v63, 0.0 }
0x101a   :  { %v2277_v29 = vsel %vm2276_vm5, %v2275_v28, 0.0 }
0x101b   :  { %2278 = vadd.xlane.f32.xlu2 %v2277_v29 }
0x101c   :  { %v2314_v30 = vpop.f32.mrf.mxu3 }
0x101d   :  { %v2335_v32 = vadd.f32 %v2334_v31, %v2314_v30 }
0x1024   :  { %v2355_v34 = vpop.f32.mrf.mxu3 }
0x1025   :  { %v2358_v35 = vadd.f32 %v2355_v34, %v2335_v32 }
0x1027   :  { %v2363_v36 = vadd.f32 %v2775_v4, %v2358_v35 }
0x1029   :  { %v2364_v9 = vmax.f32 %v2363_v36, 0.0 }
0x102b   :  { %2685 = vmatmul.msk.f32.vlgmr.msrb.gmra.mxu0 %vm322_vm1, %v2364_v9 }
0x10a8   :  { %v2393_v41 = vpop.f32.mrf.mxu0 }
0x10a9   :  { %v2394_v33 = vadd.f32 %v2776_v40, %v2393_v41 }
0x10ab   :  { %v2396_v56 = vmax.f32 %v2394_v33, 0.0 }
0x10ad   :  { %2686 = vmatmul.msk.f32.vlgmr.msrb.gmra.mxu3 %vm415_vm4, %v2396_v56 }
0x1130   :  { %v2423_v43 = vpop.f32.mrf.mxu3 }
0x1131   :  { %v2424_v44 = vadd.f32 %v2777_v42, %v2423_v43 }
0x1133   :  { %v2687_v45 = vmul.f32 -1.442695, %v2424_v44 }
0x1135   :  { %2802 = vpow2.f32 %v2687_v45 }
0x113b   :  { %v2803_v46 = vpop.eup %2802 }
0x113c   :  { %v2429_v48 = vadd.f32 1.0, %v2803_v46 }
0x113e   :  { %2804 = vrcp.f32 %v2429_v48 }
0x1144   :  { %v2805_v17 = vpop.eup %2804 }
0x1145   :  { %3025 = shalt.err (!%p3022_p2)
}
0x1146   :  { %2466 = dma.vmem_to_hbm [thread:$0]  %s2462_s20, 16, %s2464_s1, [#allocation7]   ;;  %v2431_v50 = vmul.f32 %v2805_v17, %v2429_v48  ;;  %v2441_v55 = vand.u32 2147483648, %v2429_v48  ;;  %vm2436_vm1 = vweird.f32 %v2805_v17  ;;  %v2439_v61 = vand.u32 2147483647, %v2429_v48  ;;  %v2279_v7 = vpop.xlane.xlu2 %2278 }
0x1147   :  { %vm2435_vm4 = vweird.f32 %v2429_v48  ;;  %v2280_v8 = vadd.f32 1e-08, %v2279_v7  ;;  %vm2445_vm12 = vcmp.eq.s32.totalorder %v3993_v26, 7 }
0x1148   :  { %v2432_v51 = vsub.f32 1.0, %v2431_v50  ;;  %vm2437_vm6 = vmor %vm2435_vm4, %vm2436_vm1  ;;  %v2442_v2 = vor.u32 1.1754944e-38, %v2441_v55  ;;  %vm2440_vm8 = vcmp.eq.f32.partialorder %v2439_v61, 8.507059e+37 }
0x1149   :  { %2806 = vrsqrt.f32 %v2280_v8  ;;  %vm2287_vm10 = vweird.f32 %v2280_v8 }
0x114a   :  { %v2433_v60 = vmul.f32 %v2805_v17, %v2432_v51 }
0x114c   :  { %v2434_v1 = vadd.f32 %v2805_v17, %v2433_v60 }
0x114e   :  { %v2438_v5 = vsel %vm2437_vm6, %v2805_v17, %v2434_v1 }
0x114f   :  { %v2443_v6 = vsel %vm2440_vm8, %v2442_v2, %v2438_v5  ;;  %v2807_v11 = vpop.eup %2806 }
0x1150   :  { %2448 = vperm.xlu0 %2759, %v2443_v6   ;;  %v2282_v13 = vmul.f32 %v2807_v11, %v2280_v8  ;;  %vm2288_vm9 = vweird.f32 %v2807_v11 }
0x1151   :  { %vm2289_vm11 = vmor %vm2287_vm10, %vm2288_vm9 }
0x1152   :  { %v2283_v14 = vmul.f32 %v2807_v11, %v2282_v13 }
0x1154   :  { %v2284_v15 = vmul.f32 0.5, %v2283_v14 }
0x1156   :  { %v2285_v47 = vsub.f32 1.5, %v2284_v15 }
0x1158   :  { %v2286_v19 = vmul.f32 %v2807_v11, %v2285_v47 }
0x115a   :  { %v2290_v20 = vsel %vm2289_vm11, %v2807_v11, %v2286_v19 }
0x115b   :  { %v2291_v49 = vmul.f32 %v2290_v20, %v3997_v27 }
0x115d   :  { %v2292_v21 = vsel %vm3999_vm0, %v2291_v49, %v3997_v27 }
0x11c2   :  { %v2449_v3 = vpop.permute.xlu0 %2448 }
0x11c3   :  { %v2451_v0 = vsel %vm2445_vm12, %v2449_v3, %v2292_v21 }
0x11c4   :  { %2452 = vst.msk [vmem:[%s3346_s4] sm:$0xf] %vm2276_vm5, %v2451_v0 }
0x11c5   :  { %3036 = dma.done.wait [#allocation7], 16  }
0x11c6   :  { %3037 = vsyncadd [#allocation7], 4294967280 }
0x11c7   :  { %2473 = vsyncpa [#allocation6], 1 }
0x11c8   :  { %2474 = vsyncpa [#allocation9], 1 }
0x11c9   :  { %2475 = vsyncpa [#allocation12], 1 }
0x11ca   :  { %2476 = vsyncpa [#allocation15], 1 }
0x11cb   :  { %2477 = vsyncpa [#allocation18], 1 }
0x11cc   :  { %2478 = vsyncpa [#allocation7], 1 }

</bundles_post_ra>
